<compile_context>
chip_gen: v7x
topology: tpu7x:2x2x1
jax: 0.10.0
libtpu: 0.0.40
codegen_flags: <defaults>
</compile_context>

<pallas_src>
import functools

import jax
import jax.numpy as jnp
import numpy as np
from jax import lax
from jax.experimental import pallas as pl
from jax.experimental.pallas import tpu as pltpu

NEG_SLOPE = 0.2      # LeakyReLU(0.2)
LANE = 128           # final output channels padded to a lane multiple


def _round_up(x, m):
    return (x + m - 1) // m * m


def _lrelu(v):
    return jnp.where(v >= 0, v, NEG_SLOPE * v)


def _padded_tile_bytes(shape, dtype):
    """VMEM footprint of one block including (sublane, lane) tile padding."""
    itemsize = np.dtype(dtype).itemsize
    sublane = max(8, 32 // itemsize)            # 8 (f32), 16 (bf16)
    dims = [int(d) for d in shape if d is not None]
    if len(dims) >= 1:
        dims[-1] = _round_up(dims[-1], LANE)
    if len(dims) >= 2:
        dims[-2] = _round_up(dims[-2], sublane)
    return int(np.prod(dims)) * itemsize


def _vmem_cap_bytes():
    """Generation-aware scoped-VMEM ceiling (v5e/v6e: 128 MiB, v7x: 64 MiB)."""
    try:
        cap = int(pltpu.get_tpu_info().vmem_capacity_bytes)
        return max(min(cap * 3 // 4, 100 << 20), 16 << 20)
    except Exception:
        return 48 << 20                          # conservative fallback


# ---------------------------------------------------------------------------
# Pallas kernels
# ---------------------------------------------------------------------------
def _build_lhs(x_refs, *, s, Ho, Wo):
    """Build the 27-tap LHS (Ho*Wo, 27*C): tap-major, channel-minor columns.

    x_refs : three refs (kd = 0,1,2), each (s*s, Hq, Wq, C) bf16,
             holding the stride-phase-decomposed padded input depth plane.
    """
    views = []
    for xr in x_refs:                            # kd = 0, 1, 2
        planes = {}
        for kh in range(3):
            for kw in range(3):
                ph, pw = kh % s, kw % s
                qh, qw = kh // s, kw // s
                pidx = ph * s + pw
                if pidx not in planes:
                    planes[pidx] = xr[pidx]      # (Hq, Wq, C), loaded once/phase
                a = planes[pidx]
                views.append(a[qh:qh + Ho, qw:qw + Wo, :])
    c = views[0].shape[-1]
    lhs = jnp.concatenate(views, axis=-1)        # (Ho, Wo, 27*C)
    return lhs.reshape(Ho * Wo, 27 * c)


def _conv_kernel(x0, x1, x2, w_ref, b_ref, o_ref, *, s, Ho, Wo):
    # out = leaky_relu(conv3x3x3(x) + b)
    lhs = _build_lhs((x0, x1, x2), s=s, Ho=Ho, Wo=Wo)
    acc = jnp.dot(lhs, w_ref[...], preferred_element_type=jnp.float32)
    o_ref[...] = _lrelu(acc + b_ref[...]).astype(o_ref.dtype)


def _conv_add_kernel(x0, x1, x2, w_ref, b_ref, r_ref, o_ref, *, s, Ho, Wo, pad_c):
    # out = leaky_relu(conv3x3x3(x) + b + r)            (identity shortcut)
    lhs = _build_lhs((x0, x1, x2), s=s, Ho=Ho, Wo=Wo)
    acc = jnp.dot(lhs, w_ref[...], preferred_element_type=jnp.float32)
    r = r_ref[...].astype(jnp.float32)
    if pad_c:                                    # zero-extend to padded Cout
        r = jnp.concatenate(
            [r, jnp.zeros((r.shape[0], pad_c), jnp.float32)], axis=-1)
    o_ref[...] = _lrelu(acc + b_ref[...] + r).astype(o_ref.dtype)


def _conv_proj_kernel(x0, x1, x2, w_ref, b_ref, r_ref, ws_ref, o_ref, *, s, Ho, Wo):
    # out = leaky_relu(conv3x3x3(x) + (b + b_sc) + r @ W_sc)   (1x1 projection)
    lhs = _build_lhs((x0, x1, x2), s=s, Ho=Ho, Wo=Wo)
    acc = jnp.dot(lhs, w_ref[...], preferred_element_type=jnp.float32)
    sc = jnp.dot(r_ref[...], ws_ref[...], preferred_element_type=jnp.float32)
    o_ref[...] = _lrelu(acc + b_ref[...] + sc).astype(o_ref.dtype)


# ---------------------------------------------------------------------------
# Fused conv wrapper (3x3x3, padding=1, arbitrary stride)
# ---------------------------------------------------------------------------
def _x_index(n, d, *, Dp, s, kd):
    return (n * Dp + d * s + kd, 0, 0, 0, 0)


def _fused_conv3x3(x_cl, w_k, bias, *, stride, out_dtype,
                   residual=None, w_sc=None):
    """3x3x3 conv (pad=1, given stride) + bias [+ shortcut] + LeakyReLU.

    x_cl     : (N, Din, Hin, Win, Cin)  channels-last activation (any float)
    w_k      : (27*Cin, Co) bf16        packed weight, row = tap*Cin + cin
    bias     : (Co,) f32
    residual : None
             | (N, Do, Ho*Wo, Cr) bf16, Cr <= Co          (identity add)
             | (N, Do, Ho*Wo, Cr) bf16 with w_sc=(Cr, Co) (1x1 projection)
    returns  : (N, Do, Ho, Wo, Co) out_dtype
    """
    N, Din, Hin, Win, Cin = x_cl.shape
    s = int(stride)
    Kdim, Co = w_k.shape
    assert Kdim == 27 * Cin

    Do = (Din - 1) // s + 1
    Ho = (Hin - 1) // s + 1
    Wo = (Win - 1) // s + 1
    Dp = s * (Do - 1) + 3
    Hp = s * (Ho - 1) + 3
    Wp = s * (Wo - 1) + 3
    Hq = -(-Hp // s)
    Wq = -(-Wp // s)
    ss = s * s

    # Pad spatially (+1 each side), trim to the exact extent the conv reads,
    # then de-interleave the H/W stride phases so every tap is a static
    # contiguous slice inside the kernel (for s == 1 this is a pure reshape).
    xp = jnp.pad(x_cl.astype(jnp.bfloat16),
                 ((0, 0), (1, 1), (1, 1), (1, 1), (0, 0)))[:, :Dp, :Hp, :Wp, :]
    xp = jnp.pad(xp, ((0, 0), (0, 0), (0, s * Hq - Hp), (0, s * Wq - Wp), (0, 0)))
    xp = xp.reshape(N, Dp, Hq, s, Wq, s, Cin)
    xp = xp.transpose(0, 1, 3, 5, 2, 4, 6).reshape(N * Dp, ss, Hq, Wq, Cin)

    # Three depth-shifted views of the same array replace the old kd grid axis.
    x_specs = [
        pl.BlockSpec((None, ss, Hq, Wq, Cin),
                     functools.partial(_x_index, Dp=Dp, s=s, kd=kd))
        for kd in range(3)
    ]
    w_spec = pl.BlockSpec(w_k.shape, lambda n, d: (0, 0))        # VMEM-resident
    b_spec = pl.BlockSpec((1, Co), lambda n, d: (0, 0))          # VMEM-resident
    out_spec = pl.BlockSpec((None, None, Ho * Wo, Co), lambda n, d: (n, d, 0, 0))

    inputs = [xp, xp, xp, w_k, bias.reshape(1, Co).astype(jnp.float32)]
    in_specs = list(x_specs) + [w_spec, b_spec]

    flops = 2 * N * Do * Ho * Wo * Kdim * Co
    bytes_accessed = (3 * N * Do * ss * Hq * Wq * Cin * 2
                      + w_k.size * 2 + Co * 4
                      + N * Do * Ho * Wo * Co * np.dtype(out_dtype).itemsize)

    # VMEM budget with (sublane, lane) tile padding of every block.
    vmem_need = (3 * 2 * _padded_tile_bytes((ss, Hq, Wq, Cin), jnp.bfloat16)
                 + 2 * _padded_tile_bytes(w_k.shape, jnp.bfloat16)
                 + 2 * _padded_tile_bytes((1, Co), jnp.float32)
                 + 2 * _padded_tile_bytes((Ho * Wo, Co), out_dtype)
                 + _padded_tile_bytes((Ho * Wo, Kdim), jnp.bfloat16)   # lhs temp
                 + 2 * _padded_tile_bytes((Ho * Wo, Co), jnp.float32))  # f32 acc

    if residual is None:
        kern = functools.partial(_conv_kernel, s=s, Ho=Ho, Wo=Wo)
    else:
        Cr = residual.shape[-1]
        r_spec = pl.BlockSpec((None, None, Ho * Wo, Cr), lambda n, d: (n, d, 0, 0))
        inputs.append(residual)
        in_specs.append(r_spec)
        bytes_accessed += residual.size * residual.dtype.itemsize
        vmem_need += 2 * _padded_tile_bytes((Ho * Wo, Cr), residual.dtype)
        if w_sc is None:
            kern = functools.partial(_conv_add_kernel, s=s, Ho=Ho, Wo=Wo,
                                     pad_c=Co - Cr)
        else:
            ws_spec = pl.BlockSpec(w_sc.shape, lambda n, d: (0, 0))
            inputs.append(w_sc)
            in_specs.append(ws_spec)
            flops += 2 * N * Do * Ho * Wo * Cr * Co
            bytes_accessed += w_sc.size * 2
            vmem_need += 2 * _padded_tile_bytes(w_sc.shape, jnp.bfloat16)
            kern = functools.partial(_conv_proj_kernel, s=s, Ho=Ho, Wo=Wo)

    cap = _vmem_cap_bytes()
    vmem_limit = int(min(max(int(1.5 * vmem_need), 32 << 20, vmem_need), cap))
    # TODO(synk): if vmem_need > cap (huge planes on v7x), tile Ho with a halo.

    out = pl.pallas_call(
        kern,
        out_shape=jax.ShapeDtypeStruct((N, Do, Ho * Wo, Co), out_dtype),
        grid=(N, Do),
        in_specs=in_specs,
        out_specs=out_spec,
        compiler_params=pltpu.CompilerParams(
            dimension_semantics=("parallel", "parallel"),
            vmem_limit_bytes=vmem_limit),
        cost_estimate=pl.CostEstimate(flops=int(flops), transcendentals=0,
                                      bytes_accessed=int(bytes_accessed)),
    )(*inputs)
    return out.reshape(N, Do, Ho, Wo, Co)


# ---------------------------------------------------------------------------
# Parameter setup: spectral norm (plain JAX, runs once) + weight packing
# ---------------------------------------------------------------------------
def _l2n(v, eps=1e-12):
    return v / (jnp.linalg.norm(v) + eps)


def _spectral_norm_weight(w, key):
    # One power iteration from a deterministic random u (training-mode
    # forward_pre_hook semantics: w_sn = w / sigma).  RNG differs from torch,
    # so this is self-consistent rather than bit-matching a torch state.
    cout = w.shape[0]
    wm = w.reshape(cout, -1)
    u = _l2n(jax.random.normal(key, (cout,), jnp.float32))
    v = _l2n(wm.T @ u)
    u = _l2n(wm @ v)
    sigma = jnp.sum(u * (wm @ v))
    return w / sigma


def _pack_conv3_weight(w_sn, cout_pad):
    # (Cout, Cin, 3, 3, 3) f32 -> (27*Cin, Cout_pad) bf16,
    # row index = (kd*9 + kh*3 + kw)*Cin + cin  (matches the in-kernel LHS).
    cout, cin = w_sn.shape[0], w_sn.shape[1]
    wk = jnp.transpose(w_sn, (2, 3, 4, 1, 0)).reshape(27 * cin, cout)
    wk = jnp.pad(wk, ((0, 0), (0, cout_pad - cout)))
    return wk.astype(jnp.bfloat16)


# ---------------------------------------------------------------------------
# ResidualBlock3D
# ---------------------------------------------------------------------------
class ResidualBlock3DPallas:
    def __init__(self, in_channels, out_channels, stride=1, key=None):
        self.cin, self.cout, self.stride = in_channels, out_channels, int(stride)
        self.coutp = _round_up(out_channels, LANE)
        self.has_shortcut = (stride != 1) or (in_channels != out_channels)
        key = jax.random.PRNGKey(0) if key is None else key
        ks = jax.random.split(key, 9)

        def init_conv(kw_, kb_, co, ci, k):
            fan_in = ci * k * k * k
            w = jax.random.normal(kw_, (co, ci, k, k, k), jnp.float32) / np.sqrt(fan_in)
            b = jax.random.normal(kb_, (co,), jnp.float32) * 0.01
            return w, b

        w1, self.b1 = init_conv(ks[0], ks[1], out_channels, in_channels, 3)
        w2, self.b2 = init_conv(ks[2], ks[3], out_channels, out_channels, 3)
        self.w1 = _spectral_norm_weight(w1, ks[4])   # f32 copies kept for reference()
        self.w2 = _spectral_norm_weight(w2, ks[5])

        # conv1 emits its REAL Cout channels (right-sized bf16 intermediate);
        # conv2 reduces over the real 27*Cout and emits lane-padded Coutp for a
        # dense final store / full MXU N.  Built ONCE here, not per call.
        self.w1k = _pack_conv3_weight(self.w1, out_channels)
        self.w2k = _pack_conv3_weight(self.w2, self.coutp)
        pad_c = self.coutp - out_channels

        if self.has_shortcut:
            wsc, self.bsc = init_conv(ks[6], ks[7], out_channels, in_channels, 1)
            self.wsc = _spectral_norm_weight(wsc, ks[8])
            self.wsck = jnp.pad(self.wsc.reshape(out_channels, in_channels).T,
                                ((0, 0), (0, pad_c))).astype(jnp.bfloat16)
            # Fold conv2 bias and shortcut bias into one epilogue vector.
            self.b2p = jnp.pad(self.b2 + self.bsc, (0, pad_c))
        else:
            self.wsc, self.bsc, self.wsck = None, None, None
            self.b2p = jnp.pad(self.b2, (0, pad_c))

    def __call__(self, x):
        # x: (N, Cin, D, H, W) float32 (PyTorch NCDHW interface)
        N, Cin, D, H, W = x.shape
        s = self.stride
        x_cl = jnp.transpose(x, (0, 2, 3, 4, 1))   # -> channels-last, once

        # conv1 (stride s) + bias + LeakyReLU -> bf16 intermediate, real Cout ch.
        out1 = _fused_conv3x3(x_cl, self.w1k, self.b1, stride=s,
                              out_dtype=jnp.bfloat16)
        _, Do, Ho, Wo, _ = out1.shape

        # conv2 (stride 1) + shortcut + add + LeakyReLU, fused in one kernel.
        if self.has_shortcut:
            r = x_cl[:, ::s, ::s, ::s, :].astype(jnp.bfloat16)
            r = r.reshape(N, Do, Ho * Wo, Cin)
            out2 = _fused_conv3x3(out1, self.w2k, self.b2p, stride=1,
                                  out_dtype=jnp.float32,
                                  residual=r, w_sc=self.wsck)
        else:
            r = x_cl.astype(jnp.bfloat16).reshape(N, D, H * W, Cin)
            out2 = _fused_conv3x3(out1, self.w2k, self.b2p, stride=1,
                                  out_dtype=jnp.float32, residual=r)

        # Drop channel padding; back to NCDHW only at the module boundary.
        return jnp.transpose(out2[..., :self.cout], (0, 4, 1, 2, 3))

    # pure-JAX f32 reference (lax conv) for correctness checking
    def reference(self, x):
        def conv3d(x_, w, b, stride, pad):
            out = lax.conv_general_dilated(
                x_, w, window_strides=(stride,) * 3,
                padding=[(pad, pad)] * 3,
                dimension_numbers=("NCDHW", "OIDHW", "NCDHW"))
            return out + b.reshape(1, -1, 1, 1, 1)

        lrelu = lambda t: jnp.where(t >= 0, t, NEG_SLOPE * t)
        out = lrelu(conv3d(x, self.w1, self.b1, self.stride, 1))
        out = conv3d(out, self.w2, self.b2, 1, 1)
        sc = conv3d(x, self.wsc, self.bsc, self.stride, 0) if self.has_shortcut else x
        return lrelu(out + sc)


if __name__ == "__main__":
    key = jax.random.PRNGKey(0)
    cases = [
        # (N, Cin, Cout, D, H, W, stride)
        (2, 4, 8, 8, 8, 8, 1),   # projection shortcut (channel change), stride 1
        (2, 8, 8, 8, 8, 8, 1),   # identity shortcut
        (1, 4, 8, 8, 8, 8, 2),   # strided projection shortcut (stride-phase path)
    ]
    for (N, Cin, Cout, D, H, W, s) in cases:
        key, kx, kp = jax.random.split(key, 3)
        x = jax.random.normal(kx, (N, Cin, D, H, W), jnp.float32)
        block = ResidualBlock3DPallas(Cin, Cout, stride=s, key=kp)

        y = jax.block_until_ready(jax.jit(block.__call__)(x))
        Do, Ho, Wo = (D - 1) // s + 1, (H - 1) // s + 1, (W - 1) // s + 1
        assert y.shape == (N, Cout, Do, Ho, Wo), y.shape

        y_ref = jax.block_until_ready(block.reference(x))
        # bf16 MXU operands with f32 accumulation: a few 1e-3 absolute error.
        np.testing.assert_allclose(np.asarray(y), np.asarray(y_ref),
                                   rtol=2e-2, atol=2e-2)
    print("KERNEL_OK")
</pallas_src>

<mosaic_0001>
module attributes {stable_mosaic.version = 11 : i64} {
  func.func @_conv_kernel(%arg0: i32, %arg1: i32, %arg2: memref<1x1x10x10x4xbf16, #tpu.memory_space<vmem>>, %arg3: memref<1x1x10x10x4xbf16, #tpu.memory_space<vmem>>, %arg4: memref<1x1x10x10x4xbf16, #tpu.memory_space<vmem>>, %arg5: memref<108x8xbf16, #tpu.memory_space<vmem>>, %arg6: memref<1x8xf32, #tpu.memory_space<vmem>>, %arg7: memref<1x1x64x8xbf16, #tpu.memory_space<vmem>>) attributes {dimension_semantics = [#tpu.dimension_semantics<parallel>, #tpu.dimension_semantics<parallel>], iteration_bounds = array<i64: 2, 8>, scalar_prefetch = 0 : i64, scratch_operands = 0 : i64, tpu.core_type = #tpu.core_type<tc>, window_params = [{transform_indices = @transform_0, window_bounds = array<i64: 1, 1, 10, 10, 4>}, {transform_indices = @transform_1, window_bounds = array<i64: 1, 1, 10, 10, 4>}, {transform_indices = @transform_2, window_bounds = array<i64: 1, 1, 10, 10, 4>}, {pipeline_mode = #tpu.pipeline_mode<synchronous>, transform_indices = @transform_3, window_bounds = array<i64: 108, 8>}, {pipeline_mode = #tpu.pipeline_mode<synchronous>, transform_indices = @transform_4, window_bounds = array<i64: 1, 8>}, {transform_indices = @transform_5, window_bounds = array<i64: 1, 1, 64, 8>}]} {
    %c0 = arith.constant 0 : index
    %c0_0 = arith.constant 0 : index
    %c0_1 = arith.constant 0 : index
    %c0_2 = arith.constant 0 : index
    %c0_3 = arith.constant 0 : index
    %0 = vector.load %arg2[%c0, %c0_0, %c0_1, %c0_2, %c0_3] : memref<1x1x10x10x4xbf16, #tpu.memory_space<vmem>>, vector<1x1x10x10x4xbf16>
    %1 = vector.shape_cast %0 : vector<1x1x10x10x4xbf16> to vector<10x10x4xbf16>
    %2 = vector.extract_strided_slice %1 {offsets = [0, 0, 0], sizes = [8, 8, 4], strides = [1, 1, 1]} : vector<10x10x4xbf16> to vector<8x8x4xbf16>
    %3 = vector.extract_strided_slice %1 {offsets = [0, 1, 0], sizes = [8, 8, 4], strides = [1, 1, 1]} : vector<10x10x4xbf16> to vector<8x8x4xbf16>
    %4 = vector.extract_strided_slice %1 {offsets = [0, 2, 0], sizes = [8, 8, 4], strides = [1, 1, 1]} : vector<10x10x4xbf16> to vector<8x8x4xbf16>
    %5 = vector.extract_strided_slice %1 {offsets = [1, 0, 0], sizes = [8, 8, 4], strides = [1, 1, 1]} : vector<10x10x4xbf16> to vector<8x8x4xbf16>
    %6 = vector.extract_strided_slice %1 {offsets = [1, 1, 0], sizes = [8, 8, 4], strides = [1, 1, 1]} : vector<10x10x4xbf16> to vector<8x8x4xbf16>
    %7 = vector.extract_strided_slice %1 {offsets = [1, 2, 0], sizes = [8, 8, 4], strides = [1, 1, 1]} : vector<10x10x4xbf16> to vector<8x8x4xbf16>
    %8 = vector.extract_strided_slice %1 {offsets = [2, 0, 0], sizes = [8, 8, 4], strides = [1, 1, 1]} : vector<10x10x4xbf16> to vector<8x8x4xbf16>
    %9 = vector.extract_strided_slice %1 {offsets = [2, 1, 0], sizes = [8, 8, 4], strides = [1, 1, 1]} : vector<10x10x4xbf16> to vector<8x8x4xbf16>
    %10 = vector.extract_strided_slice %1 {offsets = [2, 2, 0], sizes = [8, 8, 4], strides = [1, 1, 1]} : vector<10x10x4xbf16> to vector<8x8x4xbf16>
    %c0_4 = arith.constant 0 : index
    %c0_5 = arith.constant 0 : index
    %c0_6 = arith.constant 0 : index
    %c0_7 = arith.constant 0 : index
    %c0_8 = arith.constant 0 : index
    %11 = vector.load %arg3[%c0_4, %c0_5, %c0_6, %c0_7, %c0_8] : memref<1x1x10x10x4xbf16, #tpu.memory_space<vmem>>, vector<1x1x10x10x4xbf16>
    %12 = vector.shape_cast %11 : vector<1x1x10x10x4xbf16> to vector<10x10x4xbf16>
    %13 = vector.extract_strided_slice %12 {offsets = [0, 0, 0], sizes = [8, 8, 4], strides = [1, 1, 1]} : vector<10x10x4xbf16> to vector<8x8x4xbf16>
    %14 = vector.extract_strided_slice %12 {offsets = [0, 1, 0], sizes = [8, 8, 4], strides = [1, 1, 1]} : vector<10x10x4xbf16> to vector<8x8x4xbf16>
    %15 = vector.extract_strided_slice %12 {offsets = [0, 2, 0], sizes = [8, 8, 4], strides = [1, 1, 1]} : vector<10x10x4xbf16> to vector<8x8x4xbf16>
    %16 = vector.extract_strided_slice %12 {offsets = [1, 0, 0], sizes = [8, 8, 4], strides = [1, 1, 1]} : vector<10x10x4xbf16> to vector<8x8x4xbf16>
    %17 = vector.extract_strided_slice %12 {offsets = [1, 1, 0], sizes = [8, 8, 4], strides = [1, 1, 1]} : vector<10x10x4xbf16> to vector<8x8x4xbf16>
    %18 = vector.extract_strided_slice %12 {offsets = [1, 2, 0], sizes = [8, 8, 4], strides = [1, 1, 1]} : vector<10x10x4xbf16> to vector<8x8x4xbf16>
    %19 = vector.extract_strided_slice %12 {offsets = [2, 0, 0], sizes = [8, 8, 4], strides = [1, 1, 1]} : vector<10x10x4xbf16> to vector<8x8x4xbf16>
    %20 = vector.extract_strided_slice %12 {offsets = [2, 1, 0], sizes = [8, 8, 4], strides = [1, 1, 1]} : vector<10x10x4xbf16> to vector<8x8x4xbf16>
    %21 = vector.extract_strided_slice %12 {offsets = [2, 2, 0], sizes = [8, 8, 4], strides = [1, 1, 1]} : vector<10x10x4xbf16> to vector<8x8x4xbf16>
    %c0_9 = arith.constant 0 : index
    %c0_10 = arith.constant 0 : index
    %c0_11 = arith.constant 0 : index
    %c0_12 = arith.constant 0 : index
    %c0_13 = arith.constant 0 : index
    %22 = vector.load %arg4[%c0_9, %c0_10, %c0_11, %c0_12, %c0_13] : memref<1x1x10x10x4xbf16, #tpu.memory_space<vmem>>, vector<1x1x10x10x4xbf16>
    %23 = vector.shape_cast %22 : vector<1x1x10x10x4xbf16> to vector<10x10x4xbf16>
    %24 = vector.extract_strided_slice %23 {offsets = [0, 0, 0], sizes = [8, 8, 4], strides = [1, 1, 1]} : vector<10x10x4xbf16> to vector<8x8x4xbf16>
    %25 = vector.extract_strided_slice %23 {offsets = [0, 1, 0], sizes = [8, 8, 4], strides = [1, 1, 1]} : vector<10x10x4xbf16> to vector<8x8x4xbf16>
    %26 = vector.extract_strided_slice %23 {offsets = [0, 2, 0], sizes = [8, 8, 4], strides = [1, 1, 1]} : vector<10x10x4xbf16> to vector<8x8x4xbf16>
    %27 = vector.extract_strided_slice %23 {offsets = [1, 0, 0], sizes = [8, 8, 4], strides = [1, 1, 1]} : vector<10x10x4xbf16> to vector<8x8x4xbf16>
    %28 = vector.extract_strided_slice %23 {offsets = [1, 1, 0], sizes = [8, 8, 4], strides = [1, 1, 1]} : vector<10x10x4xbf16> to vector<8x8x4xbf16>
    %29 = vector.extract_strided_slice %23 {offsets = [1, 2, 0], sizes = [8, 8, 4], strides = [1, 1, 1]} : vector<10x10x4xbf16> to vector<8x8x4xbf16>
    %30 = vector.extract_strided_slice %23 {offsets = [2, 0, 0], sizes = [8, 8, 4], strides = [1, 1, 1]} : vector<10x10x4xbf16> to vector<8x8x4xbf16>
    %31 = vector.extract_strided_slice %23 {offsets = [2, 1, 0], sizes = [8, 8, 4], strides = [1, 1, 1]} : vector<10x10x4xbf16> to vector<8x8x4xbf16>
    %32 = vector.extract_strided_slice %23 {offsets = [2, 2, 0], sizes = [8, 8, 4], strides = [1, 1, 1]} : vector<10x10x4xbf16> to vector<8x8x4xbf16>
    %33 = tpu.concatenate %2, %3, %4, %5, %6, %7, %8, %9, %10, %13, %14, %15, %16, %17, %18, %19 in 2 : vector<8x8x4xbf16>, vector<8x8x4xbf16>, vector<8x8x4xbf16>, vector<8x8x4xbf16>, vector<8x8x4xbf16>, vector<8x8x4xbf16>, vector<8x8x4xbf16>, vector<8x8x4xbf16>, vector<8x8x4xbf16>, vector<8x8x4xbf16>, vector<8x8x4xbf16>, vector<8x8x4xbf16>, vector<8x8x4xbf16>, vector<8x8x4xbf16>, vector<8x8x4xbf16>, vector<8x8x4xbf16> -> vector<8x8x64xbf16>
    %34 = tpu.concatenate %20, %21, %24, %25, %26, %27, %28, %29, %30, %31, %32 in 2 : vector<8x8x4xbf16>, vector<8x8x4xbf16>, vector<8x8x4xbf16>, vector<8x8x4xbf16>, vector<8x8x4xbf16>, vector<8x8x4xbf16>, vector<8x8x4xbf16>, vector<8x8x4xbf16>, vector<8x8x4xbf16>, vector<8x8x4xbf16>, vector<8x8x4xbf16> -> vector<8x8x44xbf16>
    %35 = tpu.concatenate %33, %34 in 2 : vector<8x8x64xbf16>, vector<8x8x44xbf16> -> vector<8x8x108xbf16>
    %36 = vector.shape_cast %35 : vector<8x8x108xbf16> to vector<64x108xbf16>
    %c0_14 = arith.constant 0 : index
    %c0_15 = arith.constant 0 : index
    %37 = vector.load %arg5[%c0_14, %c0_15] : memref<108x8xbf16, #tpu.memory_space<vmem>>, vector<108x8xbf16>
    %cst = arith.constant dense<0.000000e+00> : vector<64x8xf32>
    %38 = tpu.matmul %36, %37, %cst {dimension_numbers = #tpu.dot_dimension_numbers<[1], [0], [0], [1], [0, 0, 1, 1], [], []>} : vector<64x108xbf16>, vector<108x8xbf16>, vector<64x8xf32> -> vector<64x8xf32>
    %c0_16 = arith.constant 0 : index
    %c0_17 = arith.constant 0 : index
    %39 = vector.load %arg6[%c0_16, %c0_17] : memref<1x8xf32, #tpu.memory_space<vmem>>, vector<1x8xf32>
    %40 = vector.broadcast %39 : vector<1x8xf32> to vector<64x8xf32>
    %41 = arith.addf %38, %40 : vector<64x8xf32>
    %cst_18 = arith.constant 0.000000e+00 : f32
    %42 = vector.broadcast %cst_18 : f32 to vector<64x8xf32>
    %43 = arith.cmpf oge, %41, %42 : vector<64x8xf32>
    %cst_19 = arith.constant 2.000000e-01 : f32
    %44 = vector.broadcast %cst_19 : f32 to vector<64x8xf32>
    %45 = arith.mulf %44, %41 : vector<64x8xf32>
    %46 = arith.select %43, %41, %45 : vector<64x8xi1>, vector<64x8xf32>
    %47 = arith.truncf %46 : vector<64x8xf32> to vector<64x8xbf16>
    %c0_20 = arith.constant 0 : index
    %c0_21 = arith.constant 0 : index
    %c0_22 = arith.constant 0 : index
    %c0_23 = arith.constant 0 : index
    %48 = vector.load %arg7[%c0_20, %c0_21, %c0_22, %c0_23] : memref<1x1x64x8xbf16, #tpu.memory_space<vmem>>, vector<1x1x64x8xbf16>
    %49 = vector.shape_cast %48 : vector<1x1x64x8xbf16> to vector<64x8xbf16>
    %50 = vector.shape_cast %47 : vector<64x8xbf16> to vector<1x1x64x8xbf16>
    tpu.vector_store %arg7[%c0_20, %c0_21, %c0_22, %c0_23], %50 {strides = array<i32>} : memref<1x1x64x8xbf16, #tpu.memory_space<vmem>>, vector<1x1x64x8xbf16>,
    return
  }
  func.func @transform_0(%arg0: i32, %arg1: i32) -> (i32, i32, i32, i32, i32) {
    %c10_i32 = arith.constant 10 : i32
    %0 = arith.muli %arg0, %c10_i32 : i32
    %c1_i32 = arith.constant 1 : i32
    %1 = arith.muli %arg1, %c1_i32 : i32
    %2 = arith.addi %0, %1 : i32
    %c0_i32 = arith.constant 0 : i32
    %3 = arith.addi %2, %c0_i32 : i32
    %c0_i32_0 = arith.constant 0 : i32
    %c0_i32_1 = arith.constant 0 : i32
    %c0_i32_2 = arith.constant 0 : i32
    %c0_i32_3 = arith.constant 0 : i32
    %c0_i32_4 = arith.constant 0 : i32
    return %3, %c0_i32_0, %c0_i32_1, %c0_i32_2, %c0_i32_3 : i32, i32, i32, i32, i32
  }
  func.func @transform_1(%arg0: i32, %arg1: i32) -> (i32, i32, i32, i32, i32) {
    %c10_i32 = arith.constant 10 : i32
    %0 = arith.muli %arg0, %c10_i32 : i32
    %c1_i32 = arith.constant 1 : i32
    %1 = arith.muli %arg1, %c1_i32 : i32
    %2 = arith.addi %0, %1 : i32
    %c1_i32_0 = arith.constant 1 : i32
    %3 = arith.addi %2, %c1_i32_0 : i32
    %c0_i32 = arith.constant 0 : i32
    %c0_i32_1 = arith.constant 0 : i32
    %c0_i32_2 = arith.constant 0 : i32
    %c0_i32_3 = arith.constant 0 : i32
    %c0_i32_4 = arith.constant 0 : i32
    return %3, %c0_i32, %c0_i32_1, %c0_i32_2, %c0_i32_3 : i32, i32, i32, i32, i32
  }
  func.func @transform_2(%arg0: i32, %arg1: i32) -> (i32, i32, i32, i32, i32) {
    %c10_i32 = arith.constant 10 : i32
    %0 = arith.muli %arg0, %c10_i32 : i32
    %c1_i32 = arith.constant 1 : i32
    %1 = arith.muli %arg1, %c1_i32 : i32
    %2 = arith.addi %0, %1 : i32
    %c2_i32 = arith.constant 2 : i32
    %3 = arith.addi %2, %c2_i32 : i32
    %c0_i32 = arith.constant 0 : i32
    %c0_i32_0 = arith.constant 0 : i32
    %c0_i32_1 = arith.constant 0 : i32
    %c0_i32_2 = arith.constant 0 : i32
    %c0_i32_3 = arith.constant 0 : i32
    return %3, %c0_i32, %c0_i32_0, %c0_i32_1, %c0_i32_2 : i32, i32, i32, i32, i32
  }
  func.func @transform_3(%arg0: i32, %arg1: i32) -> (i32, i32) {
    %c0_i32 = arith.constant 0 : i32
    %c0_i32_0 = arith.constant 0 : i32
    %c0_i32_1 = arith.constant 0 : i32
    return %c0_i32, %c0_i32_0 : i32, i32
  }
  func.func @transform_4(%arg0: i32, %arg1: i32) -> (i32, i32) {
    %c0_i32 = arith.constant 0 : i32
    %c0_i32_0 = arith.constant 0 : i32
    %c0_i32_1 = arith.constant 0 : i32
    return %c0_i32, %c0_i32_0 : i32, i32
  }
  func.func @transform_5(%arg0: i32, %arg1: i32) -> (i32, i32, i32, i32) {
    %c0_i32 = arith.constant 0 : i32
    %c0_i32_0 = arith.constant 0 : i32
    %c0_i32_1 = arith.constant 0 : i32
    return %arg0, %arg1, %c0_i32, %c0_i32_0 : i32, i32, i32, i32
  }
}

module attributes {stable_mosaic.version = 11 : i64} {
  func.func @_conv_proj_kernel(%arg0: i32, %arg1: i32, %arg2: memref<1x1x10x10x8xbf16, #tpu.memory_space<vmem>>, %arg3: memref<1x1x10x10x8xbf16, #tpu.memory_space<vmem>>, %arg4: memref<1x1x10x10x8xbf16, #tpu.memory_space<vmem>>, %arg5: memref<216x128xbf16, #tpu.memory_space<vmem>>, %arg6: memref<1x128xf32, #tpu.memory_space<vmem>>, %arg7: memref<1x1x64x4xbf16, #tpu.memory_space<vmem>>, %arg8: memref<4x128xbf16, #tpu.memory_space<vmem>>, %arg9: memref<1x1x64x128xf32, #tpu.memory_space<vmem>>) attributes {dimension_semantics = [#tpu.dimension_semantics<parallel>, #tpu.dimension_semantics<parallel>], iteration_bounds = array<i64: 2, 8>, scalar_prefetch = 0 : i64, scratch_operands = 0 : i64, tpu.core_type = #tpu.core_type<tc>, window_params = [{transform_indices = @transform_0, window_bounds = array<i64: 1, 1, 10, 10, 8>}, {transform_indices = @transform_1, window_bounds = array<i64: 1, 1, 10, 10, 8>}, {transform_indices = @transform_2, window_bounds = array<i64: 1, 1, 10, 10, 8>}, {pipeline_mode = #tpu.pipeline_mode<synchronous>, transform_indices = @transform_3, window_bounds = array<i64: 216, 128>}, {pipeline_mode = #tpu.pipeline_mode<synchronous>, transform_indices = @transform_4, window_bounds = array<i64: 1, 128>}, {transform_indices = @transform_5, window_bounds = array<i64: 1, 1, 64, 4>}, {pipeline_mode = #tpu.pipeline_mode<synchronous>, transform_indices = @transform_6, window_bounds = array<i64: 4, 128>}, {transform_indices = @transform_7, window_bounds = array<i64: 1, 1, 64, 128>}]} {
    %c0 = arith.constant 0 : index
    %c0_0 = arith.constant 0 : index
    %c0_1 = arith.constant 0 : index
    %c0_2 = arith.constant 0 : index
    %c0_3 = arith.constant 0 : index
    %0 = vector.load %arg2[%c0, %c0_0, %c0_1, %c0_2, %c0_3] : memref<1x1x10x10x8xbf16, #tpu.memory_space<vmem>>, vector<1x1x10x10x8xbf16>
    %1 = vector.shape_cast %0 : vector<1x1x10x10x8xbf16> to vector<10x10x8xbf16>
    %2 = vector.extract_strided_slice %1 {offsets = [0, 0, 0], sizes = [8, 8, 8], strides = [1, 1, 1]} : vector<10x10x8xbf16> to vector<8x8x8xbf16>
    %3 = vector.extract_strided_slice %1 {offsets = [0, 1, 0], sizes = [8, 8, 8], strides = [1, 1, 1]} : vector<10x10x8xbf16> to vector<8x8x8xbf16>
    %4 = vector.extract_strided_slice %1 {offsets = [0, 2, 0], sizes = [8, 8, 8], strides = [1, 1, 1]} : vector<10x10x8xbf16> to vector<8x8x8xbf16>
    %5 = vector.extract_strided_slice %1 {offsets = [1, 0, 0], sizes = [8, 8, 8], strides = [1, 1, 1]} : vector<10x10x8xbf16> to vector<8x8x8xbf16>
    %6 = vector.extract_strided_slice %1 {offsets = [1, 1, 0], sizes = [8, 8, 8], strides = [1, 1, 1]} : vector<10x10x8xbf16> to vector<8x8x8xbf16>
    %7 = vector.extract_strided_slice %1 {offsets = [1, 2, 0], sizes = [8, 8, 8], strides = [1, 1, 1]} : vector<10x10x8xbf16> to vector<8x8x8xbf16>
    %8 = vector.extract_strided_slice %1 {offsets = [2, 0, 0], sizes = [8, 8, 8], strides = [1, 1, 1]} : vector<10x10x8xbf16> to vector<8x8x8xbf16>
    %9 = vector.extract_strided_slice %1 {offsets = [2, 1, 0], sizes = [8, 8, 8], strides = [1, 1, 1]} : vector<10x10x8xbf16> to vector<8x8x8xbf16>
    %10 = vector.extract_strided_slice %1 {offsets = [2, 2, 0], sizes = [8, 8, 8], strides = [1, 1, 1]} : vector<10x10x8xbf16> to vector<8x8x8xbf16>
    %c0_4 = arith.constant 0 : index
    %c0_5 = arith.constant 0 : index
    %c0_6 = arith.constant 0 : index
    %c0_7 = arith.constant 0 : index
    %c0_8 = arith.constant 0 : index
    %11 = vector.load %arg3[%c0_4, %c0_5, %c0_6, %c0_7, %c0_8] : memref<1x1x10x10x8xbf16, #tpu.memory_space<vmem>>, vector<1x1x10x10x8xbf16>
    %12 = vector.shape_cast %11 : vector<1x1x10x10x8xbf16> to vector<10x10x8xbf16>
    %13 = vector.extract_strided_slice %12 {offsets = [0, 0, 0], sizes = [8, 8, 8], strides = [1, 1, 1]} : vector<10x10x8xbf16> to vector<8x8x8xbf16>
    %14 = vector.extract_strided_slice %12 {offsets = [0, 1, 0], sizes = [8, 8, 8], strides = [1, 1, 1]} : vector<10x10x8xbf16> to vector<8x8x8xbf16>
    %15 = vector.extract_strided_slice %12 {offsets = [0, 2, 0], sizes = [8, 8, 8], strides = [1, 1, 1]} : vector<10x10x8xbf16> to vector<8x8x8xbf16>
    %16 = vector.extract_strided_slice %12 {offsets = [1, 0, 0], sizes = [8, 8, 8], strides = [1, 1, 1]} : vector<10x10x8xbf16> to vector<8x8x8xbf16>
    %17 = vector.extract_strided_slice %12 {offsets = [1, 1, 0], sizes = [8, 8, 8], strides = [1, 1, 1]} : vector<10x10x8xbf16> to vector<8x8x8xbf16>
    %18 = vector.extract_strided_slice %12 {offsets = [1, 2, 0], sizes = [8, 8, 8], strides = [1, 1, 1]} : vector<10x10x8xbf16> to vector<8x8x8xbf16>
    %19 = vector.extract_strided_slice %12 {offsets = [2, 0, 0], sizes = [8, 8, 8], strides = [1, 1, 1]} : vector<10x10x8xbf16> to vector<8x8x8xbf16>
    %20 = vector.extract_strided_slice %12 {offsets = [2, 1, 0], sizes = [8, 8, 8], strides = [1, 1, 1]} : vector<10x10x8xbf16> to vector<8x8x8xbf16>
    %21 = vector.extract_strided_slice %12 {offsets = [2, 2, 0], sizes = [8, 8, 8], strides = [1, 1, 1]} : vector<10x10x8xbf16> to vector<8x8x8xbf16>
    %c0_9 = arith.constant 0 : index
    %c0_10 = arith.constant 0 : index
    %c0_11 = arith.constant 0 : index
    %c0_12 = arith.constant 0 : index
    %c0_13 = arith.constant 0 : index
    %22 = vector.load %arg4[%c0_9, %c0_10, %c0_11, %c0_12, %c0_13] : memref<1x1x10x10x8xbf16, #tpu.memory_space<vmem>>, vector<1x1x10x10x8xbf16>
    %23 = vector.shape_cast %22 : vector<1x1x10x10x8xbf16> to vector<10x10x8xbf16>
    %24 = vector.extract_strided_slice %23 {offsets = [0, 0, 0], sizes = [8, 8, 8], strides = [1, 1, 1]} : vector<10x10x8xbf16> to vector<8x8x8xbf16>
    %25 = vector.extract_strided_slice %23 {offsets = [0, 1, 0], sizes = [8, 8, 8], strides = [1, 1, 1]} : vector<10x10x8xbf16> to vector<8x8x8xbf16>
    %26 = vector.extract_strided_slice %23 {offsets = [0, 2, 0], sizes = [8, 8, 8], strides = [1, 1, 1]} : vector<10x10x8xbf16> to vector<8x8x8xbf16>
    %27 = vector.extract_strided_slice %23 {offsets = [1, 0, 0], sizes = [8, 8, 8], strides = [1, 1, 1]} : vector<10x10x8xbf16> to vector<8x8x8xbf16>
    %28 = vector.extract_strided_slice %23 {offsets = [1, 1, 0], sizes = [8, 8, 8], strides = [1, 1, 1]} : vector<10x10x8xbf16> to vector<8x8x8xbf16>
    %29 = vector.extract_strided_slice %23 {offsets = [1, 2, 0], sizes = [8, 8, 8], strides = [1, 1, 1]} : vector<10x10x8xbf16> to vector<8x8x8xbf16>
    %30 = vector.extract_strided_slice %23 {offsets = [2, 0, 0], sizes = [8, 8, 8], strides = [1, 1, 1]} : vector<10x10x8xbf16> to vector<8x8x8xbf16>
    %31 = vector.extract_strided_slice %23 {offsets = [2, 1, 0], sizes = [8, 8, 8], strides = [1, 1, 1]} : vector<10x10x8xbf16> to vector<8x8x8xbf16>
    %32 = vector.extract_strided_slice %23 {offsets = [2, 2, 0], sizes = [8, 8, 8], strides = [1, 1, 1]} : vector<10x10x8xbf16> to vector<8x8x8xbf16>
    %33 = tpu.concatenate %2, %3, %4, %5, %6, %7, %8, %9, %10, %13, %14, %15, %16, %17, %18, %19 in 2 : vector<8x8x8xbf16>, vector<8x8x8xbf16>, vector<8x8x8xbf16>, vector<8x8x8xbf16>, vector<8x8x8xbf16>, vector<8x8x8xbf16>, vector<8x8x8xbf16>, vector<8x8x8xbf16>, vector<8x8x8xbf16>, vector<8x8x8xbf16>, vector<8x8x8xbf16>, vector<8x8x8xbf16>, vector<8x8x8xbf16>, vector<8x8x8xbf16>, vector<8x8x8xbf16>, vector<8x8x8xbf16> -> vector<8x8x128xbf16>
    %34 = tpu.concatenate %20, %21, %24, %25, %26, %27, %28, %29, %30, %31, %32 in 2 : vector<8x8x8xbf16>, vector<8x8x8xbf16>, vector<8x8x8xbf16>, vector<8x8x8xbf16>, vector<8x8x8xbf16>, vector<8x8x8xbf16>, vector<8x8x8xbf16>, vector<8x8x8xbf16>, vector<8x8x8xbf16>, vector<8x8x8xbf16>, vector<8x8x8xbf16> -> vector<8x8x88xbf16>
    %35 = tpu.concatenate %33, %34 in 2 : vector<8x8x128xbf16>, vector<8x8x88xbf16> -> vector<8x8x216xbf16>
    %36 = vector.shape_cast %35 : vector<8x8x216xbf16> to vector<64x216xbf16>
    %c0_14 = arith.constant 0 : index
    %c0_15 = arith.constant 0 : index
    %37 = vector.load %arg5[%c0_14, %c0_15] : memref<216x128xbf16, #tpu.memory_space<vmem>>, vector<216x128xbf16>
    %cst = arith.constant dense<0.000000e+00> : vector<64x128xf32>
    %38 = tpu.matmul %36, %37, %cst {dimension_numbers = #tpu.dot_dimension_numbers<[1], [0], [0], [1], [0, 0, 1, 1], [], []>} : vector<64x216xbf16>, vector<216x128xbf16>, vector<64x128xf32> -> vector<64x128xf32>
    %c0_16 = arith.constant 0 : index
    %c0_17 = arith.constant 0 : index
    %c0_18 = arith.constant 0 : index
    %c0_19 = arith.constant 0 : index
    %39 = vector.load %arg7[%c0_16, %c0_17, %c0_18, %c0_19] : memref<1x1x64x4xbf16, #tpu.memory_space<vmem>>, vector<1x1x64x4xbf16>
    %40 = vector.shape_cast %39 : vector<1x1x64x4xbf16> to vector<64x4xbf16>
    %c0_20 = arith.constant 0 : index
    %c0_21 = arith.constant 0 : index
    %41 = vector.load %arg8[%c0_20, %c0_21] : memref<4x128xbf16, #tpu.memory_space<vmem>>, vector<4x128xbf16>
    %cst_22 = arith.constant dense<0.000000e+00> : vector<64x128xf32>
    %42 = tpu.matmul %40, %41, %cst_22 {dimension_numbers = #tpu.dot_dimension_numbers<[1], [0], [0], [1], [0, 0, 1, 1], [], []>} : vector<64x4xbf16>, vector<4x128xbf16>, vector<64x128xf32> -> vector<64x128xf32>
    %c0_23 = arith.constant 0 : index
    %c0_24 = arith.constant 0 : index
    %43 = vector.load %arg6[%c0_23, %c0_24] : memref<1x128xf32, #tpu.memory_space<vmem>>, vector<1x128xf32>
    %44 = vector.broadcast %43 : vector<1x128xf32> to vector<64x128xf32>
    %45 = arith.addf %38, %44 : vector<64x128xf32>
    %46 = arith.addf %45, %42 : vector<64x128xf32>
    %cst_25 = arith.constant 0.000000e+00 : f32
    %47 = vector.broadcast %cst_25 : f32 to vector<64x128xf32>
    %48 = arith.cmpf oge, %46, %47 : vector<64x128xf32>
    %cst_26 = arith.constant 2.000000e-01 : f32
    %49 = vector.broadcast %cst_26 : f32 to vector<64x128xf32>
    %50 = arith.mulf %49, %46 : vector<64x128xf32>
    %51 = arith.select %48, %46, %50 : vector<64x128xi1>, vector<64x128xf32>
    %c0_27 = arith.constant 0 : index
    %c0_28 = arith.constant 0 : index
    %c0_29 = arith.constant 0 : index
    %c0_30 = arith.constant 0 : index
    %52 = vector.load %arg9[%c0_27, %c0_28, %c0_29, %c0_30] : memref<1x1x64x128xf32, #tpu.memory_space<vmem>>, vector<1x1x64x128xf32>
    %53 = vector.shape_cast %52 : vector<1x1x64x128xf32> to vector<64x128xf32>
    %54 = vector.shape_cast %51 : vector<64x128xf32> to vector<1x1x64x128xf32>
    tpu.vector_store %arg9[%c0_27, %c0_28, %c0_29, %c0_30], %54 {strides = array<i32>} : memref<1x1x64x128xf32, #tpu.memory_space<vmem>>, vector<1x1x64x128xf32>,
    return
  }
  func.func @transform_0(%arg0: i32, %arg1: i32) -> (i32, i32, i32, i32, i32) {
    %c10_i32 = arith.constant 10 : i32
    %0 = arith.muli %arg0, %c10_i32 : i32
    %c1_i32 = arith.constant 1 : i32
    %1 = arith.muli %arg1, %c1_i32 : i32
    %2 = arith.addi %0, %1 : i32
    %c0_i32 = arith.constant 0 : i32
    %3 = arith.addi %2, %c0_i32 : i32
    %c0_i32_0 = arith.constant 0 : i32
    %c0_i32_1 = arith.constant 0 : i32
    %c0_i32_2 = arith.constant 0 : i32
    %c0_i32_3 = arith.constant 0 : i32
    %c0_i32_4 = arith.constant 0 : i32
    return %3, %c0_i32_0, %c0_i32_1, %c0_i32_2, %c0_i32_3 : i32, i32, i32, i32, i32
  }
  func.func @transform_1(%arg0: i32, %arg1: i32) -> (i32, i32, i32, i32, i32) {
    %c10_i32 = arith.constant 10 : i32
    %0 = arith.muli %arg0, %c10_i32 : i32
    %c1_i32 = arith.constant 1 : i32
    %1 = arith.muli %arg1, %c1_i32 : i32
    %2 = arith.addi %0, %1 : i32
    %c1_i32_0 = arith.constant 1 : i32
    %3 = arith.addi %2, %c1_i32_0 : i32
    %c0_i32 = arith.constant 0 : i32
    %c0_i32_1 = arith.constant 0 : i32
    %c0_i32_2 = arith.constant 0 : i32
    %c0_i32_3 = arith.constant 0 : i32
    %c0_i32_4 = arith.constant 0 : i32
    return %3, %c0_i32, %c0_i32_1, %c0_i32_2, %c0_i32_3 : i32, i32, i32, i32, i32
  }
  func.func @transform_2(%arg0: i32, %arg1: i32) -> (i32, i32, i32, i32, i32) {
    %c10_i32 = arith.constant 10 : i32
    %0 = arith.muli %arg0, %c10_i32 : i32
    %c1_i32 = arith.constant 1 : i32
    %1 = arith.muli %arg1, %c1_i32 : i32
    %2 = arith.addi %0, %1 : i32
    %c2_i32 = arith.constant 2 : i32
    %3 = arith.addi %2, %c2_i32 : i32
    %c0_i32 = arith.constant 0 : i32
    %c0_i32_0 = arith.constant 0 : i32
    %c0_i32_1 = arith.constant 0 : i32
    %c0_i32_2 = arith.constant 0 : i32
    %c0_i32_3 = arith.constant 0 : i32
    return %3, %c0_i32, %c0_i32_0, %c0_i32_1, %c0_i32_2 : i32, i32, i32, i32, i32
  }
  func.func @transform_3(%arg0: i32, %arg1: i32) -> (i32, i32) {
    %c0_i32 = arith.constant 0 : i32
    %c0_i32_0 = arith.constant 0 : i32
    %c0_i32_1 = arith.constant 0 : i32
    return %c0_i32, %c0_i32_0 : i32, i32
  }
  func.func @transform_4(%arg0: i32, %arg1: i32) -> (i32, i32) {
    %c0_i32 = arith.constant 0 : i32
    %c0_i32_0 = arith.constant 0 : i32
    %c0_i32_1 = arith.constant 0 : i32
    return %c0_i32, %c0_i32_0 : i32, i32
  }
  func.func @transform_5(%arg0: i32, %arg1: i32) -> (i32, i32, i32, i32) {
    %c0_i32 = arith.constant 0 : i32
    %c0_i32_0 = arith.constant 0 : i32
    %c0_i32_1 = arith.constant 0 : i32
    return %arg0, %arg1, %c0_i32, %c0_i32_0 : i32, i32, i32, i32
  }
  func.func @transform_6(%arg0: i32, %arg1: i32) -> (i32, i32) {
    %c0_i32 = arith.constant 0 : i32
    %c0_i32_0 = arith.constant 0 : i32
    %c0_i32_1 = arith.constant 0 : i32
    return %c0_i32, %c0_i32_0 : i32, i32
  }
  func.func @transform_7(%arg0: i32, %arg1: i32) -> (i32, i32, i32, i32) {
    %c0_i32 = arith.constant 0 : i32
    %c0_i32_0 = arith.constant 0 : i32
    %c0_i32_1 = arith.constant 0 : i32
    return %arg0, %arg1, %c0_i32, %c0_i32_0 : i32, i32, i32, i32
  }
}

</mosaic_0001>

<bundles_post_ra>
// kernel: a_call__.2
= control target key start
LH: loop header
LB: loop body
LE: loop exit
PB: predicated region body
PF: predicated region fallthrough
CT: control target
= control target key end

     0   :  { %s2498_s18 = smov 0   ;;  %s2500_s19 = smov 0   ;;  %s4016_s0 = inlined_call_operand.vmem [shape: bf16[20,1,10,10,4], index: 0, kind: input, shape index: {}, may-alias: {0,1,2}]   ;;  %s4017_s1 = inlined_call_operand.vmem [shape: bf16[20,1,10,10,4], index: 1, kind: input, shape index: {}, may-alias: {0,1,2}]   ;;  %s4018_s2 = inlined_call_operand.vmem [shape: bf16[20,1,10,10,4], index: 2, kind: input, shape index: {}, may-alias: {0,1,2}]   ;;  %s4019_s3 = inlined_call_operand.vmem [shape: bf16[108,8], index: 3, kind: input, shape index: {}]   ;;  %s4020_s4 = inlined_call_operand.vmem [shape: f32[1,8], index: 4, kind: input, shape index: {}]   ;;  %s4021_s5 = inlined_call_operand.vmem [shape: bf16[2,8,64,8], index: 5, kind: output, shape index: {}]  }
   0x1   :  { %s2502_s20 = smov 0   ;;  %s2504_s21 = smov 0  }
   0x2   :  { %s2506_s22 = smov 0  }
   0x3 LB: > { %s24_s23 = sadd.s32 1, %s2442_s20  ;;  %s27_s24 = sadd.s32 1, %s2446_s21  ;;  %s2450_s22 = sphi %s2506_s22, %s15_s22   ;;  %s2446_s21 = sphi %s2504_s21, %s4264_s21   ;;  %s2442_s20 = sphi %s2502_s20, %s4263_s20   ;;  %s2438_s19 = sphi %s2500_s19, %s4262_s19   ;;  %s2434_s18 = sphi %s2498_s18, %s4261_s18  }
   0x4   : > { %p25_p0 = scmp.ge.s32.totalorder %s24_s23, 8  ;;  %p2129_p1 = scmp.ge.s32.totalorder %s2450_s22, 1 }
   0x5   : > { %p253_p2 = scmp.lt.s32.totalorder %s2450_s22, 17 }
   0x6   : > { %s4266_s23 = smov (%p25_p0, %s24_s23), 0  ;;  %s4268_s24 = smov (!%p25_p0, %s27_s24), %s2446_s21 }
   0x7   : > { %p254_p3 = pnand %p2129_p1, %p253_p2  ;;  %p29_p4 = scmp.ge.s32.totalorder %s4268_s24, 2 }
   0x9   : > { %s4270_s24 = smov (%p29_p4, %s4268_s24), 0  ;;  %257 = sbr.rel (%p254_p3) target bundleno = 789 (0x315), region = 40 }
  0x10   : > { %s303_s25 = smul.u32 10, %s2438_s19  ;;  %s2452_s7 = smov 8   ;;  %vm912_vm0 = vcmask 31744   ;;  %vm937_vm1 = vcmask 64512   ;;  %vm954_vm2 = vcmask 97280   ;;  %vm971_vm3 = vcmask 130048  }
  0x11   : > { %s2453_s8 = smov 4   ;;  %s2454_s11 = smov 12   ;;  %vm988_vm4 = vcmask 162816   ;;  %vm1005_vm5 = vcmask 195584   ;;  %vm1022_vm6 = vcmask 228352   ;;  %vm1039_vm7 = vcmask 261120  }
  0x12   : > { %s2534_s26 = sadd.s32 %s2434_s18, %s303_s25  ;;  %s2455_s17 = smov 16   ;;  %vm1056_vm8 = vcmask 293888   ;;  %vm1073_vm9 = vcmask 326656   ;;  %vm1881_vm10 = vcmask 1045504   ;;  %vm1090_vm11 = vcmask 359424  }
  0x13   : > { %p305_p5 = scmp.lt.s32.totalorder %s2534_s26, 19  ;;  %s314_s9 = sadd.s32 1, %s2534_s26  ;;  %vm1107_vm12 = vcmask 392192   ;;  %vm1124_vm13 = vcmask 424960   ;;  %vm1141_vm14 = vcmask 457728   ;;  %vm1158_vm15 = vcmask 490496  }
  0x14   : > { %p315_p6 = scmp.lt.s32.totalorder %s314_s9, 19  ;;  %s325_s12 = sadd.s32 2, %s2534_s26 }
  0x15   : > { %s306_s27 = scalar_select %p305_p5, %s2534_s26, 19 }
  0x16   : > { %s4272_s9 = smov (!%p315_p6, %s314_s9), 19  ;;  %p326_p7 = scmp.lt.s32.totalorder %s325_s12, 19 }
  0x17   : > { %s2278_s28 = smul.u32 80, %s306_s27  ;;  %s2457_s29 = smov 24  }
  0x18   : > { %s2279_s10 = smul.u32 80, %s4272_s9  ;;  %s4274_s12 = smov (!%p326_p7, %s325_s12), 19 }
  0x19   : > { %s2541_s6 = scalar_lea.vmem %s4016_s0, %s2278_s28  ;;  %s2280_s16 = smul.u32 80, %s4274_s12 }
  0x1a   : > { %v2544_v0 = vld [vmem:[%s2541_s6 + $0x8] sm:$0xf]  ;;  %v347_v1 = vld [vmem:[%s2541_s6 + $0xc] sm:$0x1]  ;;  %v344_v2 = vld [vmem:[%s2541_s6] sm:$0xf]  ;;  %s2661_s15 = scalar_lea.vmem %s4017_s1, %s2279_s10 }
  0x1b   : > { %v2549_v3 = vcombine.low %v2544_v0, %v347_v1  ;;  %v345_v4 = vld [vmem:[%s2541_s6 + $0x4] sm:$0x1]  ;;  %v2553_v5 = vld [vmem:[%s2541_s6 + $0x10] sm:$0xf]  ;;  %v349_v6 = vld [vmem:[%s2541_s6 + $0x14] sm:$0x1]  ;;  %s2742_s27 = scalar_lea.vmem %s4018_s2, %s2280_s16 }
  0x1c   : > { %v2136_v7 = vcombine.low %v344_v2, %v345_v4  ;;  %v2138_v8 = vcombine.low %v2553_v5, %v349_v6  ;;  %v2558_v9 = vld [vmem:[%s2541_s6 + $0x18] sm:$0xf]  ;;  %v351_v10 = vld [vmem:[%s2541_s6 + $0x1c] sm:$0x1]  ;;  %v2565_v14 = vld [vmem:[%s2541_s6 + $0x28] sm:$0xf]  ;;  %v2640_v1 = vcombine.low %v2553_v5, %v2553_v5  ;;  %v2144_v2 = vcombine.low %v2544_v0, %v2544_v0 }
  0x1d   : > { %v4022_v11 = vrot.slane %v2549_v3, 1  ;;  %v2139_v12 = vcombine.low %v2558_v9, %v351_v10  ;;  %v454_v13 = vshll.u32 %v2549_v3, 16  ;;  %v355_v15 = vld [vmem:[%s2541_s6 + $0x2c] sm:$0x1]  ;;  %v452_v19 = vshrl.u32 %v2549_v3, 16  ;;  %s2456_s28 = smov 20  }
  0x1e   : > { %v516_v16 = vrot.slane %v2136_v7, 1  ;;  %v459_v17 = vshrl.u32 %v2138_v8, 16  ;;  %v461_v18 = vshll.u32 %v2138_v8, 16  ;;  %v2570_v20 = vld [vmem:[%s2541_s6 + $0x20] sm:$0xf]  ;;  %v445_v21 = vshrl.u32 %v2136_v7, 16 }
  0x1f   : > { %526 = vrot.lane.b32.xlu1 %v4022_v11, %s2452_s7  ;;  %v447_v22 = vshll.u32 %v2136_v7, 16  ;;  %v466_v23 = vshrl.u32 %v2139_v12, 16  ;;  %v468_v24 = vshll.u32 %v2139_v12, 16  ;;  %v353_v25 = vld [vmem:[%s2541_s6 + $0x24] sm:$0x1]  ;;  %v456_v27 = vrot.slane %v454_v13, 1 }
  0x20   : > { %524 = vrot.lane.b32.xlu0 %v516_v16, %s2452_s7  ;;  %v463_v26 = vrot.slane %v461_v18, 1  ;;  %v2141_v28 = vcombine.low %v2565_v14, %v355_v15  ;;  %v2140_v29 = vcombine.low %v2570_v20, %v353_v25  ;;  %v2580_v30 = vld [vmem:[%s2541_s6 + $0x38] sm:$0xf]  ;;  %v359_v31 = vld [vmem:[%s2541_s6 + $0x3c] sm:$0x1]  ;;  %v2613_v58 = vrot.slane %v2139_v12, 1 }
  0x21   : > { %v449_v32 = vrot.slane %v447_v22, 1  ;;  %v470_v33 = vrot.slane %v468_v24, 1  ;;  %v2143_v34 = vcombine.low %v2580_v30, %v359_v31  ;;  %v356_v35 = vld [vmem:[%s2541_s6 + $0x30] sm:$0xf]  ;;  %v357_v36 = vld [vmem:[%s2541_s6 + $0x34] sm:$0x1]  ;;  %v2593_v46 = vor.u32 %v456_v27, %v452_v19 }
  0x22   : > { %v2586_v37 = vor.u32 %v463_v26, %v459_v17  ;;  %v482_v38 = vshll.u32 %v2141_v28, 16  ;;  %v480_v40 = vshrl.u32 %v2141_v28, 16  ;;  %v475_v41 = vshll.u32 %v2140_v29, 16  ;;  %v2674_v7 = vld [vmem:[%s2541_s6 + $0x40] sm:$0xf]  ;;  %s2458_s30 = smov 28  }
  0x23   : > { %v450_v39 = vor.u32 %v449_v32, %v445_v21  ;;  %v2590_v42 = vor.u32 %v470_v33, %v466_v23  ;;  %v496_v44 = vshll.u32 %v2143_v34, 16  ;;  %v2142_v45 = vcombine.low %v356_v35, %v357_v36  ;;  %v377_v15 = vld [vmem:[%s2661_s15 + $0x34] sm:$0x1]  ;;  %v2700_v16 = vld [vmem:[%s2661_s15 + $0x18] sm:$0xf]  ;;  %s2461_s9 = smov 40  }
  0x24   : > { %504 = vrot.lane.b32.xlu1 %v2586_v37, %s2453_s8  ;;  %v484_v43 = vrot.slane %v482_v38, 1  ;;  %v473_v47 = vshrl.u32 %v2140_v29, 16  ;;  %v477_v48 = vrot.slane %v475_v41, 1  ;;  %v494_v51 = vshrl.u32 %v2143_v34, 16  ;;  %v371_v17 = vld [vmem:[%s2661_s15 + $0x1c] sm:$0x1] }
  0x25   : > { %500 = vrot.lane.b32.xlu0 %v450_v39, %s2453_s8  ;;  %v489_v49 = vshll.u32 %v2142_v45, 16  ;;  %v498_v52 = vrot.slane %v496_v44, 1  ;;  %v487_v54 = vshrl.u32 %v2142_v45, 16  ;;  %v2617_v59 = vrot.slane %v2138_v8, 1  ;;  %v2677_v8 = vld [vmem:[%s2661_s15 + $0x10] sm:$0xf] }
  0x26   : > { %v2597_v50 = vor.u32 %v484_v43, %v480_v40  ;;  %v2601_v53 = vor.u32 %v477_v48, %v473_v47  ;;  %v2622_v60 = vrot.slane %v2141_v28, 1  ;;  %v2626_v61 = vrot.slane %v2140_v29, 1  ;;  %v2715_v21 = vld [vmem:[%s2661_s15 + $0x20] sm:$0xf]  ;;  %v373_v22 = vld [vmem:[%s2661_s15 + $0x24] sm:$0x1] }
  0x27   : > { %v491_v55 = vrot.slane %v489_v49, 1  ;;  %v2605_v56 = vor.u32 %v498_v52, %v494_v51  ;;  %v2630_v62 = vrot.slane %v2143_v34, 1  ;;  %v2634_v63 = vrot.slane %v2142_v45, 1  ;;  %v2719_v23 = vld [vmem:[%s2661_s15 + $0x38] sm:$0xf]  ;;  %s2462_s10 = smov 44  }
  0x28   : > { %506 = vrot.lane.b32.xlu1 %v2590_v42, %s2453_s8  ;;  %v2650_v4 = vcombine.low %v2570_v20, %v2570_v20  ;;  %v2655_v5 = vcombine.low %v2558_v9, %v2558_v9  ;;  %v2665_v0 = vcombine.low %v356_v35, %v356_v35  ;;  %v2671_v6 = vcombine.low %v2565_v14, %v2565_v14  ;;  %v369_v9 = vld [vmem:[%s2661_s15 + $0x14] sm:$0x1]  ;;  %v2696_v14 = vld [vmem:[%s2661_s15 + $0x30] sm:$0xf]  ;;  %v379_v24 = vld [vmem:[%s2661_s15 + $0x3c] sm:$0x1] }
  0x29   : > { %502 = vrot.lane.b32.xlu0 %v2593_v46, %s2453_s8  ;;  %v2609_v57 = vor.u32 %v491_v55, %v487_v54  ;;  %v2684_v10 = vcombine.low %v2674_v7, %v2674_v7  ;;  %v2687_v12 = vcombine.low %v2677_v8, %v369_v9  ;;  %v2693_v13 = vcombine.low %v2580_v30, %v2580_v30  ;;  %v2723_v25 = vld [vmem:[%s2661_s15 + $0x40] sm:$0xf]  ;;  %v381_v30 = vld [vmem:[%s2661_s15 + $0x44] sm:$0x1]  ;;  %v2745_v33 = vld [vmem:[%s2661_s15 + $0x28] sm:$0xf] }
  0x2a   : > { %v2707_v19 = vcombine.low %v2696_v14, %v377_v15  ;;  %v2712_v20 = vcombine.low %v2700_v16, %v371_v17  ;;  %4057 = vst [vmem:[#allocation5_spill] sm:$0xff] %v2723_v25  ;;  %v2730_v29 = vcombine.low %v2715_v21, %v373_v22  ;;  %v2737_v32 = vcombine.low %v2719_v23, %v379_v24  ;;  %v375_v34 = vld [vmem:[%s2661_s15 + $0x2c] sm:$0x1]  ;;  %v2758_v41 = vld [vmem:[%s2742_s27] sm:$0xf]  ;;  %s2464_s12 = smov 52  }
  0x2b   : > { %4054 = vst [vmem:[#allocation2_spill] sm:$0xff] %v2687_v12  ;;  %v752_v18 = vshll.u32 %v2687_v12, 16  ;;  %v750_v26 = vshrl.u32 %v2687_v12, 16  ;;  %v2749_v35 = vcombine.low %v2723_v25, %v381_v30  ;;  %v382_v47 = vld [vmem:[%s2661_s15 + $0x48] sm:$0xf]  ;;  %v2175_v51 = vcombine.low %v2758_v41, %v2758_v41  ;;  %p334_p8 = scmp.lt.s32.totalorder %s2438_s19, 1 }
  0x2c   : > { %510 = vrot.lane.b32.xlu1 %v2597_v50, %s2453_s8  ;;  %4055 = vst [vmem:[#allocation3_spill] sm:$0xff] %v2707_v19  ;;  %4056 = vst [vmem:[#allocation4_spill] sm:$0xff] %v2712_v20  ;;  %v780_v28 = vshll.u32 %v2707_v19, 16  ;;  %v759_v31 = vshll.u32 %v2712_v20, 16  ;;  %v778_v38 = vshrl.u32 %v2707_v19, 16  ;;  %v766_v40 = vshll.u32 %v2730_v29, 16 }
  0x2d   : > { %508 = vrot.lane.b32.xlu0 %v2601_v53, %s2453_s8  ;;  %v754_v27 = vrot.slane %v752_v18, 1  ;;  %4058 = vst [vmem:[#allocation6_spill] sm:$0xff] %v2730_v29  ;;  %4059 = vst [vmem:[#allocation7_spill] sm:$0xff] %v2737_v32  ;;  %v757_v43 = vshrl.u32 %v2712_v20, 16  ;;  %v787_v45 = vshll.u32 %v2737_v32, 16  ;;  %v764_v49 = vshrl.u32 %v2730_v29, 16 }
  0x2e   : > { %4060 = vst [vmem:[#allocation8_spill] sm:$0xff] %v2749_v35  ;;  %v782_v39 = vrot.slane %v780_v28, 1  ;;  %v761_v44 = vrot.slane %v759_v31, 1  ;;  %v383_v48 = vld [vmem:[%s2661_s15 + $0x4c] sm:$0x1]  ;;  %v768_v54 = vrot.slane %v766_v40, 1 }
  0x2f   : > { %v2753_v36 = vor.u32 %v754_v27, %v750_v26  ;;  %v785_v55 = vshrl.u32 %v2737_v32, 16  ;;  %v789_v15 = vrot.slane %v787_v45, 1  ;;  %v2783_v18 = vcombine.low %v382_v47, %v383_v48  ;;  %v2786_v22 = vld [vmem:[%s2742_s27 + $0x20] sm:$0xf]  ;;  %v2789_v24 = vld [vmem:[%s2742_s27 + $0x8] sm:$0xf] }
  0x30   : > { %514 = vrot.lane.b32.xlu1 %v2605_v56, %s2453_s8  ;;  %v2774_v52 = vor.u32 %v782_v39, %v778_v38  ;;  %v2780_v9 = vor.u32 %v761_v44, %v757_v43  ;;  %v854_v26 = vshrl.u32 %v2749_v35, 16  ;;  %v1226_v27 = vshrl.u32 %v2175_v51, 16  ;;  %v2807_v44 = vld [vmem:[%s2742_s27 + $0x10] sm:$0xf]  ;;  %v2810_v45 = vld [vmem:[%s2742_s27 + $0x28] sm:$0xf] }
  0x31   : > { %512 = vrot.lane.b32.xlu0 %v2609_v57, %s2453_s8  ;;  %4062 = vst [vmem:[#allocation10_spill] sm:$0xff] %v2783_v18  ;;  %v2794_v28 = vor.u32 %v768_v54, %v764_v49  ;;  %v2179_v31 = vcombine.low %v2786_v22, %v2786_v22  ;;  %v2802_v38 = vor.u32 %v789_v15, %v785_v55  ;;  %v1181_v43 = vshll.u32 %v2783_v18, 16  ;;  %v398_v20 = vld [vmem:[%s2742_s27 + $0x38] sm:$0xf]  ;;  %p336_p9 = scmp.lt.s32.totalorder %s2434_s18, 7  ;;  %s4276_s19 = smov (!%p334_p8, %s2438_s19), 1 }
  0x32   : > { %v1228_v47 = vrot.slane %v1226_v27, 7  ;;  %v1229_v48 = vshll.u32 %v2175_v51, 16  ;;  %v2180_v51 = vcombine.low %v2810_v45, %v2810_v45  ;;  %v396_v27 = vld [vmem:[%s2742_s27 + $0x30] sm:$0xf] }
  0x33   : > { %v1254_v54 = vshrl.u32 %v2179_v31, 16  ;;  %v1183_v11 = vrot.slane %v1181_v43, 1  ;;  %s4278_s18 = smov (!%p336_p9, %s2434_s18), 7 }
  0x34   : > { %530 = vrot.lane.b32.xlu1 %v2613_v58, %s2452_s7 }
  0x35   : > { %528 = vrot.lane.b32.xlu0 %v2617_v59, %s2452_s7  ;;  %v1256_v19 = vrot.slane %v1254_v54, 7 }
  0x38   : > { %534 = vrot.lane.b32.xlu1 %v2622_v60, %s2452_s7 }
  0x39   : > { %532 = vrot.lane.b32.xlu0 %v2626_v61, %s2452_s7 }
  0x3c   : > { %538 = vrot.lane.b32.xlu1 %v2630_v62, %s2452_s7 }
  0x3d   : > { %536 = vrot.lane.b32.xlu0 %v2634_v63, %s2452_s7 }
  0x40   : > { %552 = vrot.lane.b32.xlu1 %v2640_v1, %s2454_s11 }
  0x41   : > { %550 = vrot.lane.b32.xlu0 %v2144_v2, %s2454_s11  ;;  %v856_v2 = vshll.u32 %v2749_v35, 16  ;;  %v1257_v35 = vshll.u32 %v2179_v31, 16 }
  0x43   : > { %v858_v30 = vrot.slane %v856_v2, 1  ;;  %v2177_v2 = vcombine.low %v2807_v44, %v2807_v44  ;;  %v2837_v31 = vor.u32 %v1257_v35, %v1256_v19 }
  0x44   : > { %556 = vrot.lane.b32.xlu1 %v2650_v4, %s2454_s11 }
  0x45   : > { %554 = vrot.lane.b32.xlu0 %v2655_v5, %s2454_s11  ;;  %v2814_v49 = vor.u32 %v858_v30, %v854_v26  ;;  %v2827_v26 = vld [vmem:[%s2742_s27 + $0x18] sm:$0xf]  ;;  %v1231_v30 = vor.u32 %v1229_v48, %v1228_v47  ;;  %v1243_v29 = vshll.u32 %v2177_v2, 16 }
  0x46   : > { %v2178_v12 = vcombine.low %v2827_v26, %v2827_v26 }
  0x47   : > { %4063 = vst [vmem:[#allocation11_spill] sm:$0xff] %v2814_v49 }
  0x48   : > { %560 = vrot.lane.b32.xlu1 %v2665_v0, %s2454_s11  ;;  %v1250_v35 = vshll.u32 %v2178_v12, 16 }
  0x49   : > { %558 = vrot.lane.b32.xlu0 %v2671_v6, %s2454_s11 }
  0x4c   : > { %564 = vrot.lane.b32.xlu1 %v2684_v10, %s2454_s11 }
  0x4d   : > { %562 = vrot.lane.b32.xlu0 %v2693_v13, %s2454_s11 }
  0x50   : > { %578 = vrot.lane.b32.xlu1 %v2586_v37, %s2455_s17 }
  0x51   : > { %576 = vrot.lane.b32.xlu0 %v2593_v46, %s2455_s17  ;;  %v2765_v46 = vcombine.low %v2745_v33, %v375_v34  ;;  %v2176_v34 = vcombine.low %v2789_v24, %v2789_v24 }
  0x53   : > { %4061 = vst [vmem:[#allocation9_spill] sm:$0xff] %v2765_v46  ;;  %v773_v17 = vshll.u32 %v2765_v46, 16  ;;  %v771_v39 = vshrl.u32 %v2765_v46, 16  ;;  %v1233_v55 = vshrl.u32 %v2176_v34, 16  ;;  %v1236_v25 = vshll.u32 %v2176_v34, 16 }
  0x54   : > { %582 = vrot.lane.b32.xlu1 %v2601_v53, %s2455_s17 }
  0x55   : > { %580 = vrot.lane.b32.xlu0 %v2590_v42, %s2455_s17  ;;  %v775_v40 = vrot.slane %v773_v17, 1  ;;  %v1179_v17 = vshrl.u32 %v2783_v18, 16  ;;  %v1235_v32 = vrot.slane %v1233_v55, 7  ;;  %v1261_v18 = vshrl.u32 %v2180_v51, 16 }
  0x56   : > { %v1264_v55 = vshll.u32 %v2180_v51, 16 }
  0x57   : > { %v2820_v15 = vor.u32 %v775_v40, %v771_v39  ;;  %v1240_v39 = vshrl.u32 %v2177_v2, 16  ;;  %v2181_v40 = vcombine.low %v396_v27, %v396_v27  ;;  %v1184_v43 = vor.u32 %v1183_v11, %v1179_v17 }
  0x58   : > { %1185 = vrot.lane.b32.xlu1 %v2753_v36, %s2453_s8  ;;  %v2839_v34 = vor.u32 %v1236_v25, %v1235_v32  ;;  %v1263_v54 = vrot.slane %v1261_v18, 7  ;;  %v1247_v11 = vshrl.u32 %v2178_v12, 16  ;;  %v2182_v17 = vcombine.low %v398_v20, %v398_v20 }
  0x59   : > { %584 = vrot.lane.b32.xlu0 %v2597_v50, %s2455_s17  ;;  %v1242_v47 = vrot.slane %v1240_v39, 7  ;;  %v1268_v48 = vshrl.u32 %v2181_v40, 16  ;;  %v1271_v19 = vshll.u32 %v2181_v40, 16 }
  0x5a   : > { %v2848_v25 = vor.u32 %v1264_v55, %v1263_v54  ;;  %v1249_v32 = vrot.slane %v1247_v11, 7  ;;  %v1275_v18 = vshrl.u32 %v2182_v17, 16  ;;  %v1278_v40 = vshll.u32 %v2182_v17, 16  ;;  %v389_v55 = vld [vmem:[%s2742_s27 + $0x14] sm:$0x1] }
  0x5b   : > { %v1270_v2 = vrot.slane %v1268_v48, 7  ;;  %v387_v48 = vld [vmem:[%s2742_s27 + $0xc] sm:$0x1]  ;;  %v2880_v17 = vcombine.low %v2807_v44, %v389_v55 }
  0x5c   : > { %1193 = vrot.lane.b32.xlu1 %v2774_v52, %s2453_s8  ;;  %v1277_v39 = vrot.slane %v1275_v18, 7  ;;  %v2876_v11 = vcombine.low %v2789_v24, %v387_v48 }
  0x5d   : > { %1187 = vrot.lane.b32.xlu0 %v2780_v9, %s2453_s8  ;;  %v2852_v51 = vor.u32 %v1271_v19, %v1270_v2  ;;  %v397_v19 = vld [vmem:[%s2742_s27 + $0x34] sm:$0x1] }
  0x60   : > { %1189 = vrot.lane.b32.xlu1 %v2794_v28, %s2453_s8 }
  0x61   : > { %1195 = vrot.lane.b32.xlu0 %v2802_v38, %s2453_s8 }
  0x64   : > { %1197 = vrot.lane.b32.xlu1 %v2814_v49, %s2453_s8  ;;  %v2844_v49 = vor.u32 %v1243_v29, %v1242_v47  ;;  %v2856_v29 = vor.u32 %v1250_v35, %v1249_v32  ;;  %v2865_v47 = vor.u32 %v1278_v40, %v1277_v39  ;;  %v391_v32 = vld [vmem:[%s2742_s27 + $0x1c] sm:$0x1]  ;;  %v2891_v35 = vcombine.low %v396_v27, %v397_v19 }
  0x65   : > { %1191 = vrot.lane.b32.xlu0 %v2820_v15, %s2453_s8  ;;  %v399_v39 = vld [vmem:[%s2742_s27 + $0x3c] sm:$0x1]  ;;  %v1352_v19 = vshrl.u32 %v2880_v17, 16 }
  0x66   : > { %v2907_v48 = vcombine.low %v398_v20, %v399_v39 }
  0x68   : > { %1281 = vrot.lane.b32.xlu1 %v1231_v30, %s2452_s7  ;;  %v385_v30 = vld [vmem:[%s2742_s27 + $0x4] sm:$0x1] }
  0x69   : > { %1199 = vrot.lane.b32.xlu0 %v1184_v43, %s2453_s8  ;;  %v2183_v12 = vcombine.low %v2758_v41, %v385_v30  ;;  %v393_v43 = vld [vmem:[%s2742_s27 + $0x24] sm:$0x1]  ;;  %v395_v41 = vld [vmem:[%s2742_s27 + $0x2c] sm:$0x1]  ;;  %v2897_v30 = vcombine.low %v2827_v26, %v391_v32  ;;  %v1345_v26 = vshrl.u32 %v2876_v11, 16  ;;  %s2460_s8 = smov 36  }
  0x6a   : > { %v2869_v54 = vcombine.low %v2786_v22, %v393_v43  ;;  %v2885_v22 = vcombine.low %v2810_v45, %v395_v41  ;;  %v1347_v45 = vshll.u32 %v2876_v11, 16 }
  0x6b   : > { %v1340_v2 = vshll.u32 %v2183_v12, 16  ;;  %v1338_v24 = vshrl.u32 %v2183_v12, 16 }
  0x6c   : > { %1289 = vrot.lane.b32.xlu1 %v2837_v31, %s2452_s7  ;;  %v1368_v18 = vshll.u32 %v2869_v54, 16  ;;  %v1366_v40 = vshrl.u32 %v2869_v54, 16  ;;  %v1349_v55 = vrot.slane %v1347_v45, 1  ;;  %v1375_v41 = vshll.u32 %v2885_v22, 16 }
  0x6d   : > { %1283 = vrot.lane.b32.xlu0 %v2839_v34, %s2452_s7  ;;  %v1342_v44 = vrot.slane %v1340_v2, 1  ;;  %v1361_v45 = vshll.u32 %v2897_v30, 16 }
  0x6e   : > { %v1370_v43 = vrot.slane %v1368_v18, 1  ;;  %v2920_v20 = vor.u32 %v1349_v55, %v1345_v26  ;;  %v1377_v18 = vrot.slane %v1375_v41, 1  ;;  %v1389_v55 = vshll.u32 %v2907_v48, 16 }
  0x6f   : > { %v1343_v27 = vor.u32 %v1342_v44, %v1338_v24  ;;  %v1382_v24 = vshll.u32 %v2891_v35, 16  ;;  %v1373_v44 = vshrl.u32 %v2885_v22, 16  ;;  %v1363_v26 = vrot.slane %v1361_v45, 1 }
  0x70   : > { %1285 = vrot.lane.b32.xlu1 %v2844_v49, %s2452_s7  ;;  %v2914_v2 = vor.u32 %v1370_v43, %v1366_v40 }
  0x71   : > { %1291 = vrot.lane.b32.xlu0 %v2848_v25, %s2452_s7  ;;  %v1384_v40 = vrot.slane %v1382_v24, 1  ;;  %v2931_v43 = vor.u32 %v1377_v18, %v1373_v44  ;;  %v1387_v24 = vshrl.u32 %v2907_v48, 16  ;;  %v1391_v44 = vrot.slane %v1389_v55, 1 }
  0x73   : > { %v2952_v45 = vor.u32 %v1391_v44, %v1387_v24 }
  0x74   : > { %1293 = vrot.lane.b32.xlu1 %v2852_v51, %s2452_s7 }
  0x75   : > { %1287 = vrot.lane.b32.xlu0 %v2856_v29, %s2452_s7 }
  0x78   : > { %1321 = vrot.lane.b32.xlu1 %v2183_v12, %s2454_s11  ;;  %v1354_v12 = vshll.u32 %v2880_v17, 16 }
  0x79   : > { %1295 = vrot.lane.b32.xlu0 %v2865_v47, %s2452_s7  ;;  %s2459_s7 = smov 32  }
  0x7a   : > { %v1356_v32 = vrot.slane %v1354_v12, 1  ;;  %v1359_v12 = vshrl.u32 %v2897_v30, 16 }
  0x7c   : > { %1329 = vrot.lane.b32.xlu1 %v2869_v54, %s2454_s11  ;;  %v2926_v39 = vor.u32 %v1356_v32, %v1352_v19  ;;  %v2943_v32 = vor.u32 %v1363_v26, %v1359_v12 }
  0x7d   : > { %1323 = vrot.lane.b32.xlu0 %v2876_v11, %s2454_s11 }
  0x80   : > { %1325 = vrot.lane.b32.xlu1 %v2880_v17, %s2454_s11 }
  0x81   : > { %1331 = vrot.lane.b32.xlu0 %v2885_v22, %s2454_s11 }
  0x84   : > { %1333 = vrot.lane.b32.xlu1 %v2891_v35, %s2454_s11 }
  0x85   : > { %1327 = vrot.lane.b32.xlu0 %v2897_v30, %s2454_s11 }
  0x88   : > { %1393 = vrot.lane.b32.xlu1 %v1343_v27, %s2455_s17  ;;  %v1380_v27 = vshrl.u32 %v2891_v35, 16 }
  0x89   : > { %1335 = vrot.lane.b32.xlu0 %v2907_v48, %s2454_s11  ;;  %s2463_s11 = smov 48  }
  0x8a   : > { %v2937_v41 = vor.u32 %v1384_v40, %v1380_v27  ;;  %v400_v40 = vld [vmem:[%s2742_s27 + $0x40] sm:$0xf] }
  0x8b   : > { %v2191_v12 = vcombine.low %v400_v40, %v400_v40 }
  0x8c   : > { %1401 = vrot.lane.b32.xlu1 %v2914_v2, %s2455_s17 }
  0x8d   : > { %1395 = vrot.lane.b32.xlu0 %v2920_v20, %s2455_s17  ;;  %v1413_v24 = vshrl.u32 %v2191_v12, 16 }
  0x90   : > { %1397 = vrot.lane.b32.xlu1 %v2926_v39, %s2455_s17 }
  0x91   : > { %1403 = vrot.lane.b32.xlu0 %v2931_v43, %s2455_s17  ;;  %v2941_v19 = vpop.permute.xlu1 %526 }
  0x92   : > { %4064 = vst [vmem:[#allocation12_spill] sm:$0xff] %v2941_v19  ;;  %v2946_v18 = vpop.permute.xlu0 %524 }
  0x93   : > { %4065 = vst [vmem:[#allocation13_spill] sm:$0xff] %v2946_v18 }
  0x94   : > { %1405 = vrot.lane.b32.xlu1 %v2937_v41, %s2455_s17 }
  0x95   : > { %1399 = vrot.lane.b32.xlu0 %v2943_v32, %s2455_s17 }
  0x96   : > { %v2954_v27 = vpop.permute.xlu1 %504 }
  0x97   : > { %4066 = vst [vmem:[#allocation14_spill] sm:$0xff] %v2954_v27  ;;  %v2957_v46 = vpop.permute.xlu0 %500 }
  0x98   : > { %4067 = vst [vmem:[#allocation15_spill] sm:$0xff] %v2957_v46  ;;  %1419 = vrot.lane.b32.xlu1 %v2839_v34, %s2456_s28  ;;  %v1415_v34 = vrot.slane %v1413_v24, 7 }
  0x99   : > { %1407 = vrot.lane.b32.xlu0 %v2952_v45, %s2455_s17 }
  0x9a   : > { %v2963_v26 = vpop.permute.xlu1 %506 }
  0x9b   : > { %4068 = vst [vmem:[#allocation16_spill] sm:$0xff] %v2963_v26  ;;  %v2965_v55 = vpop.permute.xlu0 %502  ;;  %v1416_v26 = vshll.u32 %v2191_v12, 16 }
  0x9c   : > { %1427 = vrot.lane.b32.xlu1 %v2848_v25, %s2456_s28 }
  0x9d   : > { %1421 = vrot.lane.b32.xlu0 %v2844_v49, %s2456_s28 }
  0x9e   : > { %v2971_v44 = vpop.permute.xlu1 %510 }
  0x9f   : > { %4069 = vst [vmem:[#allocation17_spill] sm:$0xff] %v2971_v44  ;;  %v2973_v27 = vpop.permute.xlu0 %508 }
  0xa0   : > { %4070 = vst [vmem:[#allocation18_spill] sm:$0xff] %v2973_v27  ;;  %1423 = vrot.lane.b32.xlu1 %v2856_v29, %s2456_s28  ;;  %v1418_v27 = vor.u32 %v1416_v26, %v1415_v34 }
  0xa1   : > { %1429 = vrot.lane.b32.xlu0 %v2852_v51, %s2456_s28 }
  0xa2   : > { %v2979_v18 = vpop.permute.xlu1 %514 }
  0xa3   : > { %v2981_v19 = vpop.permute.xlu0 %512 }
  0xa4   : > { %4071 = vst [vmem:[#allocation19_spill] sm:$0xff] %v2981_v19  ;;  %1431 = vrot.lane.b32.xlu1 %v2865_v47, %s2456_s28 }
  0xa5   : > { %1425 = vrot.lane.b32.xlu0 %v2837_v31, %s2456_s28 }
  0xa6   : > { %v2987_v44 = vpop.permute.xlu1 %530 }
  0xa7   : > { %4072 = vst [vmem:[#allocation20_spill] sm:$0xff] %v2987_v44  ;;  %v2989_v46 = vpop.permute.xlu0 %528 }
  0xa8   : > { %4073 = vst [vmem:[#allocation21_spill] sm:$0xff] %v2989_v46  ;;  %1438 = vrot.lane.b32.xlu1 %v2876_v11, %s2457_s29  ;;  %v401_v46 = vld [vmem:[%s2742_s27 + $0x44] sm:$0x1] }
  0xa9   : > { %1433 = vrot.lane.b32.xlu0 %v1418_v27, %s2456_s28 }
  0xaa   : > { %v2994_v12 = vpop.permute.xlu1 %534 }
  0xab   : > { %4074 = vst [vmem:[#allocation22_spill] sm:$0xff] %v2994_v12  ;;  %v2996_v24 = vpop.permute.xlu0 %532 }
  0xac   : > { %4075 = vst [vmem:[#allocation23_spill] sm:$0xff] %v2996_v24  ;;  %1446 = vrot.lane.b32.xlu1 %v2885_v22, %s2457_s29  ;;  %v2192_v24 = vcombine.low %v400_v40, %v401_v46 }
  0xad   : > { %1440 = vrot.lane.b32.xlu0 %v2880_v17, %s2457_s29 }
  0xae   : > { %v3002_v26 = vpop.permute.xlu1 %538  ;;  %v1457_v46 = vshll.u32 %v2192_v24, 16 }
  0xaf   : > { %4076 = vst [vmem:[#allocation24_spill] sm:$0xff] %v3002_v26  ;;  %v3004_v34 = vpop.permute.xlu0 %536  ;;  %v402_v26 = vld [vmem:[%s2742_s27 + $0x48] sm:$0xf] }
  0xb0   : > { %4077 = vst [vmem:[#allocation25_spill] sm:$0xff] %v3004_v34  ;;  %1442 = vrot.lane.b32.xlu1 %v2897_v30, %s2457_s29 }
  0xb1   : > { %1448 = vrot.lane.b32.xlu0 %v2891_v35, %s2457_s29 }
  0xb2   : > { %v3010_v11 = vpop.permute.xlu1 %552 }
  0xb3   : > { %4078 = vst [vmem:[#allocation26_spill] sm:$0xff] %v3010_v11  ;;  %v3013_v44 = vpop.permute.xlu0 %550 }
  0xb4   : > { %4079 = vst [vmem:[#allocation27_spill] sm:$0xff] %v3013_v44  ;;  %1450 = vrot.lane.b32.xlu1 %v2907_v48, %s2457_s29 }
  0xb5   : > { %1444 = vrot.lane.b32.xlu0 %v2869_v54, %s2457_s29 }
  0xb6   : > { %v3019_v12 = vpop.permute.xlu1 %556 }
  0xb7   : > { %4080 = vst [vmem:[#allocation28_spill] sm:$0xff] %v3019_v12  ;;  %v3021_v34 = vpop.permute.xlu0 %554  ;;  %v1459_v12 = vrot.slane %v1457_v46, 1  ;;  %v2193_v46 = vcombine.low %v402_v26, %v402_v26 }
  0xb8   : > { %4081 = vst [vmem:[#allocation29_spill] sm:$0xff] %v3021_v34  ;;  %1461 = vrot.lane.b32.xlu1 %v2920_v20, %s2458_s30  ;;  %v1455_v20 = vshrl.u32 %v2192_v24, 16 }
  0xb9   : > { %1452 = vrot.lane.b32.xlu0 %v2192_v24, %s2457_s29 }
  0xba   : > { %v3026_v11 = vpop.permute.xlu1 %560 }
  0xbb   : > { %4082 = vst [vmem:[#allocation30_spill] sm:$0xff] %v3026_v11  ;;  %v3028_v44 = vpop.permute.xlu0 %558 }
  0xbc   : > { %4083 = vst [vmem:[#allocation31_spill] sm:$0xff] %v3028_v44  ;;  %1469 = vrot.lane.b32.xlu1 %v2931_v43, %s2458_s30 }
  0xbd   : > { %1463 = vrot.lane.b32.xlu0 %v2926_v39, %s2458_s30 }
  0xbe   : > { %v3034_v40 = vpop.permute.xlu1 %564 }
  0xbf   : > { %4084 = vst [vmem:[#allocation32_spill] sm:$0xff] %v3034_v40  ;;  %v3036_v34 = vpop.permute.xlu0 %562  ;;  %v3050_v40 = vor.u32 %v1459_v12, %v1455_v20  ;;  %v1481_v12 = vshrl.u32 %v2193_v46, 16 }
  0xc0   : > { %4085 = vst [vmem:[#allocation33_spill] sm:$0xff] %v3036_v34  ;;  %1465 = vrot.lane.b32.xlu1 %v2943_v32, %s2458_s30 }
  0xc1   : > { %1471 = vrot.lane.b32.xlu0 %v2937_v41, %s2458_s30 }
  0xc2   : > { %v3042_v44 = vpop.permute.xlu1 %578 }
  0xc3   : > { %4086 = vst [vmem:[#allocation34_spill] sm:$0xff] %v3042_v44  ;;  %v3044_v11 = vpop.permute.xlu0 %576 }
  0xc4   : > { %4087 = vst [vmem:[#allocation35_spill] sm:$0xff] %v3044_v11  ;;  %1473 = vrot.lane.b32.xlu1 %v2952_v45, %s2458_s30 }
  0xc5   : > { %1467 = vrot.lane.b32.xlu0 %v2914_v2, %s2458_s30 }
  0xc6   : > { %v3052_v34 = vpop.permute.xlu1 %582 }
  0xc7   : > { %4088 = vst [vmem:[#allocation36_spill] sm:$0xff] %v3052_v34  ;;  %v3055_v19 = vpop.permute.xlu0 %580 }
  0xc8   : > { %4089 = vst [vmem:[#allocation37_spill] sm:$0xff] %v3055_v19  ;;  %1487 = vrot.lane.b32.xlu1 %v2844_v49, %s2459_s7  ;;  %v1483_v49 = vrot.slane %v1481_v12, 7 }
  0xc9   : > { %1475 = vrot.lane.b32.xlu0 %v3050_v40, %s2458_s30 }
  0xca   : > { %v3061_v11 = vpop.permute.xlu1 %1185 }
  0xcb   : > { %4090 = vst [vmem:[#allocation38_spill] sm:$0xff] %v3061_v11  ;;  %v3063_v44 = vpop.permute.xlu0 %584  ;;  %v1484_v11 = vshll.u32 %v2193_v46, 16 }
  0xcc   : > { %4091 = vst [vmem:[#allocation39_spill] sm:$0xff] %v3063_v44  ;;  %1495 = vrot.lane.b32.xlu1 %v2852_v51, %s2459_s7 }
  0xcd   : > { %1489 = vrot.lane.b32.xlu0 %v2856_v29, %s2459_s7  ;;  %v1486_v51 = vor.u32 %v1484_v11, %v1483_v49  ;;  %v403_v11 = vld [vmem:[%s2742_s27 + $0x4c] sm:$0x1] }
  0xce   : > { %v3069_v20 = vpop.permute.xlu1 %1193 }
  0xcf   : > { %v3071_v19 = vpop.permute.xlu0 %1187 }
  0xd0   : > { %4092 = vst [vmem:[#allocation40_spill] sm:$0xff] %v3071_v19  ;;  %1491 = vrot.lane.b32.xlu1 %v2837_v31, %s2459_s7 }
  0xd1   : > { %1497 = vrot.lane.b32.xlu0 %v2865_v47, %s2459_s7 }
  0xd2   : > { %v3077_v34 = vpop.permute.xlu1 %1189 }
  0xd3   : > { %v3079_v44 = vpop.permute.xlu0 %1195 }
  0xd4   : > { %1499 = vrot.lane.b32.xlu1 %v1418_v27, %s2459_s7 }
  0xd5   : > { %1493 = vrot.lane.b32.xlu0 %v2848_v25, %s2459_s7 }
  0xd6   : > { %v3084_v29 = vpop.permute.xlu1 %1197 }
  0xd7   : > { %v3086_v19 = vpop.permute.xlu0 %1191 }
  0xd8   : > { %1506 = vrot.lane.b32.xlu1 %v2880_v17, %s2460_s8 }
  0xd9   : > { %1501 = vrot.lane.b32.xlu0 %v1486_v51, %s2459_s7 }
  0xda   : > { %v3091_v31 = vpop.permute.xlu1 %1281 }
  0xdb   : > { %v3093_v47 = vpop.permute.xlu0 %1199 }
  0xdc   : > { %1514 = vrot.lane.b32.xlu1 %v2891_v35, %s2460_s8  ;;  %v2194_v35 = vcombine.low %v402_v26, %v403_v11 }
  0xdd   : > { %1508 = vrot.lane.b32.xlu0 %v2897_v30, %s2460_s8 }
  0xde   : > { %v3099_v25 = vpop.permute.xlu1 %1289 }
  0xdf   : > { %v3101_v27 = vpop.permute.xlu0 %1283 }
  0xe0   : > { %1510 = vrot.lane.b32.xlu1 %v2869_v54, %s2460_s8  ;;  %v361_v54 = vld [vmem:[%s2541_s6 + $0x44] sm:$0x1] }
  0xe1   : > { %1516 = vrot.lane.b32.xlu0 %v2907_v48, %s2460_s8 }
  0xe2   : > { %v3107_v17 = vpop.permute.xlu1 %1285 }
  0xe3   : > { %v3110_v46 = vpop.permute.xlu0 %1291 }
  0xe4   : > { %1518 = vrot.lane.b32.xlu1 %v2192_v24, %s2460_s8  ;;  %v3128_v24 = vcombine.low %v2674_v7, %v361_v54  ;;  %v1523_v7 = vshrl.u32 %v2194_v35, 16 }
  0xe5   : > { %1512 = vrot.lane.b32.xlu0 %v2885_v22, %s2460_s8  ;;  %v1525_v22 = vshll.u32 %v2194_v35, 16 }
  0xe6   : > { %v3115_v30 = vpop.permute.xlu1 %1293  ;;  %v572_v51 = vshll.u32 %v3128_v24, 16 }
  0xe7   : > { %v3117_v12 = vpop.permute.xlu0 %1287  ;;  %v1527_v11 = vrot.slane %v1525_v22, 1 }
  0xe8   : > { %1529 = vrot.lane.b32.xlu1 %v2926_v39, %s2461_s9 }
  0xe9   : > { %1520 = vrot.lane.b32.xlu0 %v2194_v35, %s2460_s8 }
  0xea   : > { %v3123_v48 = vpop.permute.xlu1 %1321 }
  0xeb   : > { %v3125_v49 = vpop.permute.xlu0 %1295 }
  0xec   : > { %4093 = vst [vmem:[#allocation41_spill] sm:$0xff] %v3125_v49  ;;  %1537 = vrot.lane.b32.xlu1 %v2937_v41, %s2461_s9 }
  0xed   : > { %1531 = vrot.lane.b32.xlu0 %v2943_v32, %s2461_s9  ;;  %v570_v32 = vshrl.u32 %v3128_v24, 16 }
  0xee   : > { %v3134_v26 = vpop.permute.xlu1 %1329 }
  0xef   : > { %4094 = vst [vmem:[#allocation42_spill] sm:$0xff] %v3134_v26  ;;  %v3136_v39 = vpop.permute.xlu0 %1323 }
  0xf0   : > { %4095 = vst [vmem:[#allocation43_spill] sm:$0xff] %v3136_v39  ;;  %1533 = vrot.lane.b32.xlu1 %v2914_v2, %s2461_s9  ;;  %v574_v39 = vrot.slane %v572_v51, 1  ;;  %v1528_v2 = vor.u32 %v1527_v11, %v1523_v7 }
  0xf1   : > { %1539 = vrot.lane.b32.xlu0 %v2952_v45, %s2461_s9 }
  0xf2   : > { %v3143_v54 = vpop.permute.xlu1 %1325  ;;  %v575_v45 = vor.u32 %v574_v39, %v570_v32  ;;  %v4096_v39 = vrot.slane %v2549_v3, 1  ;;  %v4040_v3 = vrot.slane %v3128_v24, 1 }
  0xf3   : > { %v3145_v41 = vpop.permute.xlu0 %1331 }
  0xf4   : > { %1541 = vrot.lane.b32.xlu1 %v3050_v40, %s2461_s9 }
  0xf5   : > { %1535 = vrot.lane.b32.xlu0 %v2931_v43, %s2461_s9 }
  0xf6   : > { %v3152_v26 = vpop.permute.xlu1 %1333 }
  0xf7   : > { %v3154_v49 = vpop.permute.xlu0 %1327 }
  0xf8   : > { %586 = vrot.lane.b32.xlu1 %v2609_v57, %s2455_s17 }
  0xf9   : > { %1543 = vrot.lane.b32.xlu0 %v1528_v2, %s2461_s9 }
  0xfa   : > { %v3159_v35 = vpop.permute.xlu1 %1393 }
  0xfb   : > { %v3161_v40 = vpop.permute.xlu0 %1335 }
  0xfc   : > { %590 = vrot.lane.b32.xlu1 %v575_v45, %s2455_s17 }
  0xfd   : > { %588 = vrot.lane.b32.xlu0 %v2605_v56, %s2455_s17 }
  0xfe   : > { %v3166_v43 = vpop.permute.xlu1 %1401 }
  0xff   : > { %v3168_v22 = vpop.permute.xlu0 %1395 }
 0x100   : > { %595 = vrot.lane.b32.xlu1 %v2617_v59, %s2456_s28 }
 0x101   : > { %593 = vrot.lane.b32.xlu0 %v4096_v39, %s2456_s28 }
 0x102   : > { %v3175_v51 = vpop.permute.xlu1 %1397 }
 0x103   : > { %v3177_v7 = vpop.permute.xlu0 %1403 }
 0x104   : > { %603 = vrot.lane.b32.xlu1 %v2634_v63, %s2456_s28 }
 0x105   : > { %601 = vrot.lane.b32.xlu0 %v2622_v60, %s2456_s28 }
 0x106   : > { %v3183_v11 = vpop.permute.xlu1 %1405 }
 0x107   : > { %4097 = vst [vmem:[#allocation44_spill] sm:$0xff] %v3183_v11  ;;  %v3185_v32 = vpop.permute.xlu0 %1399 }
 0x108   : > { %4098 = vst [vmem:[#allocation45_spill] sm:$0xff] %v3185_v32  ;;  %599 = vrot.lane.b32.xlu1 %v2626_v61, %s2456_s28 }
 0x109   : > { %597 = vrot.lane.b32.xlu0 %v2613_v58, %s2456_s28 }
 0x10a   : > { %v3192_v2 = vpop.permute.xlu1 %1419 }
 0x10b   : > { %4099 = vst [vmem:[#allocation46_spill] sm:$0xff] %v3192_v2  ;;  %v3194_v39 = vpop.permute.xlu0 %1407 }
 0x10c   : > { %4100 = vst [vmem:[#allocation47_spill] sm:$0xff] %v3194_v39  ;;  %607 = vrot.lane.b32.xlu1 %v4040_v3, %s2456_s28  ;;  %v362_v3 = vld [vmem:[%s2541_s6 + $0x48] sm:$0xf] }
 0x10d   : > { %605 = vrot.lane.b32.xlu0 %v2630_v62, %s2456_s28 }
 0x10e   : > { %v3201_v32 = vpop.permute.xlu1 %1427 }
 0x10f   : > { %4101 = vst [vmem:[#allocation48_spill] sm:$0xff] %v3201_v32  ;;  %v3203_v11 = vpop.permute.xlu0 %1421 }
 0x110   : > { %4102 = vst [vmem:[#allocation49_spill] sm:$0xff] %v3203_v11  ;;  %614 = vrot.lane.b32.xlu1 %v2655_v5, %s2457_s29  ;;  %v2153_v5 = vcombine.low %v362_v3, %v362_v3 }
 0x111   : > { %612 = vrot.lane.b32.xlu0 %v2640_v1, %s2457_s29  ;;  %v363_v1 = vld [vmem:[%s2541_s6 + $0x4c] sm:$0x1] }
 0x112   : > { %v3209_v2 = vpop.permute.xlu1 %1423 }
 0x113   : > { %4103 = vst [vmem:[#allocation50_spill] sm:$0xff] %v3209_v2  ;;  %v3211_v39 = vpop.permute.xlu0 %1429 }
 0x114   : > { %4104 = vst [vmem:[#allocation51_spill] sm:$0xff] %v3211_v39  ;;  %622 = vrot.lane.b32.xlu1 %v2693_v13, %s2457_s29  ;;  %v2154_v13 = vcombine.low %v362_v3, %v363_v1 }
 0x115   : > { %620 = vrot.lane.b32.xlu0 %v2665_v0, %s2457_s29 }
 0x116   : > { %v3218_v32 = vpop.permute.xlu1 %1431  ;;  %v632_v3 = vshrl.u32 %v2154_v13, 16 }
 0x117   : > { %4105 = vst [vmem:[#allocation52_spill] sm:$0xff] %v3218_v32  ;;  %v3220_v11 = vpop.permute.xlu0 %1425  ;;  %v4166_v32 = vld [vmem:[#allocation32_spill] sm:$0xff] }
 0x118   : > { %4106 = vst [vmem:[#allocation53_spill] sm:$0xff] %v3220_v11  ;;  %618 = vrot.lane.b32.xlu1 %v2671_v6, %s2457_s29  ;;  %v634_v6 = vshll.u32 %v2154_v13, 16 }
 0x119   : > { %616 = vrot.lane.b32.xlu0 %v2650_v4, %s2457_s29 }
 0x11a   : > { %v3227_v39 = vpop.permute.xlu1 %1438 }
 0x11b   : > { %4107 = vst [vmem:[#allocation54_spill] sm:$0xff] %v3227_v39  ;;  %v3229_v2 = vpop.permute.xlu0 %1433 }
 0x11c   : > { %4108 = vst [vmem:[#allocation55_spill] sm:$0xff] %v3229_v2  ;;  %626 = vrot.lane.b32.xlu1 %v2153_v5, %s2457_s29 }
 0x11d   : > { %624 = vrot.lane.b32.xlu0 %v2684_v10, %s2457_s29  ;;  %v636_v10 = vrot.slane %v634_v6, 1  ;;  %s2466_s29 = smov 60  }
 0x11e   : > { %v3234_v0 = vpop.permute.xlu1 %1446 }
 0x11f   : > { %4109 = vst [vmem:[#allocation56_spill] sm:$0xff] %v3234_v0  ;;  %v3236_v11 = vpop.permute.xlu0 %1440  ;;  %v4164_v0 = vld [vmem:[#allocation15_spill] sm:$0xff] }
 0x120   : > { %4110 = vst [vmem:[#allocation57_spill] sm:$0xff] %v3236_v11  ;;  %640 = vrot.lane.b32.xlu1 %v2590_v42, %s2458_s30  ;;  %v2406_v11 = vld [vmem:[%s2541_s6] sm:$0xf] }
 0x121   : > { %638 = vrot.lane.b32.xlu0 %v2586_v37, %s2458_s30  ;;  %v637_v37 = vor.u32 %v636_v10, %v632_v3  ;;  %v364_v10 = vld [vmem:[%s2661_s15] sm:$0xf] }
 0x122   : > { %v3242_v4 = vpop.permute.xlu1 %1442 }
 0x123   : > { %4111 = vst [vmem:[#allocation58_spill] sm:$0xff] %v3242_v4  ;;  %v3244_v2 = vpop.permute.xlu0 %1448  ;;  %v4163_v4 = vld [vmem:[#allocation24_spill] sm:$0xff] }
 0x124   : > { %4112 = vst [vmem:[#allocation59_spill] sm:$0xff] %v3244_v2  ;;  %648 = vrot.lane.b32.xlu1 %v2605_v56, %s2458_s30 }
 0x125   : > { %646 = vrot.lane.b32.xlu0 %v2609_v57, %s2458_s30 }
 0x126   : > { %v3250_v5 = vpop.permute.xlu1 %1450 }
 0x127   : > { %4113 = vst [vmem:[#allocation60_spill] sm:$0xff] %v3250_v5  ;;  %v3252_v1 = vpop.permute.xlu0 %1444  ;;  %v4162_v5 = vld [vmem:[#allocation19_spill] sm:$0xff] }
 0x128   : > { %4114 = vst [vmem:[#allocation61_spill] sm:$0xff] %v3252_v1  ;;  %644 = vrot.lane.b32.xlu1 %v2597_v50, %s2458_s30 }
 0x129   : > { %642 = vrot.lane.b32.xlu0 %v2601_v53, %s2458_s30 }
 0x12a   : > { %v3258_v42 = vpop.permute.xlu1 %1461 }
 0x12b   : > { %4115 = vst [vmem:[#allocation62_spill] sm:$0xff] %v3258_v42  ;;  %v3260_v2 = vpop.permute.xlu0 %1452  ;;  %v2405_v42 = vld [vmem:[%s2541_s6 + $0x30] sm:$0xf] }
 0x12c   : > { %4116 = vst [vmem:[#allocation63_spill] sm:$0xff] %v3260_v2  ;;  %652 = vrot.lane.b32.xlu1 %v637_v37, %s2458_s30  ;;  %v4125_v37 = vrot.slane %v3128_v24, 1  ;;  %v3317_v24 = vcombine.low %v2715_v21, %v2715_v21  ;;  %v3334_v21 = vcombine.low %v2677_v8, %v2677_v8  ;;  %v3351_v8 = vcombine.low %v2696_v14, %v2696_v14 }
 0x12d   : > { %650 = vrot.lane.b32.xlu0 %v575_v45, %s2458_s30 }
 0x12e   : > { %v3264_v56 = vpop.permute.xlu1 %1469  ;;  %4129 = vst [vmem:[#allocation75_spill] sm:$0xff] %v3317_v24  ;;  %4133 = vst [vmem:[#allocation79_spill] sm:$0xff] %v3334_v21 }
 0x12f   : > { %4117 = vst [vmem:[#allocation64_spill] sm:$0xff] %v3264_v56  ;;  %v3266_v57 = vpop.permute.xlu0 %1463  ;;  %4136 = vst [vmem:[#allocation82_spill] sm:$0xff] %v3351_v8 }
 0x130   : > { %4118 = vst [vmem:[#allocation65_spill] sm:$0xff] %v3266_v57  ;;  %657 = vrot.lane.b32.xlu1 %v2613_v58, %s2459_s7  ;;  %v654_v58 = vrot.slane %v2154_v13, 1  ;;  %v2404_v57 = vld [vmem:[%s2541_s6 + $0x8] sm:$0xf] }
 0x131   : > { %655 = vrot.lane.b32.xlu0 %v2617_v59, %s2459_s7  ;;  %v366_v59 = vld [vmem:[%s2661_s15 + $0x8] sm:$0xf] }
 0x132   : > { %v3272_v50 = vpop.permute.xlu1 %1465 }
 0x133   : > { %4119 = vst [vmem:[#allocation66_spill] sm:$0xff] %v3272_v50  ;;  %v3274_v53 = vpop.permute.xlu0 %1471 }
 0x134   : > { %4120 = vst [vmem:[#allocation67_spill] sm:$0xff] %v3274_v53  ;;  %665 = vrot.lane.b32.xlu1 %v2630_v62, %s2459_s7 }
 0x135   : > { %663 = vrot.lane.b32.xlu0 %v2634_v63, %s2459_s7  ;;  %v3295_v63 = vcombine.low %v366_v59, %v366_v59 }
 0x136   : > { %v3280_v45 = vpop.permute.xlu1 %1473 }
 0x137   : > { %4121 = vst [vmem:[#allocation68_spill] sm:$0xff] %v3280_v45  ;;  %v3282_v6 = vpop.permute.xlu0 %1467  ;;  %v365_v45 = vld [vmem:[%s2661_s15 + $0x4] sm:$0x1] }
 0x138   : > { %4122 = vst [vmem:[#allocation69_spill] sm:$0xff] %v3282_v6  ;;  %661 = vrot.lane.b32.xlu1 %v2622_v60, %s2459_s7  ;;  %v367_v6 = vld [vmem:[%s2661_s15 + $0xc] sm:$0x1]  ;;  %v2155_v60 = vcombine.low %v364_v10, %v364_v10 }
 0x139   : > { %659 = vrot.lane.b32.xlu0 %v2626_v61, %s2459_s7  ;;  %v3306_v53 = vcombine.low %v366_v59, %v367_v6  ;;  %v3327_v6 = vcombine.low %v2700_v16, %v2700_v16  ;;  %v3344_v16 = vcombine.low %v2719_v23, %v2719_v23 }
 0x13a   : > { %v3289_v3 = vpop.permute.xlu1 %1487 }
 0x13b   : > { %4123 = vst [vmem:[#allocation70_spill] sm:$0xff] %v3289_v3  ;;  %v3292_v62 = vpop.permute.xlu0 %1475  ;;  %4132 = vst [vmem:[#allocation78_spill] sm:$0xff] %v3327_v6 }
 0x13c   : > { %4124 = vst [vmem:[#allocation71_spill] sm:$0xff] %v3292_v62  ;;  %669 = vrot.lane.b32.xlu1 %v654_v58, %s2459_s7  ;;  %v3312_v58 = vcombine.low %v2745_v33, %v2745_v33  ;;  %v2163_v62 = vcombine.low %v364_v10, %v365_v45  ;;  %v745_v33 = vshll.u32 %v3306_v53, 16 }
 0x13d   : > { %667 = vrot.lane.b32.xlu0 %v4125_v37, %s2459_s7 }
 0x13e   : > { %v3301_v13 = vpop.permute.xlu1 %1495  ;;  %4128 = vst [vmem:[#allocation74_spill] sm:$0xff] %v3312_v58  ;;  %v738_v45 = vshll.u32 %v2163_v62, 16 }
 0x13f   : > { %4126 = vst [vmem:[#allocation72_spill] sm:$0xff] %v3301_v13  ;;  %v3304_v61 = vpop.permute.xlu0 %1489 }
 0x140   : > { %4127 = vst [vmem:[#allocation73_spill] sm:$0xff] %v3304_v61  ;;  %697 = vrot.lane.b32.xlu1 %v3295_v63, %s2460_s8 }
 0x141   : > { %695 = vrot.lane.b32.xlu0 %v2155_v60, %s2460_s8  ;;  %v743_v60 = vshrl.u32 %v3306_v53, 16 }
 0x142   : > { %v3319_v37 = vpop.permute.xlu1 %1491 }
 0x143   : > { %4130 = vst [vmem:[#allocation76_spill] sm:$0xff] %v3319_v37  ;;  %v3321_v13 = vpop.permute.xlu0 %1497  ;;  %v747_v37 = vrot.slane %v745_v33, 1 }
 0x144   : > { %4131 = vst [vmem:[#allocation77_spill] sm:$0xff] %v3321_v13  ;;  %705 = vrot.lane.b32.xlu1 %v3312_v58, %s2460_s8  ;;  %v740_v13 = vrot.slane %v738_v45, 1 }
 0x145   : > { %703 = vrot.lane.b32.xlu0 %v3317_v24, %s2460_s8  ;;  %v3359_v23 = vor.u32 %v747_v37, %v743_v60 }
 0x146   : > { %v3336_v59 = vpop.permute.xlu1 %1499 }
 0x147   : > { %4134 = vst [vmem:[#allocation80_spill] sm:$0xff] %v3336_v59  ;;  %v3338_v10 = vpop.permute.xlu0 %1493  ;;  %v736_v59 = vshrl.u32 %v2163_v62, 16 }
 0x148   : > { %4135 = vst [vmem:[#allocation81_spill] sm:$0xff] %v3338_v10  ;;  %701 = vrot.lane.b32.xlu1 %v3327_v6, %s2460_s8 }
 0x149   : > { %699 = vrot.lane.b32.xlu0 %v3334_v21, %s2460_s8  ;;  %v741_v33 = vor.u32 %v740_v13, %v736_v59 }
 0x14a   : > { %v3353_v10 = vpop.permute.xlu1 %1506 }
 0x14b   : > { %4137 = vst [vmem:[#allocation83_spill] sm:$0xff] %v3353_v10  ;;  %v3355_v50 = vpop.permute.xlu0 %1501 }
 0x14c   : > { %4138 = vst [vmem:[#allocation84_spill] sm:$0xff] %v3355_v50  ;;  %709 = vrot.lane.b32.xlu1 %v3344_v16, %s2460_s8  ;;  %v4149_v50 = vld [vmem:[#allocation9_spill] sm:$0xff] }
 0x14d   : > { %707 = vrot.lane.b32.xlu0 %v3351_v8, %s2460_s8 }
 0x14e   : > { %v3363_v56 = vpop.permute.xlu1 %1514 }
 0x14f   : > { %4139 = vst [vmem:[#allocation85_spill] sm:$0xff] %v3363_v56  ;;  %v3365_v2 = vpop.permute.xlu0 %1508  ;;  %v4042_v56 = vrot.slane %v4149_v50, 1 }
 0x150   : > { %4140 = vst [vmem:[#allocation86_spill] sm:$0xff] %v3365_v2  ;;  %793 = vrot.lane.b32.xlu1 %v3359_v23, %s2461_s9 }
 0x151   : > { %791 = vrot.lane.b32.xlu0 %v741_v33, %s2461_s9  ;;  %v4041_v33 = vrot.slane %v3306_v53, 1 }
 0x152   : > { %v3370_v14 = vpop.permute.xlu1 %1510 }
 0x153   : > { %4141 = vst [vmem:[#allocation87_spill] sm:$0xff] %v3370_v14  ;;  %v3372_v45 = vpop.permute.xlu0 %1516 }
 0x154   : > { %4142 = vst [vmem:[#allocation88_spill] sm:$0xff] %v3372_v45  ;;  %801 = vrot.lane.b32.xlu1 %v2820_v15, %s2461_s9 }
 0x155   : > { %799 = vrot.lane.b32.xlu0 %v2794_v28, %s2461_s9 }
 0x156   : > { %v3378_v13 = vpop.permute.xlu1 %1518 }
 0x157   : > { %4143 = vst [vmem:[#allocation89_spill] sm:$0xff] %v3378_v13  ;;  %v3380_v37 = vpop.permute.xlu0 %1512  ;;  %v807_v13 = vrot.slane %v2163_v62, 1  ;;  %v4153_v62 = vld [vmem:[#allocation4_spill] sm:$0xff] }
 0x158   : > { %4144 = vst [vmem:[#allocation90_spill] sm:$0xff] %v3380_v37  ;;  %797 = vrot.lane.b32.xlu1 %v2780_v9, %s2461_s9 }
 0x159   : > { %795 = vrot.lane.b32.xlu0 %v2753_v36, %s2461_s9 }
 0x15a   : > { %v3386_v59 = vpop.permute.xlu1 %1529 }
 0x15b   : > { %4145 = vst [vmem:[#allocation91_spill] sm:$0xff] %v3386_v59  ;;  %v3388_v60 = vpop.permute.xlu0 %1520 }
 0x15c   : > { %4146 = vst [vmem:[#allocation92_spill] sm:$0xff] %v3388_v60  ;;  %805 = vrot.lane.b32.xlu1 %v2802_v38, %s2461_s9  ;;  %v4150_v60 = vld [vmem:[#allocation6_spill] sm:$0xff] }
 0x15d   : > { %803 = vrot.lane.b32.xlu0 %v2774_v52, %s2461_s9  ;;  %v4043_v45 = vrot.slane %v4150_v60, 1 }
 0x15e   : > { %v3395_v37 = vpop.permute.xlu1 %1537 }
 0x15f   : > { %4147 = vst [vmem:[#allocation93_spill] sm:$0xff] %v3395_v37  ;;  %v3397_v14 = vpop.permute.xlu0 %1531  ;;  %v4044_v37 = vrot.slane %v4153_v62, 1 }
 0x160   : > { %4148 = vst [vmem:[#allocation94_spill] sm:$0xff] %v3397_v14  ;;  %817 = vrot.lane.b32.xlu1 %v4041_v33, %s2462_s10  ;;  %v4154_v14 = vld [vmem:[#allocation2_spill] sm:$0xff] }
 0x161   : > { %815 = vrot.lane.b32.xlu0 %v807_v13, %s2462_s10  ;;  %v4045_v10 = vrot.slane %v4154_v14, 1  ;;  %v4157_v13 = vld [vmem:[#allocation7_spill] sm:$0xff] }
 0x162   : > { %v3403_v59 = vpop.permute.xlu1 %1533 }
 0x163   : > { %4151 = vst [vmem:[#allocation9_spill] sm:$0xff] %v3403_v59  ;;  %v3405_v2 = vpop.permute.xlu0 %1539  ;;  %v4046_v59 = vrot.slane %v4157_v13, 1 }
 0x164   : > { %4152 = vst [vmem:[#allocation6_spill] sm:$0xff] %v3405_v2  ;;  %825 = vrot.lane.b32.xlu1 %v4042_v56, %s2462_s10  ;;  %v4158_v56 = vld [vmem:[#allocation3_spill] sm:$0xff] }
 0x165   : > { %823 = vrot.lane.b32.xlu0 %v4043_v45, %s2462_s10  ;;  %v4047_v2 = vrot.slane %v4158_v56, 1 }
 0x166   : > { %v3413_v33 = vpop.permute.xlu1 %1541 }
 0x167   : > { %4155 = vst [vmem:[#allocation4_spill] sm:$0xff] %v3413_v33  ;;  %v3415_v61 = vpop.permute.xlu0 %1535 }
 0x168   : > { %4156 = vst [vmem:[#allocation2_spill] sm:$0xff] %v3415_v61  ;;  %821 = vrot.lane.b32.xlu1 %v4044_v37, %s2462_s10 }
 0x169   : > { %819 = vrot.lane.b32.xlu0 %v4045_v10, %s2462_s10 }
 0x16a   : > { %v3423_v3 = vpop.permute.xlu1 %586 }
 0x16b   : > { %v3425_v1 = vpop.permute.xlu0 %1543 }
 0x16c   : > { %4159 = vst [vmem:[#allocation7_spill] sm:$0xff] %v3425_v1  ;;  %829 = vrot.lane.b32.xlu1 %v4046_v59, %s2462_s10 }
 0x16d   : > { %827 = vrot.lane.b32.xlu0 %v4047_v2, %s2462_s10  ;;  %v4160_v2 = vld [vmem:[#allocation5_spill] sm:$0xff] }
 0x16e   : > { %v591_v45 = vpop.permute.xlu1 %590  ;;  %v3442_v61 = vcombine.low %v4160_v2, %v4160_v2  ;;  %v933_v2 = vsel %vm912_vm0, %v2405_v42, %v4162_v5  ;;  %v4167_v5 = vld [vmem:[#allocation33_spill] sm:$0xff] }
 0x16f   : > { %v589_v37 = vpop.permute.xlu0 %588 }
 0x170   : > { %836 = vrot.lane.b32.xlu1 %v3334_v21, %s2463_s11  ;;  %4161 = vst [vmem:[#allocation3_spill] sm:$0xff] %v3442_v61  ;;  %v2403_v21 = vld [vmem:[%s2541_s6 + $0x38] sm:$0xf] }
 0x171   : > { %834 = vrot.lane.b32.xlu0 %v3295_v63, %s2463_s11 }
 0x172   : > { %v596_v10 = vpop.permute.xlu1 %595 }
 0x173   : > { %v594_v33 = vpop.permute.xlu0 %593 }
 0x174   : > { %844 = vrot.lane.b32.xlu1 %v3351_v8, %s2463_s11 }
 0x175   : > { %842 = vrot.lane.b32.xlu0 %v3312_v58, %s2463_s11  ;;  %v936_v58 = vsel %vm912_vm0, %v2403_v21, %v2979_v18  ;;  %v915_v18 = vsel %vm912_vm0, %v2406_v11, %v4164_v0  ;;  %v4165_v21 = vld [vmem:[#allocation25_spill] sm:$0xff] }
 0x176   : > { %v3435_v59 = vpop.permute.xlu1 %603  ;;  %v951_v39 = vsel %vm937_vm1, %v933_v2, %v4165_v21 }
 0x177   : > { %v3437_v1 = vpop.permute.xlu0 %601  ;;  %v968_v42 = vsel %vm954_vm2, %v951_v39, %v4167_v5 }
 0x178   : > { %840 = vrot.lane.b32.xlu1 %v3317_v24, %s2463_s11  ;;  %v918_v24 = vsel %vm912_vm0, %v2404_v57, %v2965_v55  ;;  %v985_v0 = vsel %vm971_vm3, %v968_v42, %v589_v37  ;;  %v4172_v37 = vld [vmem:[#allocation34_spill] sm:$0xff]  ;;  %v2407_v42 = vld [vmem:[%s2541_s6 + $0x28] sm:$0xf] }
 0x179   : > { %838 = vrot.lane.b32.xlu0 %v3327_v6, %s2463_s11  ;;  %v953_v6 = vsel %vm937_vm1, %v936_v58, %v4163_v4  ;;  %v4168_v58 = vld [vmem:[#allocation12_spill] sm:$0xff] }
 0x17a   : > { %v3445_v63 = vpop.permute.xlu1 %599  ;;  %v970_v55 = vsel %vm954_vm2, %v953_v6, %v4166_v32  ;;  %v941_v11 = vsel %vm937_vm1, %v918_v24, %v4168_v58  ;;  %v4169_v6 = vld [vmem:[#allocation26_spill] sm:$0xff] }
 0x17b   : > { %v3450_v8 = vpop.permute.xlu0 %597  ;;  %v987_v4 = vsel %vm971_vm3, %v970_v55, %v591_v45  ;;  %v958_v21 = vsel %vm954_vm2, %v941_v11, %v4169_v6  ;;  %v4171_v45 = vld [vmem:[#allocation27_spill] sm:$0xff]  ;;  %v2408_v11 = vld [vmem:[%s2541_s6 + $0x20] sm:$0xf] }
 0x17c   : > { %848 = vrot.lane.b32.xlu1 %v3442_v61, %s2463_s11  ;;  %v4170_v61 = vld [vmem:[#allocation13_spill] sm:$0xff]  ;;  %v975_v55 = vsel %vm971_vm3, %v958_v21, %v4172_v37  ;;  %v4176_v6 = vld [vmem:[#allocation22_spill] sm:$0xff]  ;;  %v4177_v37 = vld [vmem:[#allocation23_spill] sm:$0xff] }
 0x17d   : > { %846 = vrot.lane.b32.xlu0 %v3344_v16, %s2463_s11  ;;  %v939_v39 = vsel %vm937_vm1, %v915_v18, %v4170_v61  ;;  %v4174_v61 = vld [vmem:[#allocation35_spill] sm:$0xff]  ;;  %s2467_s11 = smov 64  }
 0x17e   : > { %v608_v57 = vpop.permute.xlu1 %607  ;;  %v956_v24 = vsel %vm954_vm2, %v939_v39, %v4171_v45 }
 0x17f   : > { %v1004_v2 = vsel %vm988_vm4, %v987_v4, %v608_v57  ;;  %v606_v32 = vpop.permute.xlu0 %605  ;;  %v4173_v4 = vld [vmem:[#allocation17_spill] sm:$0xff]  ;;  %v973_v18 = vsel %vm971_vm3, %v956_v24, %v4174_v61 }
 0x180   : > { %v1002_v5 = vsel %vm988_vm4, %v985_v0, %v606_v32  ;;  %862 = vrot.lane.b32.xlu1 %v2753_v36, %s2464_s12  ;;  %v930_v57 = vsel %vm912_vm0, %v2407_v42, %v4173_v4  ;;  %v992_v36 = vsel %vm988_vm4, %v975_v55, %v596_v10  ;;  %v4175_v0 = vld [vmem:[#allocation18_spill] sm:$0xff]  ;;  %v4179_v4 = vld [vmem:[#allocation31_spill] sm:$0xff]  ;;  %v2409_v61 = vld [vmem:[%s2541_s6 + $0x18] sm:$0xf] }
 0x181   : > { %860 = vrot.lane.b32.xlu0 %v3359_v23, %s2464_s12  ;;  %v927_v32 = vsel %vm912_vm0, %v2408_v11, %v4175_v0  ;;  %v949_v21 = vsel %vm937_vm1, %v930_v57, %v4176_v6  ;;  %v990_v23 = vsel %vm988_vm4, %v973_v18, %v594_v33  ;;  %v4178_v42 = vld [vmem:[#allocation30_spill] sm:$0xff]  ;;  %v4180_v18 = vld [vmem:[#allocation16_spill] sm:$0xff] }
 0x182   : > { %v615_v58 = vpop.permute.xlu1 %614  ;;  %v947_v24 = vsel %vm937_vm1, %v927_v32, %v4177_v37  ;;  %v966_v10 = vsel %vm954_vm2, %v949_v21, %v4178_v42  ;;  %v2410_v32 = vld [vmem:[%s2541_s6 + $0x10] sm:$0xf]  ;;  %v4182_v6 = vld [vmem:[#allocation14_spill] sm:$0xff]  ;;  %s2465_s6 = smov 56  }
 0x183   : > { %v1009_v39 = vsel %vm1005_vm5, %v992_v36, %v615_v58  ;;  %v613_v45 = vpop.permute.xlu0 %612  ;;  %v964_v57 = vsel %vm954_vm2, %v947_v24, %v4179_v4  ;;  %v983_v33 = vsel %vm971_vm3, %v966_v10, %v3423_v3  ;;  %v924_v36 = vsel %vm912_vm0, %v2409_v61, %v4180_v18  ;;  %v4181_v58 = vld [vmem:[#allocation39_spill] sm:$0xff]  ;;  %v4184_v24 = vld [vmem:[#allocation21_spill] sm:$0xff]  ;;  %v4185_v10 = vld [vmem:[#allocation28_spill] sm:$0xff] }
 0x184   : > { %v1007_v55 = vsel %vm1005_vm5, %v990_v23, %v613_v45  ;;  %870 = vrot.lane.b32.xlu1 %v2774_v52, %s2464_s12  ;;  %v981_v11 = vsel %vm971_vm3, %v964_v57, %v4181_v58  ;;  %v1000_v0 = vsel %vm988_vm4, %v983_v33, %v3435_v59  ;;  %v921_v21 = vsel %vm912_vm0, %v2410_v32, %v4182_v6  ;;  %v4183_v23 = vld [vmem:[#allocation20_spill] sm:$0xff]  ;;  %v4186_v57 = vld [vmem:[#allocation29_spill] sm:$0xff]  ;;  %v4189_v6 = vld [vmem:[#allocation11_spill] sm:$0xff] }
 0x185   : > { %868 = vrot.lane.b32.xlu0 %v2820_v15, %s2464_s12  ;;  %v945_v3 = vsel %vm937_vm1, %v924_v36, %v4183_v23  ;;  %v998_v15 = vsel %vm988_vm4, %v981_v11, %v3437_v1  ;;  %v943_v42 = vsel %vm937_vm1, %v921_v21, %v4184_v24  ;;  %v4187_v1 = vld [vmem:[#allocation36_spill] sm:$0xff]  ;;  %v4188_v18 = vld [vmem:[#allocation37_spill] sm:$0xff]  ;;  %v4190_v23 = vld [vmem:[#allocation38_spill] sm:$0xff] }
 0x186   : > { %v623_v52 = vpop.permute.xlu1 %622  ;;  %v962_v59 = vsel %vm954_vm2, %v945_v3, %v4185_v10  ;;  %v960_v33 = vsel %vm954_vm2, %v943_v42, %v4186_v57  ;;  %v4193_v42 = vrot.slane %v3306_v53, 1  ;;  %v4194_v10 = vld [vmem:[#allocation8_spill] sm:$0xff] }
 0x187   : > { %v3530_v45 = vsel %vm1005_vm5, %v1000_v0, %v623_v52  ;;  %v621_v37 = vpop.permute.xlu0 %620  ;;  %v979_v61 = vsel %vm971_vm3, %v962_v59, %v4187_v1  ;;  %v977_v36 = vsel %vm971_vm3, %v960_v33, %v4188_v18  ;;  %v1552_v59 = vsel %vm912_vm0, %v4149_v50, %v3086_v19  ;;  %v4197_v18 = vld [vmem:[#allocation41_spill] sm:$0xff] }
 0x188   : > { %v3537_v4 = vsel %vm1005_vm5, %v998_v15, %v621_v37  ;;  %866 = vrot.lane.b32.xlu1 %v2794_v28, %s2464_s12  ;;  %v996_v58 = vsel %vm988_vm4, %v979_v61, %v3445_v63  ;;  %v994_v0 = vsel %vm988_vm4, %v977_v36, %v3450_v8  ;;  %v1546_v8 = vsel %vm912_vm0, %v4154_v14, %v4190_v23  ;;  %v4192_v37 = vld [vmem:[#allocation40_spill] sm:$0xff]  ;;  %v4199_v36 = vld [vmem:[#allocation42_spill] sm:$0xff] }
 0x189   : > { %864 = vrot.lane.b32.xlu0 %v2780_v9, %s2464_s12  ;;  %v4191_v15 = vrot.slane %v4154_v14, 1  ;;  %v1548_v24 = vsel %vm912_vm0, %v4153_v62, %v4192_v37  ;;  %v1556_v14 = vsel %vm912_vm0, %v4157_v13, %v3079_v44  ;;  %v1562_v57 = vsel %vm937_vm1, %v1546_v8, %v3091_v31  ;;  %v4195_v44 = vld [vmem:[#allocation10_spill] sm:$0xff] }
 0x18a   : > { %v619_v11 = vpop.permute.xlu1 %618  ;;  %v1560_v53 = vsel %vm912_vm0, %v4195_v44, %v3093_v47  ;;  %v1564_v19 = vsel %vm937_vm1, %v1548_v24, %v3101_v27  ;;  %v1572_v61 = vsel %vm937_vm1, %v1556_v14, %v3110_v46  ;;  %v1578_v46 = vsel %vm954_vm2, %v1562_v57, %v3123_v48 }
 0x18b   : > { %v3554_v28 = vsel %vm1005_vm5, %v996_v58, %v619_v11  ;;  %v617_v52 = vpop.permute.xlu0 %616  ;;  %v4200_v11 = vld [vmem:[#allocation43_spill] sm:$0xff]  ;;  %v1588_v48 = vsel %vm954_vm2, %v1572_v61, %v3145_v41  ;;  %v876_v41 = vrot.slane %v4194_v10, 1 }
 0x18c   : > { %v3557_v32 = vsel %vm1005_vm5, %v994_v0, %v617_v52  ;;  %874 = vrot.lane.b32.xlu1 %v4189_v6, %s2464_s12  ;;  %v1580_v0 = vsel %vm954_vm2, %v1564_v19, %v4200_v11  ;;  %v1604_v8 = vsel %vm971_vm3, %v1588_v48, %v3177_v7  ;;  %v4221_v48 = vld [vmem:[#allocation62_spill] sm:$0xff] }
 0x18d   : > { %872 = vrot.lane.b32.xlu0 %v2802_v38, %s2464_s12  ;;  %v2396_v38 = vld [vmem:[%s4019_s3] sm:$0xff]   ;;  %s2133_s12 = sshll.u32 %s4278_s18, 3 }
 0x18e   : > { %v627_v9 = vpop.permute.xlu1 %626  ;;  %2240 = vmatprep.subr.bf16.mxu0 %v2396_v38  ;;  %2262 = vmatprep.subr.bf16.mxu1 %v2396_v38 }
 0x18f   : > { %v3564_v63 = vsel %vm1005_vm5, %v1004_v2, %v627_v9  ;;  %v625_v21 = vpop.permute.xlu0 %624  ;;  %v1554_v2 = vsel %vm912_vm0, %v4158_v56, %v3069_v20  ;;  %v1558_v20 = vsel %vm912_vm0, %v4194_v10, %v3084_v29  ;;  %2241 = vmatpush3.bf16.msra.mxu0 %v2396_v38  ;;  %2269 = vmatpush3.bf16.msra.mxu1 %v2396_v38 }
 0x190   : > { %v3570_v3 = vsel %vm1005_vm5, %v1002_v5, %v625_v21  ;;  %879 = vrot.lane.b32.xlu1 %v4191_v15, %s2465_s6  ;;  %v1550_v5 = vsel %vm912_vm0, %v4150_v60, %v3077_v34  ;;  %v1570_v33 = vsel %vm937_vm1, %v1554_v2, %v3099_v25  ;;  %v4196_v25 = vrot.slane %v4158_v56, 1  ;;  %v4203_v15 = vld [vmem:[#allocation44_spill] sm:$0xff] }
 0x191   : > { %877 = vrot.lane.b32.xlu0 %v4193_v42, %s2465_s6  ;;  %v1566_v31 = vsel %vm937_vm1, %v1550_v5, %v3107_v17  ;;  %v1574_v27 = vsel %vm937_vm1, %v1558_v20, %v3115_v30  ;;  %v1568_v17 = vsel %vm937_vm1, %v1552_v59, %v3117_v12  ;;  %v4198_v56 = vrot.slane %v4149_v50, 1  ;;  %v4207_v5 = vld [vmem:[#allocation48_spill] sm:$0xff]  ;;  %v4208_v42 = vld [vmem:[#allocation49_spill] sm:$0xff]  ;;  %v4209_v20 = vld [vmem:[#allocation50_spill] sm:$0xff] }
 0x192   : > { %v641_v34 = vpop.permute.xlu1 %640  ;;  %v1586_v58 = vsel %vm954_vm2, %v1570_v33, %v4199_v36  ;;  %v1582_v30 = vsel %vm954_vm2, %v1566_v31, %v3143_v54  ;;  %v1590_v52 = vsel %vm954_vm2, %v1574_v27, %v3152_v26  ;;  %v1584_v9 = vsel %vm954_vm2, %v1568_v17, %v3154_v49  ;;  %v4213_v31 = vld [vmem:[#allocation54_spill] sm:$0xff]  ;;  %v4216_v27 = vld [vmem:[#allocation56_spill] sm:$0xff] }
 0x193   : > { %v3607_v29 = vsel %vm1022_vm6, %v1009_v39, %v641_v34  ;;  %v639_v1 = vpop.permute.xlu0 %638  ;;  %v2397_v39 = vld [vmem:[%s4019_s3 + $0x8] sm:$0xff]   ;;  %v1594_v54 = vsel %vm971_vm3, %v1578_v46, %v3159_v35  ;;  %v4201_v26 = vrot.slane %v4150_v60, 1  ;;  %v1602_v35 = vsel %vm971_vm3, %v1586_v58, %v3166_v43  ;;  %v4217_v46 = vld [vmem:[#allocation57_spill] sm:$0xff] }
 0x194   : > { %v3616_v47 = vsel %vm1022_vm6, %v1007_v55, %v639_v1  ;;  %887 = vrot.lane.b32.xlu1 %v4196_v25, %s2465_s6  ;;  %v1576_v55 = vsel %vm937_vm1, %v1560_v53, %v4197_v18  ;;  %2242 = vmatprep.subr.bf16.mxu0 %v2397_v39  ;;  %v1598_v23 = vsel %vm971_vm3, %v1582_v30, %v3175_v51  ;;  %v4202_v60 = vrot.slane %v4153_v62, 1  ;;  %v4206_v51 = vld [vmem:[#allocation47_spill] sm:$0xff]  ;;  %v4211_v53 = vld [vmem:[#allocation52_spill] sm:$0xff]  ;;  %v4212_v1 = vld [vmem:[#allocation53_spill] sm:$0xff] }
 0x195   : > { %885 = vrot.lane.b32.xlu0 %v4198_v56, %s2465_s6  ;;  %2263 = vmatprep.subr.bf16.mxu1 %v2397_v39  ;;  %v1592_v49 = vsel %vm954_vm2, %v1576_v55, %v3161_v40  ;;  %v1606_v38 = vsel %vm971_vm3, %v1590_v52, %v4203_v15  ;;  %v4204_v40 = vld [vmem:[#allocation45_spill] sm:$0xff]  ;;  %v1618_v14 = vsel %vm988_vm4, %v1602_v35, %v4207_v5  ;;  %v4210_v34 = vld [vmem:[#allocation51_spill] sm:$0xff]  ;;  %v4218_v56 = vld [vmem:[#allocation58_spill] sm:$0xff]  ;;  %vm1769_vm0 = vcmask 523264  }
 0x196   : > { %v649_v12 = vpop.permute.xlu1 %648  ;;  %2243 = vmatpush3.bf16.msra.mxu0 %v2397_v39  ;;  %2270 = vmatpush3.bf16.msra.mxu1 %v2397_v39  ;;  %v1600_v2 = vsel %vm971_vm3, %v1584_v9, %v4204_v40  ;;  %v1608_v24 = vsel %vm971_vm3, %v1592_v49, %v4206_v51  ;;  %v1614_v59 = vsel %vm988_vm4, %v1598_v23, %v4209_v20  ;;  %v4215_v25 = vld [vmem:[#allocation55_spill] sm:$0xff]  ;;  %v4220_v30 = vld [vmem:[#allocation60_spill] sm:$0xff]  ;;  %v4225_v49 = vld [vmem:[#allocation70_spill] sm:$0xff]  ;;  %vm1868_vm1 = vcmask 883712  }
 0x197   : > { %v3647_v50 = vsel %vm1022_vm6, %v3530_v45, %v649_v12  ;;  %v647_v6 = vpop.permute.xlu0 %646  ;;  %v2398_v45 = vld [vmem:[%s4019_s3 + $0x10] sm:$0xff]   ;;  %v1620_v44 = vsel %vm988_vm4, %v1604_v8, %v4210_v34  ;;  %v1622_v33 = vsel %vm988_vm4, %v1606_v38, %v4211_v53  ;;  %v1616_v19 = vsel %vm988_vm4, %v1600_v2, %v4212_v1  ;;  %v4219_v58 = vld [vmem:[#allocation59_spill] sm:$0xff] }
 0x198   : > { %v3655_v21 = vsel %vm1022_vm6, %v3537_v4, %v647_v6  ;;  %883 = vrot.lane.b32.xlu1 %v4201_v26, %s2465_s6  ;;  %v1596_v4 = vsel %vm971_vm3, %v1580_v0, %v3168_v22  ;;  %2244 = vmatprep.subr.bf16.mxu0 %v2398_v45  ;;  %v4205_v22 = vld [vmem:[#allocation46_spill] sm:$0xff]  ;;  %v1624_v39 = vsel %vm988_vm4, %v1608_v24, %v4215_v25  ;;  %v4222_v6 = vld [vmem:[#allocation65_spill] sm:$0xff]  ;;  %v4228_v15 = vld [vmem:[#allocation63_spill] sm:$0xff]  ;;  %vm2006_vm3 = vcmask 60416  }
 0x199   : > { %881 = vrot.lane.b32.xlu0 %v4202_v60, %s2465_s6  ;;  %2264 = vmatprep.subr.bf16.mxu1 %v2398_v45  ;;  %v1610_v37 = vsel %vm988_vm4, %v1594_v54, %v4205_v22  ;;  %v1612_v10 = vsel %vm988_vm4, %v1596_v4, %v4208_v42  ;;  %v1634_v17 = vsel %vm1005_vm5, %v1618_v14, %v4216_v27  ;;  %v2400_v26 = vld [vmem:[%s4019_s3 + $0x20] sm:$0xff]   ;;  %v4226_v4 = vld [vmem:[#allocation73_spill] sm:$0xff]  ;;  %v3752_v60 = vld [vmem:[%s2661_s15 + $0x48] sm:$0xf] }
 0x19a   : > { %v645_v43 = vpop.permute.xlu1 %644  ;;  %2245 = vmatpush3.bf16.msra.mxu0 %v2398_v45  ;;  %2271 = vmatpush3.bf16.msra.mxu1 %v2398_v45  ;;  %v1626_v61 = vsel %vm1005_vm5, %v1610_v37, %v4213_v31  ;;  %v1628_v18 = vsel %vm1005_vm5, %v1612_v10, %v4217_v46  ;;  %v1630_v36 = vsel %vm1005_vm5, %v1614_v59, %v4218_v56  ;;  %v4229_v40 = vld [vmem:[#allocation83_spill] sm:$0xff]  ;;  %v4233_v10 = vld [vmem:[#allocation64_spill] sm:$0xff]  ;;  %v4234_v59 = vld [vmem:[#allocation66_spill] sm:$0xff] }
 0x19b   : > { %v3687_v62 = vsel %vm1022_vm6, %v3554_v28, %v645_v43  ;;  %v643_v7 = vpop.permute.xlu0 %642  ;;  %v2399_v28 = vld [vmem:[%s4019_s3 + $0x18] sm:$0xff]   ;;  %v1638_v12 = vsel %vm1005_vm5, %v1622_v33, %v4220_v30  ;;  %v1642_v52 = vsel %vm1022_vm6, %v1626_v61, %v4221_v48  ;;  %v1644_v9 = vsel %vm1022_vm6, %v1628_v18, %v4222_v6  ;;  %v4230_v43 = vld [vmem:[#allocation86_spill] sm:$0xff]  ;;  %v4231_v51 = vld [vmem:[#allocation91_spill] sm:$0xff] }
 0x19c   : > { %v3697_v57 = vsel %vm1022_vm6, %v3557_v32, %v643_v7  ;;  %891 = vrot.lane.b32.xlu1 %v876_v41, %s2465_s6  ;;  %v4214_v32 = vrot.slane %v4157_v13, 1  ;;  %2246 = vmatprep.subr.bf16.mxu0 %v2399_v28  ;;  %v1636_v13 = vsel %vm1005_vm5, %v1620_v44, %v4219_v58  ;;  %v4224_v41 = vld [vmem:[#allocation61_spill] sm:$0xff]  ;;  %v1658_v35 = vsel %vm1039_vm7, %v1642_v52, %v4225_v49  ;;  %v4232_v7 = vld [vmem:[#allocation94_spill] sm:$0xff]  ;;  %v4235_v34 = vld [vmem:[#allocation67_spill] sm:$0xff] }
 0x19d   : > { %2265 = vmatprep.subr.bf16.mxu1 %v2399_v28  ;;  %v1632_v45 = vsel %vm1005_vm5, %v1616_v19, %v4224_v41  ;;  %v1660_v23 = vsel %vm1039_vm7, %v1644_v9, %v4226_v4  ;;  %v2173_v8 = vcombine.low %v3752_v60, %v3752_v60  ;;  %v1640_v38 = vsel %vm1005_vm5, %v1624_v39, %v4228_v15  ;;  %v4236_v33 = vld [vmem:[#allocation68_spill] sm:$0xff]  ;;  %v4237_v19 = vld [vmem:[#allocation69_spill] sm:$0xff]  ;;  %v4238_v61 = vld [vmem:[#allocation71_spill] sm:$0xff] }
 0x19e   : > { %889 = vrot.lane.b32.xlu0 %v4214_v32, %s2465_s6  ;;  %v653_v55 = vpop.permute.xlu1 %652  ;;  %2247 = vmatpush3.bf16.msra.mxu0 %v2399_v28  ;;  %v1674_v2 = vsel %vm1056_vm8, %v1658_v35, %v4229_v40  ;;  %v1676_v22 = vsel %vm1056_vm8, %v1660_v23, %v4230_v43  ;;  %v1650_v20 = vsel %vm1022_vm6, %v1634_v17, %v4233_v10  ;;  %v4239_v25 = vld [vmem:[#allocation77_spill] sm:$0xff]  ;;  %v4240_v39 = vld [vmem:[#allocation82_spill] sm:$0xff]  ;;  %v4242_v17 = vld [vmem:[#allocation88_spill] sm:$0xff]  ;;  %s2134_s6 = sshll.u32 %s4276_s19, 6 }
 0x19f   : > { %v3726_v11 = vsel %vm1022_vm6, %v3564_v63, %v653_v55  ;;  %v651_v0 = vpop.permute.xlu0 %650  ;;  %2272 = vmatpush3.bf16.msra.mxu1 %v2399_v28  ;;  %v4223_v63 = vld [vmem:[#allocation78_spill] sm:$0xff]  ;;  %2248 = vmatprep.subr.bf16.mxu0 %v2400_v26  ;;  %v3764_v24 = vsel %vm1073_vm9, %v1674_v2, %v4231_v51  ;;  %v3768_v5 = vsel %vm1073_vm9, %v1676_v22, %v4232_v7  ;;  %v4245_v48 = vld [vmem:[#allocation76_spill] sm:$0xff]  ;;  %v4246_v6 = vld [vmem:[#allocation93_spill] sm:$0xff]  ;;  %s340_s16 = sadd.s32 %s2134_s6, %s2133_s12 }
 0x1a0   : > { %v3736_v54 = vsel %vm1022_vm6, %v3570_v3, %v651_v0  ;;  %898 = vrot.lane.b32.xlu1 %v4223_v63, %s2466_s29  ;;  %v4227_v3 = vld [vmem:[#allocation79_spill] sm:$0xff]  ;;  %2266 = vmatprep.subr.bf16.mxu1 %v2400_v26  ;;  %v1646_v28 = vsel %vm1022_vm6, %v1630_v36, %v4234_v59  ;;  %v1652_v44 = vsel %vm1022_vm6, %v1636_v13, %v4235_v34  ;;  %v1707_v18 = vshll.u32 %v3764_v24, 16  ;;  %v4243_v36 = vld [vmem:[#allocation85_spill] sm:$0xff]  ;;  %v4244_v13 = vld [vmem:[#allocation6_spill] sm:$0xff]  ;;  %s2135_s17 = sshll.u32 %s340_s16, 2 }
 0x1a1   : > { %v1654_v1 = vsel %vm1022_vm6, %v1638_v12, %v4236_v33  ;;  %v1648_v31 = vsel %vm1022_vm6, %v1632_v45, %v4237_v19  ;;  %v1656_v32 = vsel %vm1022_vm6, %v1640_v38, %v4238_v61  ;;  %v1713_v55 = vshll.u32 %v3768_v5, 16  ;;  %v4248_v41 = vld [vmem:[#allocation80_spill] sm:$0xff]  ;;  %v4249_v49 = vld [vmem:[#allocation81_spill] sm:$0xff]  ;;  %v4252_v15 = vld [vmem:[#allocation75_spill] sm:$0xff]  ;;  %s3983_s25 = scalar_lea.vmem %s4021_s5, %s2135_s17 }
 0x1a2   : > { %896 = vrot.lane.b32.xlu0 %v4227_v3, %s2466_s29  ;;  %v658_v37 = vpop.permute.xlu1 %657  ;;  %2249 = vmatpush3.bf16.msra.mxu0 %v2400_v26  ;;  %v1662_v52 = vsel %vm1039_vm7, %v1646_v28, %v4245_v48  ;;  %v1670_v45 = vsel %vm1039_vm7, %v1654_v1, %v4248_v41  ;;  %v1664_v35 = vsel %vm1039_vm7, %v1648_v31, %v4249_v49  ;;  %v4250_v4 = vld [vmem:[#allocation84_spill] sm:$0xff]  ;;  %v4251_v3 = vld [vmem:[#allocation87_spill] sm:$0xff]  ;;  %v4253_v38 = vld [vmem:[#allocation90_spill] sm:$0xff]  ;;  %v1709_v2 = vrot.slane %v1707_v18, 1 }
 0x1a3   : > { %v3772_v14 = vsel %vm1039_vm7, %v3607_v29, %v658_v37  ;;  %v656_v42 = vpop.permute.xlu0 %655  ;;  %2273 = vmatpush3.bf16.msra.mxu1 %v2400_v26  ;;  %v2401_v29 = vld [vmem:[%s4019_s3 + $0x28] sm:$0xff]   ;;  %v4247_v26 = vld [vmem:[#allocation74_spill] sm:$0xff]  ;;  %v1672_v23 = vsel %vm1039_vm7, %v1656_v32, %v4250_v4  ;;  %v1680_v40 = vsel %vm1056_vm8, %v1664_v35, %v4253_v38  ;;  %v1715_v43 = vrot.slane %v1713_v55, 1  ;;  %v4257_v19 = vld [vmem:[#allocation92_spill] sm:$0xff] }
 0x1a4   : > { %v3782_v53 = vsel %vm1039_vm7, %v3616_v47, %v656_v42  ;;  %906 = vrot.lane.b32.xlu1 %v3344_v16, %s2466_s29  ;;  %v1668_v47 = vsel %vm1039_vm7, %v1652_v44, %v4239_v25  ;;  %v4241_v16 = vld [vmem:[#allocation72_spill] sm:$0xff]  ;;  %2250 = vmatprep.subr.bf16.mxu0 %v2401_v29  ;;  %v4254_v7 = vld [vmem:[#allocation2_spill] sm:$0xff]  ;;  %v1705_v28 = vshrl.u32 %v3764_v24, 16  ;;  %v1711_v34 = vshrl.u32 %v3768_v5, 16  ;;  %v4255_v44 = vld [vmem:[#allocation9_spill] sm:$0xff] }
 0x1a5   : > { %v1666_v27 = vsel %vm1039_vm7, %v1650_v20, %v4241_v16  ;;  %v1684_v46 = vsel %vm1056_vm8, %v1668_v47, %v4242_v17  ;;  %2267 = vmatprep.subr.bf16.mxu1 %v2401_v29  ;;  %v1696_v42 = vsel %vm1073_vm9, %v1680_v40, %v4254_v7  ;;  %v1688_v24 = vsel %vm1056_vm8, %v1672_v23, %v4257_v19  ;;  %v4258_v5 = vld [vmem:[#allocation3_spill] sm:$0xff] }
 0x1a6   : > { %904 = vrot.lane.b32.xlu0 %v4240_v39, %s2466_s29  ;;  %v666_v56 = vpop.permute.xlu1 %665  ;;  %v1682_v58 = vsel %vm1056_vm8, %v1666_v27, %v4243_v36  ;;  %v1700_v0 = vsel %vm1073_vm9, %v1684_v46, %v4244_v13  ;;  %2251 = vmatpush3.bf16.msra.mxu0 %v2401_v29  ;;  %v1710_v31 = vor.u32 %v1709_v2, %v1705_v28  ;;  %v4259_v60 = vld [vmem:[#allocation7_spill] sm:$0xff]  ;;  %v4260_v46 = vld [vmem:[#allocation4_spill] sm:$0xff] }
 0x1a7   : > { %v3811_v30 = vsel %vm1039_vm7, %v3647_v50, %v666_v56  ;;  %v664_v12 = vpop.permute.xlu0 %663  ;;  %2274 = vmatpush3.bf16.msra.mxu1 %v2401_v29  ;;  %v1698_v9 = vsel %vm1073_vm9, %v1682_v58, %v4246_v6  ;;  %v2402_v50 = vld [vmem:[%s4019_s3 + $0x30] sm:$0x3f]   ;;  %v1737_v22 = vshll.u32 %v1700_v0, 16  ;;  %v1716_v61 = vor.u32 %v1715_v43, %v1711_v34 }
 0x1a8   : > { %v3819_v63 = vsel %vm1039_vm7, %v3655_v21, %v664_v12  ;;  %902 = vrot.lane.b32.xlu1 %v4247_v26, %s2466_s29  ;;  %v1678_v21 = vsel %vm1056_vm8, %v1662_v52, %v4251_v3  ;;  %2276 = vmatprep.subr.msk.bf16.mxu0 %vm1881_vm10, %v2402_v50  ;;  %v1731_v51 = vshll.u32 %v1698_v9, 16  ;;  %v1883_v59 = vsel %vm1881_vm10, %v2402_v50, 0 }
 0x1a9   : > { %2277 = vmatprep.subr.msk.bf16.mxu1 %vm1881_vm10, %v2402_v50  ;;  %v1694_v29 = vsel %vm1073_vm9, %v1678_v21, %v4255_v44  ;;  %v1739_v32 = vrot.slane %v1737_v22, 1  ;;  %v1735_v17 = vshrl.u32 %v1700_v0, 16  ;;  %v1729_v56 = vshrl.u32 %v1698_v9, 16 }
 0x1aa   : > { %900 = vrot.lane.b32.xlu0 %v4252_v15, %s2466_s29  ;;  %v662_v37 = vpop.permute.xlu1 %661  ;;  %2253 = vmatpush3.bf16.msra.mxu0 %v1883_v59  ;;  %v1733_v47 = vrot.slane %v1731_v51, 1  ;;  %v1719_v39 = vshll.u32 %v1694_v29, 16  ;;  %v1723_v26 = vshrl.u32 %v1696_v42, 16  ;;  %v1717_v9 = vshrl.u32 %v1694_v29, 16 }
 0x1ab   : > { %v1047_v10 = vsel %vm1039_vm7, %v3687_v62, %v662_v37  ;;  %v660_v20 = vpop.permute.xlu0 %659  ;;  %v4256_v62 = vld [vmem:[#allocation89_spill] sm:$0xff]  ;;  %2275 = vmatpush3.bf16.msra.mxu1 %v1883_v59  ;;  %v1740_v36 = vor.u32 %v1739_v32, %v1735_v17 }
 0x1ac   : > { %v1045_v33 = vsel %vm1039_vm7, %v3697_v57, %v660_v20  ;;  %910 = vrot.lane.b32.xlu1 %v2173_v8, %s2466_s29  ;;  %v1686_v1 = vsel %vm1056_vm8, %v1670_v45, %v4256_v62  ;;  %v1725_v57 = vshll.u32 %v1696_v42, 16  ;;  %v1704_v8 = vsel %vm1073_vm9, %v1688_v24, %v4259_v60 }
 0x1ad   : > { %v1702_v18 = vsel %vm1073_vm9, %v1686_v1, %v4260_v46  ;;  %v1749_v13 = vshll.u32 %v1704_v8, 16  ;;  %v1734_v48 = vor.u32 %v1733_v47, %v1729_v56 }
 0x1ae   : > { %908 = vrot.lane.b32.xlu0 %v4258_v5, %s2466_s29  ;;  %v670_v25 = vpop.permute.xlu1 %669  ;;  %v1727_v58 = vrot.slane %v1725_v57, 1  ;;  %v1743_v52 = vshll.u32 %v1702_v18, 16 }
 0x1af   : > { %v1055_v16 = vsel %vm1039_vm7, %v3726_v11, %v670_v25  ;;  %v668_v27 = vpop.permute.xlu0 %667  ;;  %v1721_v11 = vrot.slane %v1719_v39, 1  ;;  %v1751_v41 = vrot.slane %v1749_v13, 1 }
 0x1b0   : > { %v1053_v55 = vsel %vm1039_vm7, %v3736_v54, %v668_v27  ;;  %1755 = vrot.lane.b32.xlu1 %v1716_v61, %s2467_s11  ;;  %v1728_v50 = vor.u32 %v1727_v58, %v1723_v26  ;;  %v1745_v35 = vrot.slane %v1743_v52, 1 }
 0x1b1   : > { %v1722_v49 = vor.u32 %v1721_v11, %v1717_v9 }
 0x1b2   : > { %1753 = vrot.lane.b32.xlu0 %v1710_v31, %s2467_s11  ;;  %v698_v12 = vpop.permute.xlu1 %697 }
 0x1b3   : > { %v1060_v0 = vsel %vm1056_vm8, %v3772_v14, %v698_v12  ;;  %v696_v6 = vpop.permute.xlu0 %695  ;;  %v1747_v14 = vshrl.u32 %v1704_v8, 16 }
 0x1b4   : > { %v1058_v54 = vsel %vm1056_vm8, %v3782_v53, %v696_v6  ;;  %1763 = vrot.lane.b32.xlu1 %v1740_v36, %s2467_s11  ;;  %v1741_v53 = vshrl.u32 %v1702_v18, 16 }
 0x1b5   : > { %v1752_v21 = vor.u32 %v1751_v41, %v1747_v14 }
 0x1b6   : > { %1761 = vrot.lane.b32.xlu0 %v1734_v48, %s2467_s11  ;;  %v706_v45 = vpop.permute.xlu1 %705  ;;  %v1746_v38 = vor.u32 %v1745_v35, %v1741_v53 }
 0x1b7   : > { %v1068_v4 = vsel %vm1056_vm8, %v3811_v30, %v706_v45  ;;  %v704_v23 = vpop.permute.xlu0 %703 }
 0x1b8   : > { %v1066_v3 = vsel %vm1056_vm8, %v3819_v63, %v704_v23  ;;  %1759 = vrot.lane.b32.xlu1 %v1728_v50, %s2467_s11 }
 0x1ba   : > { %1757 = vrot.lane.b32.xlu0 %v1722_v49, %s2467_s11  ;;  %v702_v15 = vpop.permute.xlu1 %701 }
 0x1bb   : > { %v1064_v40 = vsel %vm1056_vm8, %v1047_v10, %v702_v15  ;;  %v700_v2 = vpop.permute.xlu0 %699 }
 0x1bc   : > { %v1062_v43 = vsel %vm1056_vm8, %v1045_v33, %v700_v2  ;;  %1767 = vrot.lane.b32.xlu1 %v1752_v21, %s2467_s11 }
 0x1be   : > { %1765 = vrot.lane.b32.xlu0 %v1746_v38, %s2467_s11  ;;  %v710_v30 = vpop.permute.xlu1 %709 }
 0x1bf   : > { %v1072_v63 = vsel %vm1056_vm8, %v1055_v16, %v710_v30  ;;  %v708_v22 = vpop.permute.xlu0 %707 }
 0x1c0   : > { %v1070_v37 = vsel %vm1056_vm8, %v1053_v55, %v708_v22 }
 0x1c2   : > { %v794_v51 = vpop.permute.xlu1 %793 }
 0x1c3   : > { %v1077_v7 = vsel %vm1073_vm9, %v1060_v0, %v794_v51  ;;  %v792_v42 = vpop.permute.xlu0 %791 }
 0x1c4   : > { %v1075_v20 = vsel %vm1073_vm9, %v1058_v54, %v792_v42 }
 0x1c6   : > { %v802_v10 = vpop.permute.xlu1 %801 }
 0x1c7   : > { %v1085_v59 = vsel %vm1073_vm9, %v1068_v4, %v802_v10  ;;  %v800_v28 = vpop.permute.xlu0 %799 }
 0x1c8   : > { %v1083_v34 = vsel %vm1073_vm9, %v1066_v3, %v800_v28 }
 0x1ca   : > { %v798_v44 = vpop.permute.xlu1 %797 }
 0x1cb   : > { %v1081_v29 = vsel %vm1073_vm9, %v1064_v40, %v798_v44  ;;  %v796_v33 = vpop.permute.xlu0 %795 }
 0x1cc   : > { %v1079_v62 = vsel %vm1073_vm9, %v1062_v43, %v796_v33 }
 0x1ce   : > { %v806_v1 = vpop.permute.xlu1 %805 }
 0x1cf   : > { %v1089_v19 = vsel %vm1073_vm9, %v1072_v63, %v806_v1  ;;  %v804_v24 = vpop.permute.xlu0 %803 }
 0x1d0   : > { %v1087_v5 = vsel %vm1073_vm9, %v1070_v37, %v804_v24 }
 0x1d2   : > { %v818_v31 = vpop.permute.xlu1 %817 }
 0x1d3   : > { %v1094_v61 = vsel %vm1090_vm11, %v1077_v7, %v818_v31  ;;  %v816_v32 = vpop.permute.xlu0 %815 }
 0x1d4   : > { %v1092_v57 = vsel %vm1090_vm11, %v1075_v20, %v816_v32 }
 0x1d6   : > { %v826_v25 = vpop.permute.xlu1 %825 }
 0x1d7   : > { %v1102_v47 = vsel %vm1090_vm11, %v1085_v59, %v826_v25  ;;  %v824_v39 = vpop.permute.xlu0 %823 }
 0x1d8   : > { %v1100_v60 = vsel %vm1090_vm11, %v1083_v34, %v824_v39 }
 0x1da   : > { %v822_v8 = vpop.permute.xlu1 %821 }
 0x1db   : > { %v3902_v16 = vsel %vm1090_vm11, %v1081_v29, %v822_v8  ;;  %v820_v27 = vpop.permute.xlu0 %819 }
 0x1dc   : > { %v3905_v17 = vsel %vm1090_vm11, %v1079_v62, %v820_v27 }
 0x1de   : > { %v830_v46 = vpop.permute.xlu1 %829 }
 0x1df   : > { %v3908_v18 = vsel %vm1090_vm11, %v1089_v19, %v830_v46  ;;  %v828_v55 = vpop.permute.xlu0 %827 }
 0x1e0   : > { %v3911_v56 = vsel %vm1090_vm11, %v1087_v5, %v828_v55 }
 0x1e2   : > { %v837_v36 = vpop.permute.xlu1 %836 }
 0x1e3   : > { %v835_v58 = vpop.permute.xlu0 %834  ;;  %v1111_v37 = vsel %vm1107_vm12, %v1094_v61, %v837_v36 }
 0x1e4   : > { %v1109_v7 = vsel %vm1107_vm12, %v1092_v57, %v835_v58 }
 0x1e6   : > { %v845_v13 = vpop.permute.xlu1 %844 }
 0x1e7   : > { %v843_v12 = vpop.permute.xlu0 %842  ;;  %v1119_v44 = vsel %vm1107_vm12, %v1102_v47, %v845_v13 }
 0x1e8   : > { %v1117_v1 = vsel %vm1107_vm12, %v1100_v60, %v843_v12 }
 0x1ea   : > { %v841_v48 = vpop.permute.xlu1 %840 }
 0x1eb   : > { %v839_v11 = vpop.permute.xlu0 %838  ;;  %v1115_v47 = vsel %vm1107_vm12, %v3902_v16, %v841_v48 }
 0x1ec   : > { %v1113_v27 = vsel %vm1107_vm12, %v3905_v17, %v839_v11 }
 0x1ee   : > { %v3913_v52 = vpop.permute.xlu1 %848 }
 0x1ef   : > { %v3915_v0 = vpop.permute.xlu0 %846 }
 0x1f2   : > { %v863_v6 = vpop.permute.xlu1 %862 }
 0x1f3   : > { %v861_v26 = vpop.permute.xlu0 %860  ;;  %v1128_v42 = vsel %vm1124_vm13, %v1111_v37, %v863_v6  ;;  %v1123_v6 = vsel %vm1107_vm12, %v3908_v18, %v3913_v52 }
 0x1f4   : > { %v1126_v20 = vsel %vm1124_vm13, %v1109_v7, %v861_v26 }
 0x1f6   : > { %v871_v54 = vpop.permute.xlu1 %870 }
 0x1f7   : > { %v869_v9 = vpop.permute.xlu0 %868  ;;  %v1136_v19 = vsel %vm1124_vm13, %v1119_v44, %v871_v54  ;;  %v1121_v54 = vsel %vm1107_vm12, %v3911_v56, %v3915_v0 }
 0x1f8   : > { %v1134_v5 = vsel %vm1124_vm13, %v1117_v1, %v869_v9 }
 0x1fa   : > { %v867_v50 = vpop.permute.xlu1 %866 }
 0x1fb   : > { %v865_v41 = vpop.permute.xlu0 %864  ;;  %v1132_v46 = vsel %vm1124_vm13, %v1115_v47, %v867_v50 }
 0x1fc   : > { %v1130_v36 = vsel %vm1124_vm13, %v1113_v27, %v865_v41 }
 0x1fe   : > { %v3917_v45 = vpop.permute.xlu1 %874 }
 0x1ff   : > { %v3919_v49 = vpop.permute.xlu0 %872  ;;  %v1140_v9 = vsel %vm1124_vm13, %v1123_v6, %v3917_v45 }
 0x200   : > { %v1138_v18 = vsel %vm1124_vm13, %v1121_v54, %v3919_v49  ;;  %v2195_v49 = vld [vmem:[%s4020_s4] ss:$0 sm:$0xff] }
 0x202   : > { %v880_v35 = vpop.permute.xlu1 %879 }
 0x203   : > { %v878_v4 = vpop.permute.xlu0 %877  ;;  %v1145_v10 = vsel %vm1141_vm14, %v1128_v42, %v880_v35 }
 0x204   : > { %v1143_v59 = vsel %vm1141_vm14, %v1126_v20, %v878_v4 }
 0x206   : > { %v888_v23 = vpop.permute.xlu1 %887 }
 0x207   : > { %v886_v14 = vpop.permute.xlu0 %885  ;;  %v1153_v31 = vsel %vm1141_vm14, %v1136_v19, %v888_v23 }
 0x208   : > { %v1151_v32 = vsel %vm1141_vm14, %v1134_v5, %v886_v14 }
 0x20a   : > { %v884_v3 = vpop.permute.xlu1 %883 }
 0x20b   : > { %v882_v53 = vpop.permute.xlu0 %881  ;;  %v1149_v58 = vsel %vm1141_vm14, %v1132_v46, %v884_v3 }
 0x20c   : > { %v1147_v16 = vsel %vm1141_vm14, %v1130_v36, %v882_v53 }
 0x20e   : > { %v892_v21 = vpop.permute.xlu1 %891 }
 0x20f   : > { %v1157_v52 = vsel %vm1141_vm14, %v1140_v9, %v892_v21 }
 0x210   : > { %v890_v15 = vpop.permute.xlu0 %889 }
 0x211   : > { %v1155_v35 = vsel %vm1141_vm14, %v1138_v18, %v890_v15 }
 0x212   : > { %v899_v38 = vpop.permute.xlu1 %898 }
 0x213   : > { %v1162_v28 = vsel %vm1158_vm15, %v1145_v10, %v899_v38 }
 0x214   : > { %v897_v40 = vpop.permute.xlu0 %896 }
 0x215   : > { %v1160_v29 = vsel %vm1158_vm15, %v1143_v59, %v897_v40 }
 0x216   : > { %v907_v2 = vpop.permute.xlu1 %906 }
 0x217   : > { %v1170_v57 = vsel %vm1158_vm15, %v1153_v31, %v907_v2 }
 0x218   : > { %v905_v43 = vpop.permute.xlu0 %904 }
 0x219   : > { %v1168_v39 = vsel %vm1158_vm15, %v1151_v32, %v905_v43 }
 0x21a   : > { %v903_v30 = vpop.permute.xlu1 %902 }
 0x21b   : > { %v1166_v12 = vsel %vm1158_vm15, %v1149_v58, %v903_v30 }
 0x21c   : > { %v901_v63 = vpop.permute.xlu0 %900 }
 0x21d   : > { %v1164_v17 = vsel %vm1158_vm15, %v1147_v16, %v901_v63 }
 0x21e   : > { %v911_v22 = vpop.permute.xlu1 %910 }
 0x21f   : > { %v1174_v4 = vsel %vm1158_vm15, %v1157_v52, %v911_v22 }
 0x220   : > { %v909_v51 = vpop.permute.xlu0 %908 }
 0x221   : > { %v1172_v0 = vsel %vm1158_vm15, %v1155_v35, %v909_v51 }
 0x222   : > { %v1756_v34 = vpop.permute.xlu1 %1755 }
 0x223   : > { %v1773_v33 = vsel %vm1769_vm0, %v1162_v28, %v1756_v34 }
 0x224   : > { %v1754_v62 = vpop.permute.xlu0 %1753 }
 0x225   : > { %v1771_v24 = vsel %vm1769_vm0, %v1160_v29, %v1754_v62 }
 0x226   : > { %v2196_v61 = vcombine.low %v1771_v24, %v1773_v33  ;;  %v1764_v25 = vpop.permute.xlu1 %1763 }
 0x227   : > { %v1781_v60 = vsel %vm1769_vm0, %v1170_v57, %v1764_v25 }
 0x228   : > { %2254 = vmatprep.mubr.msk.bf16.mxu0 %vm1868_vm1, %v2196_v61  ;;  %v1762_v8 = vpop.permute.xlu0 %1761 }
 0x229   : > { %v1779_v55 = vsel %vm1769_vm0, %v1168_v39, %v1762_v8 }
 0x22a   : > { %v2198_v13 = vcombine.low %v1779_v55, %v1781_v60  ;;  %v1760_v48 = vpop.permute.xlu1 %1759 }
 0x22b   : > { %v1777_v11 = vsel %vm1769_vm0, %v1166_v12, %v1760_v48 }
 0x22c   : > { %2258 = vmatprep.mubr.msk.bf16.mxu1 %vm1868_vm1, %v2198_v13  ;;  %v1758_v26 = vpop.permute.xlu0 %1757 }
 0x22d   : > { %v1775_v50 = vsel %vm1769_vm0, %v1164_v17, %v1758_v26 }
 0x22e   : > { %v2197_v41 = vcombine.low %v1775_v50, %v1777_v11  ;;  %v1768_v56 = vpop.permute.xlu1 %1767 }
 0x22f   : > { %v1785_v45 = vsel %vm1769_vm0, %v1174_v4, %v1768_v56 }
 0x230   : > { %2255 = vmatmul.mubr.msk.bf16.vlgmr.msra.gmra.mrb[0].mxu0 %vm1868_vm1, %v2197_v41  ;;  %v1766_v23 = vpop.permute.xlu0 %1765 }
 0x231   : > { %v1783_v14 = vsel %vm1769_vm0, %v1172_v0, %v1766_v23 }
 0x232   : > { %v2199_v3 = vcombine.low %v1783_v14, %v1785_v45 }
 0x234   : > { %2259 = vmatmul.mubr.msk.bf16.vlgmr.msra.gmra.mrb[0].mxu1 %vm1868_vm1, %v2199_v3 }
 0x303   : > { %v2256_v53 = vpop.f32.mrb[0].mxu0 }
 0x304   : > { %v1928_v21 = vadd.f32 %v2256_v53, %v2195_v49  ;;  %v1919_v15 = vpop.f32.mrb[1].mxu0 }
 0x305   : > { %v1920_v38 = vadd.f32 %v2195_v49, %v1919_v15  ;;  %v2257_v40 = vpop.f32.mrb[2].mxu0 }
 0x306   : > { %vm1952_vm2 = vcmp.ge.f32.partialorder %v1928_v21, 0.0  ;;  %v1960_v2 = vmul.f32 0.2, %v1928_v21  ;;  %v1931_v43 = vadd.f32 %v2257_v40, %v2195_v49  ;;  %v1922_v30 = vpop.f32.mrb[3].mxu0 }
 0x307   : > { %vm1950_vm4 = vcmp.ge.f32.partialorder %v1920_v38, 0.0  ;;  %v1958_v63 = vmul.f32 0.2, %v1920_v38  ;;  %v1923_v22 = vadd.f32 %v2195_v49, %v1922_v30  ;;  %v2260_v37 = vpop.f32.mrb[0].mxu1 }
 0x308   : > { %v1968_v51 = vsel %vm1952_vm2, %v1928_v21, %v1960_v2  ;;  %vm1953_vm5 = vcmp.ge.f32.partialorder %v1931_v43, 0.0  ;;  %v1961_v7 = vmul.f32 0.2, %v1931_v43  ;;  %v1944_v42 = vadd.f32 %v2260_v37, %v2195_v49  ;;  %v1935_v20 = vpop.f32.mrb[1].mxu1 }
 0x309   : > { %v2223_v10 = vpack.c.bf16 %v1968_v51, %v1968_v51  ;;  %v1966_v59 = vsel %vm1950_vm4, %v1920_v38, %v1958_v63  ;;  %vm1951_vm6 = vcmp.ge.f32.partialorder %v1923_v22, 0.0  ;;  %v1959_v28 = vmul.f32 0.2, %v1923_v22  ;;  %v2261_v34 = vpop.f32.mrb[2].mxu1 }
 0x30a   : > { %v2221_v44 = vpack.c.bf16 %v1966_v59, %v1966_v59  ;;  %v1969_v29 = vsel %vm1953_vm5, %v1931_v43, %v1961_v7  ;;  %vm1956_vm7 = vcmp.ge.f32.partialorder %v1944_v42, 0.0  ;;  %v1964_v33 = vmul.f32 0.2, %v1944_v42  ;;  %v1938_v62 = vpop.f32.mrb[3].mxu1 }
 0x30b   : > { %2009 = vst.msk [vmem:[%s3983_s25 + $0x8] sm:$0xf] %vm2006_vm3, %v2223_v10  ;;  %v2224_v1 = vpack.c.bf16 %v1969_v29, %v1969_v29  ;;  %v1967_v19 = vsel %vm1951_vm6, %v1923_v22, %v1959_v28  ;;  %v1936_v24 = vadd.f32 %v2195_v49, %v1935_v20  ;;  %v1947_v5 = vadd.f32 %v2261_v34, %v2195_v49 }
 0x30c   : > { %2007 = vst.msk [vmem:[%s3983_s25] sm:$0xf] %vm2006_vm3, %v2221_v44  ;;  %v2222_v31 = vpack.c.bf16 %v1967_v19, %v1967_v19  ;;  %v1972_v61 = vsel %vm1956_vm7, %v1944_v42, %v1964_v33  ;;  %v1939_v32 = vadd.f32 %v2195_v49, %v1938_v62 }
 0x30d   : > { %2010 = vst.msk [vmem:[%s3983_s25 + $0xc] sm:$0xf] %vm2006_vm3, %v2224_v1  ;;  %v2227_v57 = vpack.c.bf16 %v1972_v61, %v1972_v61  ;;  %vm1954_vm8 = vcmp.ge.f32.partialorder %v1936_v24, 0.0  ;;  %v1962_v25 = vmul.f32 0.2, %v1936_v24  ;;  %vm1957_vm9 = vcmp.ge.f32.partialorder %v1947_v5, 0.0 }
 0x30e   : > { %2008 = vst.msk [vmem:[%s3983_s25 + $0x4] sm:$0xf] %vm2006_vm3, %v2222_v31  ;;  %v1965_v47 = vmul.f32 0.2, %v1947_v5  ;;  %vm1955_vm10 = vcmp.ge.f32.partialorder %v1939_v32, 0.0 }
 0x30f   : > { %v1963_v39 = vmul.f32 0.2, %v1939_v32  ;;  %2013 = vst.msk [vmem:[%s3983_s25 + $0x18] sm:$0xf] %vm2006_vm3, %v2227_v57  ;;  %v1970_v60 = vsel %vm1954_vm8, %v1936_v24, %v1962_v25 }
 0x310   : > { %v2225_v8 = vpack.c.bf16 %v1970_v60, %v1970_v60  ;;  %v1973_v27 = vsel %vm1957_vm9, %v1947_v5, %v1965_v47 }
 0x311   : > { %v1971_v46 = vsel %vm1955_vm10, %v1939_v32, %v1963_v39  ;;  %v2228_v55 = vpack.c.bf16 %v1973_v27, %v1973_v27 }
 0x312   : > { %v2226_v36 = vpack.c.bf16 %v1971_v46, %v1971_v46  ;;  %2011 = vst.msk [vmem:[%s3983_s25 + $0x10] sm:$0xf] %vm2006_vm3, %v2225_v8 }
 0x313   : > { %2014 = vst.msk [vmem:[%s3983_s25 + $0x1c] sm:$0xf] %vm2006_vm3, %v2228_v55 }
 0x314   : > { %2012 = vst.msk [vmem:[%s3983_s25 + $0x14] sm:$0xf] %vm2006_vm3, %v2226_v36 }
 0x315 PF: > { %s15_s22 = sadd.s32 1, %s2450_s22   ;;  %s4261_s18 = smov %s2442_s20 }
 0x316   : > { %p12_p10 = scmp.ge.s32.totalorder %s15_s22, 18   ;;  %s4262_s19 = smov %s2446_s21 }
 0x317   : > { %s4263_s20 = smov %s4266_s23  ;;  %s4264_s21 = smov %s4270_s24 }
 0x318   :  { %14 = sbr.rel (!%p12_p10) target bundleno = 3 (0x3), region = 76 }

// kernel: a_call__.3
= control target key start
LH: loop header
LB: loop body
LE: loop exit
PB: predicated region body
PF: predicated region fallthrough
CT: control target
= control target key end

     0   :  { %s2750_s24 = smov 0   ;;  %s2752_s25 = smov 0   ;;  %s4312_s0 = inlined_call_operand.vmem [shape: bf16[20,1,10,10,8], index: 0, kind: input, shape index: {}, may-alias: {0,1,2}]   ;;  %s4313_s1 = inlined_call_operand.vmem [shape: bf16[20,1,10,10,8], index: 1, kind: input, shape index: {}, may-alias: {0,1,2}]   ;;  %s4314_s2 = inlined_call_operand.vmem [shape: bf16[20,1,10,10,8], index: 2, kind: input, shape index: {}, may-alias: {0,1,2}]   ;;  %s4315_s3 = inlined_call_operand.vmem [shape: bf16[216,128], index: 3, kind: input, shape index: {}]   ;;  %s4316_s4 = inlined_call_operand.vmem [shape: f32[1,128], index: 4, kind: input, shape index: {}]   ;;  %s4317_s5 = inlined_call_operand.vmem [shape: bf16[2,8,64,4], index: 5, kind: input, shape index: {}]   ;;  %s4318_s6 = inlined_call_operand.vmem [shape: bf16[4,128], index: 6, kind: input, shape index: {}]   ;;  %s4319_s7 = inlined_call_operand.vmem [shape: f32[2,8,64,128], index: 7, kind: output, shape index: {}]  }
   0x1   :  { %s2754_s26 = smov 0   ;;  %s2756_s27 = smov 0  }
   0x2   :  { %s2758_s28 = smov 0  }
   0x3 LB: > { %s26_s29 = sadd.s32 1, %s2684_s26  ;;  %s29_s30 = sadd.s32 1, %s2688_s27  ;;  %s2692_s28 = sphi %s2758_s28, %s17_s28   ;;  %s2688_s27 = sphi %s2756_s27, %s4482_s27   ;;  %s2684_s26 = sphi %s2754_s26, %s4481_s26   ;;  %s2680_s25 = sphi %s2752_s25, %s4480_s25   ;;  %s2676_s24 = sphi %s2750_s24, %s4479_s24  }
   0x4   : > { %p27_p0 = scmp.ge.s32.totalorder %s26_s29, 8  ;;  %p2359_p1 = scmp.ge.s32.totalorder %s2692_s28, 1 }
   0x5   : > { %p319_p2 = scmp.lt.s32.totalorder %s2692_s28, 17 }
   0x6   : > { %s4484_s29 = smov (%p27_p0, %s26_s29), 0  ;;  %s4486_s30 = smov (!%p27_p0, %s29_s30), %s2688_s27 }
   0x7   : > { %p320_p3 = pnand %p2359_p1, %p319_p2  ;;  %p31_p4 = scmp.ge.s32.totalorder %s4486_s30, 2 }
   0x9   : > { %s4488_s30 = smov (%p31_p4, %s4486_s30), 0  ;;  %323 = sbr.rel (%p320_p3) target bundleno = 770 (0x302), region = 48 }
  0x10   : > { %s382_s8 = smul.u32 10, %s2680_s25  ;;  %s2694_s15 = smov 16   ;;  %vm2115_vm0 = vcmask 1043456   ;;  %vm1934_vm1 = vcmask 1041408   ;;  %vm1921_vm2 = vcmask 31744   ;;  %vm1000_vm3 = vcmask 64512  }
  0x11   : > { %s2695_s16 = smov 8   ;;  %s4323_s17 = smov 24   ;;  %vm1025_vm4 = vcmask 130048   ;;  %vm1042_vm5 = vcmask 195584   ;;  %vm1059_vm6 = vcmask 261120   ;;  %vm1076_vm7 = vcmask 326656  }
  0x12   : > { %s2786_s9 = sadd.s32 %s2676_s24, %s382_s8  ;;  %s2697_s19 = smov 32   ;;  %vm1093_vm8 = vcmask 392192   ;;  %vm1110_vm9 = vcmask 457728   ;;  %vm1127_vm10 = vcmask 523264   ;;  %vm1144_vm11 = vcmask 588800  }
  0x13   : > { %p384_p5 = scmp.lt.s32.totalorder %s2786_s9, 19  ;;  %s393_s18 = sadd.s32 1, %s2786_s9  ;;  %vm1161_vm12 = vcmask 654336   ;;  %vm1178_vm13 = vcmask 719872   ;;  %vm1195_vm14 = vcmask 785408   ;;  %vm1212_vm15 = vcmask 850944  }
  0x14   : > { %p394_p6 = scmp.lt.s32.totalorder %s393_s18, 19  ;;  %s404_s20 = sadd.s32 2, %s2786_s9 }
  0x15   : > { %s385_s10 = scalar_select %p384_p5, %s2786_s9, 19 }
  0x16   : > { %s4490_s18 = smov (!%p394_p6, %s393_s18), 19  ;;  %p405_p7 = scmp.lt.s32.totalorder %s404_s20, 19 }
  0x17   : > { %s2509_s11 = smul.u32 80, %s385_s10  ;;  %s4341_s10 = smov 40  }
  0x18   : > { %s2510_s21 = smul.u32 80, %s4490_s18  ;;  %s4492_s20 = smov (!%p405_p7, %s404_s20), 19 }
  0x19   : > { %s2793_s14 = scalar_lea.vmem %s4312_s0, %s2509_s11  ;;  %s2511_s9 = smul.u32 80, %s4492_s20 }
  0x1a   : > { %v2796_v0 = vld [vmem:[%s2793_s14 + $0x8] sm:$0xf]  ;;  %v435_v1 = vld [vmem:[%s2793_s14 + $0xc] sm:$0x1]  ;;  %v432_v2 = vld [vmem:[%s2793_s14] sm:$0xf]  ;;  %s2957_s8 = scalar_lea.vmem %s4313_s1, %s2510_s21 }
  0x1b   : > { %v2801_v3 = vcombine.low %v2796_v0, %v435_v1  ;;  %v433_v4 = vld [vmem:[%s2793_s14 + $0x4] sm:$0x1]  ;;  %v2805_v5 = vld [vmem:[%s2793_s14 + $0x10] sm:$0xf]  ;;  %v437_v6 = vld [vmem:[%s2793_s14 + $0x14] sm:$0x1]  ;;  %s2971_s13 = scalar_lea.vmem %s4314_s2, %s2511_s9 }
  0x1c   : > { %v2369_v7 = vcombine.low %v432_v2, %v433_v4  ;;  %v2371_v8 = vcombine.low %v2805_v5, %v437_v6  ;;  %v2810_v9 = vld [vmem:[%s2793_s14 + $0x18] sm:$0xf]  ;;  %v439_v10 = vld [vmem:[%s2793_s14 + $0x1c] sm:$0x1]  ;;  %v2817_v14 = vld [vmem:[%s2793_s14 + $0x28] sm:$0xf]  ;;  %v2888_v1 = vcombine.low %v2805_v5, %v2805_v5  ;;  %v2377_v2 = vcombine.low %v2796_v0, %v2796_v0 }
  0x1d   : > { %v605_v11 = vrot.slane %v2801_v3, 1  ;;  %v2372_v12 = vcombine.low %v2810_v9, %v439_v10  ;;  %v542_v13 = vshll.u32 %v2801_v3, 16  ;;  %v443_v15 = vld [vmem:[%s2793_s14 + $0x2c] sm:$0x1]  ;;  %v540_v19 = vshrl.u32 %v2801_v3, 16  ;;  %s4343_s18 = smov 48  }
  0x1e   : > { %v604_v16 = vrot.slane %v2369_v7, 1  ;;  %v547_v17 = vshrl.u32 %v2371_v8, 16  ;;  %v549_v18 = vshll.u32 %v2371_v8, 16  ;;  %v2822_v20 = vld [vmem:[%s2793_s14 + $0x20] sm:$0xf]  ;;  %v533_v21 = vshrl.u32 %v2369_v7, 16 }
  0x1f   : > { %614 = vrot.lane.b32.xlu1 %v605_v11, %s2694_s15  ;;  %v535_v22 = vshll.u32 %v2369_v7, 16  ;;  %v554_v23 = vshrl.u32 %v2372_v12, 16  ;;  %v556_v24 = vshll.u32 %v2372_v12, 16  ;;  %v441_v25 = vld [vmem:[%s2793_s14 + $0x24] sm:$0x1]  ;;  %v544_v27 = vrot.slane %v542_v13, 1 }
  0x20   : > { %612 = vrot.lane.b32.xlu0 %v604_v16, %s2694_s15  ;;  %v551_v26 = vrot.slane %v549_v18, 1  ;;  %v2374_v28 = vcombine.low %v2817_v14, %v443_v15  ;;  %v2373_v29 = vcombine.low %v2822_v20, %v441_v25  ;;  %v2832_v30 = vld [vmem:[%s2793_s14 + $0x38] sm:$0xf]  ;;  %v447_v31 = vld [vmem:[%s2793_s14 + $0x3c] sm:$0x1]  ;;  %v2862_v58 = vrot.slane %v2372_v12, 1 }
  0x21   : > { %v537_v32 = vrot.slane %v535_v22, 1  ;;  %v558_v33 = vrot.slane %v556_v24, 1  ;;  %v2376_v34 = vcombine.low %v2832_v30, %v447_v31  ;;  %v444_v35 = vld [vmem:[%s2793_s14 + $0x30] sm:$0xf]  ;;  %v445_v36 = vld [vmem:[%s2793_s14 + $0x34] sm:$0x1]  ;;  %v545_v46 = vor.u32 %v544_v27, %v540_v19 }
  0x22   : > { %v2838_v37 = vor.u32 %v551_v26, %v547_v17  ;;  %v570_v38 = vshll.u32 %v2374_v28, 16  ;;  %v568_v40 = vshrl.u32 %v2374_v28, 16  ;;  %v563_v41 = vshll.u32 %v2373_v29, 16  ;;  %4362 = vst [vmem:[#allocation4_spill] sm:$0xff] %v2862_v58  ;;  %v448_v7 = vld [vmem:[%s2793_s14 + $0x40] sm:$0xf] }
  0x23   : > { %v538_v39 = vor.u32 %v537_v32, %v533_v21  ;;  %v2842_v42 = vor.u32 %v558_v33, %v554_v23  ;;  %v584_v44 = vshll.u32 %v2376_v34, 16  ;;  %v2375_v45 = vcombine.low %v444_v35, %v445_v36  ;;  %v2965_v17 = vld [vmem:[%s2957_s8 + $0x20] sm:$0xf]  ;;  %v461_v18 = vld [vmem:[%s2957_s8 + $0x24] sm:$0x1]  ;;  %s2700_s20 = smov 56  }
  0x24   : > { %4360 = vst [vmem:[#allocation2_spill] sm:$0xff] %v2838_v37  ;;  %592 = vrot.lane.b32.xlu1 %v2838_v37, %s2695_s16  ;;  %v572_v43 = vrot.slane %v570_v38, 1  ;;  %v561_v47 = vshrl.u32 %v2373_v29, 16  ;;  %v565_v48 = vrot.slane %v563_v41, 1  ;;  %v582_v51 = vshrl.u32 %v2376_v34, 16  ;;  %s2701_s21 = smov 64  }
  0x25   : > { %4361 = vst [vmem:[#allocation3_spill] sm:$0xff] %v2842_v42  ;;  %588 = vrot.lane.b32.xlu0 %v538_v39, %s2695_s16  ;;  %v577_v49 = vshll.u32 %v2375_v45, 16  ;;  %v586_v52 = vrot.slane %v584_v44, 1  ;;  %v575_v54 = vshrl.u32 %v2375_v45, 16  ;;  %v2866_v59 = vrot.slane %v2371_v8, 1  ;;  %s2702_s22 = smov 72  }
  0x26   : > { %v2847_v50 = vor.u32 %v572_v43, %v568_v40  ;;  %v2850_v53 = vor.u32 %v565_v48, %v561_v47  ;;  %v2870_v60 = vrot.slane %v2374_v28, 1  ;;  %v2874_v61 = vrot.slane %v2373_v29, 1  ;;  %v476_v3 = vld [vmem:[%s2971_s13 + $0x10] sm:$0xf]  ;;  %v478_v25 = vld [vmem:[%s2971_s13 + $0x18] sm:$0xf] }
  0x27   : > { %v579_v55 = vrot.slane %v577_v49, 1  ;;  %v2854_v56 = vor.u32 %v586_v52, %v582_v51  ;;  %4363 = vst [vmem:[#allocation5_spill] sm:$0xff] %v2866_v59  ;;  %v2878_v62 = vrot.slane %v2376_v34, 1  ;;  %v2882_v63 = vrot.slane %v2375_v45, 1  ;;  %v477_v29 = vld [vmem:[%s2971_s13 + $0x14] sm:$0x1] }
  0x28   : > { %594 = vrot.lane.b32.xlu1 %v2842_v42, %s2695_s16  ;;  %v2898_v4 = vcombine.low %v2822_v20, %v2822_v20  ;;  %v2903_v5 = vcombine.low %v2810_v9, %v2810_v9  ;;  %v2907_v6 = vcombine.low %v444_v35, %v444_v35  ;;  %v2913_v0 = vcombine.low %v2817_v14, %v2817_v14  ;;  %v449_v9 = vld [vmem:[%s2793_s14 + $0x44] sm:$0x1]  ;;  %v463_v20 = vld [vmem:[%s2957_s8 + $0x2c] sm:$0x1]  ;;  %v479_v40 = vld [vmem:[%s2971_s13 + $0x1c] sm:$0x1] }
  0x29   : > { %590 = vrot.lane.b32.xlu0 %v545_v46, %s2695_s16  ;;  %v2858_v57 = vor.u32 %v579_v55, %v575_v54  ;;  %v2918_v8 = vcombine.low %v448_v7, %v448_v7  ;;  %v2925_v10 = vcombine.low %v2832_v30, %v2832_v30  ;;  %v2927_v12 = vcombine.low %v448_v7, %v449_v9  ;;  %v480_v48 = vld [vmem:[%s2971_s13 + $0x20] sm:$0xf]  ;;  %v481_v7 = vld [vmem:[%s2971_s13 + $0x24] sm:$0x1]  ;;  %s2704_s23 = smov 80   ;;  %s2705_s12 = smov 88  }
  0x2a   : > { %v2976_v19 = vcombine.low %v2965_v17, %v461_v18  ;;  %v2410_v23 = vcombine.low %v476_v3, %v476_v3  ;;  %v2411_v31 = vcombine.low %v478_v25, %v478_v25  ;;  %v3007_v35 = vcombine.low %v476_v3, %v477_v29  ;;  %v482_v18 = vld [vmem:[%s2971_s13 + $0x28] sm:$0xf]  ;;  %v3065_v29 = vld [vmem:[%s2957_s8 + $0x30] sm:$0xf]  ;;  %p413_p8 = scmp.lt.s32.totalorder %s2680_s25, 1  ;;  %p415_p9 = scmp.lt.s32.totalorder %s2676_s24, 7 }
  0x2b   : > { %4364 = vst [vmem:[#allocation6_spill] sm:$0xff] %v2927_v12  ;;  %v660_v13 = vshll.u32 %v2927_v12, 16  ;;  %v658_v14 = vshrl.u32 %v2927_v12, 16  ;;  %v4320_v21 = vrot.slane %v2927_v12, 1  ;;  %v3022_v47 = vcombine.low %v478_v25, %v479_v40  ;;  %s2709_s9 = smov 120   ;;  %s4422_s11 = smov 104  }
  0x2c   : > { %598 = vrot.lane.b32.xlu1 %v2847_v50, %s2695_s16  ;;  %v854_v22 = vshll.u32 %v2976_v19, 16  ;;  %v852_v26 = vshrl.u32 %v2976_v19, 16  ;;  %v1328_v28 = vshrl.u32 %v2410_v23, 16  ;;  %v1331_v34 = vshll.u32 %v2410_v23, 16  ;;  %s4494_s25 = smov (!%p413_p8, %s2680_s25), 1  ;;  %s4496_s24 = smov (!%p415_p9, %s2676_s24), 7 }
  0x2d   : > { %596 = vrot.lane.b32.xlu0 %v2850_v53, %s2695_s16  ;;  %v662_v15 = vrot.slane %v660_v13, 1  ;;  %v1335_v39 = vshrl.u32 %v2411_v31, 16  ;;  %v1442_v43 = vshll.u32 %v3007_v35, 16  ;;  %4366 = vst [vmem:[#allocation8_spill] sm:$0xff] %v3022_v47  ;;  %v1440_v49 = vshrl.u32 %v3007_v35, 16 }
  0x2e   : > { %v856_v27 = vrot.slane %v854_v22, 1  ;;  %v1330_v33 = vrot.slane %v1328_v28, 7  ;;  %v1449_v54 = vshll.u32 %v3022_v47, 16  ;;  %v2412_v55 = vcombine.low %v480_v48, %v480_v48  ;;  %v467_v28 = vld [vmem:[%s2957_s8 + $0x3c] sm:$0x1] }
  0x2f   : > { %v2946_v16 = vor.u32 %v662_v15, %v658_v14  ;;  %v1337_v45 = vrot.slane %v1335_v39, 7  ;;  %v1444_v51 = vrot.slane %v1442_v43, 1  ;;  %v3047_v15 = vcombine.low %v480_v48, %v481_v7 }
  0x30   : > { %602 = vrot.lane.b32.xlu1 %v2854_v56, %s2695_s16  ;;  %v3005_v32 = vor.u32 %v856_v27, %v852_v26  ;;  %v3015_v41 = vor.u32 %v1331_v34, %v1330_v33  ;;  %v1345_v14 = vshll.u32 %v2412_v55, 16  ;;  %v2413_v3 = vcombine.low %v482_v18, %v482_v18  ;;  %v466_v27 = vld [vmem:[%s2957_s8 + $0x38] sm:$0xf] }
  0x31   : > { %600 = vrot.lane.b32.xlu0 %v2858_v57, %s2695_s16  ;;  %4365 = vst [vmem:[#allocation7_spill] sm:$0xff] %v2946_v16  ;;  %v1456_v22 = vshll.u32 %v3047_v15, 16  ;;  %v1454_v25 = vshrl.u32 %v3047_v15, 16  ;;  %v3070_v34 = vcombine.low %v466_v27, %v467_v28  ;;  %v457_v28 = vld [vmem:[%s2957_s8 + $0x14] sm:$0x1] }
  0x32   : > { %v1349_v23 = vshrl.u32 %v2413_v3, 16  ;;  %v1352_v33 = vshll.u32 %v2413_v3, 16 }
  0x33   : > { %v1458_v26 = vrot.slane %v1456_v22, 1  ;;  %4368 = vst [vmem:[#allocation10_spill] sm:$0xff] %v3070_v34  ;;  %v875_v40 = vshll.u32 %v3070_v34, 16 }
  0x34   : > { %618 = vrot.lane.b32.xlu1 %v2862_v58, %s2694_s15 }
  0x35   : > { %616 = vrot.lane.b32.xlu0 %v2866_v59, %s2694_s15  ;;  %v877_v48 = vrot.slane %v875_v40, 1 }
  0x38   : > { %622 = vrot.lane.b32.xlu1 %v2870_v60, %s2694_s15 }
  0x39   : > { %620 = vrot.lane.b32.xlu0 %v2874_v61, %s2694_s15 }
  0x3c   : > { %626 = vrot.lane.b32.xlu1 %v2878_v62, %s2694_s15 }
  0x3d   : > { %624 = vrot.lane.b32.xlu0 %v2882_v63, %s2694_s15 }
  0x40   : > { %640 = vrot.lane.b32.xlu1 %v2888_v1, %s4323_s17 }
  0x41   : > { %638 = vrot.lane.b32.xlu0 %v2377_v2, %s4323_s17  ;;  %v1447_v2 = vshrl.u32 %v3022_v47, 16 }
  0x44   : > { %644 = vrot.lane.b32.xlu1 %v2898_v4, %s4323_s17 }
  0x45   : > { %642 = vrot.lane.b32.xlu0 %v2903_v5, %s4323_s17 }
  0x48   : > { %648 = vrot.lane.b32.xlu1 %v2907_v6, %s4323_s17 }
  0x49   : > { %646 = vrot.lane.b32.xlu0 %v2913_v0, %s4323_s17 }
  0x4c   : > { %652 = vrot.lane.b32.xlu1 %v2918_v8, %s4323_s17 }
  0x4d   : > { %650 = vrot.lane.b32.xlu0 %v2925_v10, %s4323_s17 }
  0x50   : > { %666 = vrot.lane.b32.xlu1 %v2838_v37, %s2697_s19 }
  0x51   : > { %664 = vrot.lane.b32.xlu0 %v545_v46, %s2697_s19  ;;  %v1338_v46 = vshll.u32 %v2411_v31, 16  ;;  %v1351_v31 = vrot.slane %v1349_v23, 7 }
  0x53   : > { %v3030_v52 = vor.u32 %v1338_v46, %v1337_v45  ;;  %v3081_v39 = vor.u32 %v1352_v33, %v1351_v31  ;;  %v3146_v31 = vld [vmem:[%s4315_s3] sm:$0xff]  }
  0x54   : > { %670 = vrot.lane.b32.xlu1 %v2850_v53, %s2697_s19 }
  0x55   : > { %668 = vrot.lane.b32.xlu0 %v2842_v42, %s2697_s19 }
  0x58   : > { %674 = vrot.lane.b32.xlu1 %v2858_v57, %s2697_s19 }
  0x59   : > { %672 = vrot.lane.b32.xlu0 %v2847_v50, %s2697_s19 }
  0x5c   : > { %678 = vrot.lane.b32.xlu1 %v2946_v16, %s2697_s19 }
  0x5d   : > { %676 = vrot.lane.b32.xlu0 %v2854_v56, %s2697_s19 }
  0x60   : > { %683 = vrot.lane.b32.xlu1 %v2866_v59, %s4341_s10  ;;  %v469_v59 = vld [vmem:[%s2957_s8 + $0x44] sm:$0x1] }
  0x61   : > { %681 = vrot.lane.b32.xlu0 %v605_v11, %s4341_s10  ;;  %v2982_v11 = vld [vmem:[%s2957_s8 + $0x28] sm:$0xf] }
  0x62   : > { %v2992_v24 = vcombine.low %v2982_v11, %v463_v20 }
  0x64   : > { %687 = vrot.lane.b32.xlu1 %v2874_v61, %s4341_s10  ;;  %v861_v30 = vshll.u32 %v2992_v24, 16  ;;  %v859_v36 = vshrl.u32 %v2992_v24, 16 }
  0x65   : > { %685 = vrot.lane.b32.xlu0 %v2862_v58, %s4341_s10 }
  0x66   : > { %v863_v38 = vrot.slane %v861_v30, 1  ;;  %v465_v30 = vld [vmem:[%s2957_s8 + $0x34] sm:$0x1] }
  0x68   : > { %691 = vrot.lane.b32.xlu1 %v2882_v63, %s4341_s10  ;;  %v3020_v44 = vor.u32 %v863_v38, %v859_v36  ;;  %v3074_v36 = vor.u32 %v1458_v26, %v1454_v25  ;;  %v3077_v38 = vcombine.low %v3065_v29, %v465_v30  ;;  %v459_v26 = vld [vmem:[%s2957_s8 + $0x1c] sm:$0x1]  ;;  %v4321_v30 = vmov 0  }
  0x69   : > { %689 = vrot.lane.b32.xlu0 %v2870_v60, %s4341_s10  ;;  %2480 = vmatprep.subr.bf16.mxu1 %v4321_v30 }
  0x6a   : > { %v868_v45 = vshll.u32 %v3077_v38, 16  ;;  %2494 = vmatpush1.bf16.msra.mxu1 %v3146_v31 }
  0x6b   : > { %2481 = vmatprep.subr.bf16.mxu1 %v4321_v30 }
  0x6c   : > { %695 = vrot.lane.b32.xlu1 %v4320_v21, %s4341_s10 }
  0x6d   : > { %693 = vrot.lane.b32.xlu0 %v2878_v62, %s4341_s10 }
  0x70   : > { %702 = vrot.lane.b32.xlu1 %v2903_v5, %s4343_s18  ;;  %v1342_v5 = vshrl.u32 %v2412_v55, 16 }
  0x71   : > { %700 = vrot.lane.b32.xlu0 %v2888_v1, %s4343_s18  ;;  %v3035_v1 = vor.u32 %v1444_v51, %v1440_v49  ;;  %v866_v49 = vshrl.u32 %v3077_v38, 16  ;;  %v870_v51 = vrot.slane %v868_v45, 1  ;;  %v456_v45 = vld [vmem:[%s2957_s8 + $0x10] sm:$0xf] }
  0x72   : > { %v1344_v13 = vrot.slane %v1342_v5, 7 }
  0x73   : > { %v3108_v5 = vor.u32 %v870_v51, %v866_v49  ;;  %v3169_v49 = vld [vmem:[%s4315_s3 + $0x8] sm:$0xff]  }
  0x74   : > { %1277 = vrot.lane.b32.xlu1 %v3005_v32, %s2695_s16  ;;  %v3054_v20 = vor.u32 %v1345_v14, %v1344_v13  ;;  %2495 = vmatpush1.bf16.msra.mxu1 %v3169_v49 }
  0x75   : > { %704 = vrot.lane.b32.xlu0 %v2898_v4, %s4343_s18  ;;  %v1451_v4 = vrot.slane %v1449_v54, 1  ;;  %2482 = vmatprep.subr.bf16.mxu1 %v4321_v30 }
  0x77   : > { %v3045_v9 = vor.u32 %v1451_v4, %v1447_v2  ;;  %v483_v4 = vld [vmem:[%s2971_s13 + $0x2c] sm:$0x1] }
  0x78   : > { %1373 = vrot.lane.b32.xlu1 %v3015_v41, %s2694_s15  ;;  %v3114_v14 = vcombine.low %v482_v18, %v483_v4 }
  0x79   : > { %1279 = vrot.lane.b32.xlu0 %v3020_v44, %s2695_s16  ;;  %4367 = vst [vmem:[#allocation9_spill] sm:$0xff] %v3045_v9 }
  0x7a   : > { %v1461_v23 = vshrl.u32 %v3114_v14, 16 }
  0x7c   : > { %1413 = vrot.lane.b32.xlu1 %v3007_v35, %s4323_s17 }
  0x7d   : > { %1375 = vrot.lane.b32.xlu0 %v3030_v52, %s2694_s15 }
  0x80   : > { %1485 = vrot.lane.b32.xlu1 %v3035_v1, %s2697_s19 }
  0x81   : > { %1415 = vrot.lane.b32.xlu0 %v3022_v47, %s4323_s17 }
  0x84   : > { %1511 = vrot.lane.b32.xlu1 %v3030_v52, %s4341_s10 }
  0x85   : > { %1487 = vrot.lane.b32.xlu0 %v3045_v9, %s2697_s19 }
  0x88   : > { %1530 = vrot.lane.b32.xlu1 %v3022_v47, %s4343_s18 }
  0x89   : > { %1513 = vrot.lane.b32.xlu0 %v3054_v20, %s4341_s10 }
  0x8c   : > { %1553 = vrot.lane.b32.xlu1 %v3045_v9, %s2700_s20 }
  0x8d   : > { %1532 = vrot.lane.b32.xlu0 %v3047_v15, %s4343_s18 }
  0x90   : > { %706 = vrot.lane.b32.xlu1 %v2913_v0, %s4343_s18  ;;  %v873_v0 = vshrl.u32 %v3070_v34, 16  ;;  %v3259_v34 = vld [vmem:[%s4315_s3 + $0x30] sm:$0xff]  }
  0x91   : > { %1555 = vrot.lane.b32.xlu0 %v3074_v36, %s2700_s20  ;;  %v3086_v43 = vpop.permute.xlu1 %614 }
  0x92   : > { %4369 = vst [vmem:[#allocation11_spill] sm:$0xff] %v3086_v43  ;;  %v3089_v46 = vpop.permute.xlu0 %612  ;;  %v3103_v2 = vor.u32 %v877_v48, %v873_v0  ;;  %v3161_v0 = vcombine.low %v456_v45, %v457_v28  ;;  %v4386_v43 = vmov 0  }
  0x93   : > { %4370 = vst [vmem:[#allocation12_spill] sm:$0xff] %v3089_v46  ;;  %v484_v46 = vld [vmem:[%s2971_s13 + $0x30] sm:$0xf] }
  0x94   : > { %1581 = vrot.lane.b32.xlu1 %v3081_v39, %s2701_s21  ;;  %4372 = vst [vmem:[#allocation14_spill] sm:$0xff] %v3103_v2  ;;  %4379 = vst [vmem:[#allocation21_spill] sm:$0xff] %v3161_v0  ;;  %v838_v21 = vshrl.u32 %v3161_v0, 16 }
  0x95   : > { %1579 = vrot.lane.b32.xlu0 %v3054_v20, %s2701_s21 }
  0x96   : > { %v3097_v54 = vpop.permute.xlu1 %592 }
  0x97   : > { %v3099_v55 = vpop.permute.xlu0 %588 }
  0x98   : > { %4371 = vst [vmem:[#allocation13_spill] sm:$0xff] %v3099_v55  ;;  %732 = vrot.lane.b32.xlu1 %v2847_v50, %s2700_s20 }
  0x99   : > { %730 = vrot.lane.b32.xlu0 %v2850_v53, %s2700_s20  ;;  %v1463_v53 = vshll.u32 %v3114_v14, 16 }
  0x9a   : > { %v3110_v7 = vpop.permute.xlu1 %594 }
  0x9b   : > { %v3112_v13 = vpop.permute.xlu0 %590  ;;  %v1465_v25 = vrot.slane %v1463_v53, 1  ;;  %v3181_v53 = vcombine.low %v456_v45, %v456_v45 }
  0x9c   : > { %4373 = vst [vmem:[#allocation15_spill] sm:$0xff] %v3112_v13  ;;  %1283 = vrot.lane.b32.xlu1 %v3103_v2, %s2695_s16  ;;  %v3208_v13 = vld [vmem:[%s4315_s3 + $0x18] sm:$0xff]   ;;  %v4332_v2 = vrot.slane %v3161_v0, 1 }
  0x9d   : > { %1281 = vrot.lane.b32.xlu0 %v3108_v5, %s2695_s16  ;;  %v3153_v40 = vor.u32 %v1465_v25, %v1461_v23  ;;  %4383 = vst [vmem:[#allocation25_spill] sm:$0xff] %v3181_v53  ;;  %v840_v23 = vshll.u32 %v3161_v0, 16 }
  0x9e   : > { %v3120_v50 = vpop.permute.xlu1 %598 }
  0x9f   : > { %4374 = vst [vmem:[#allocation16_spill] sm:$0xff] %v3120_v50  ;;  %v3122_v3 = vpop.permute.xlu0 %596  ;;  %v842_v30 = vrot.slane %v840_v23, 1  ;;  %v471_v50 = vld [vmem:[%s2957_s8 + $0x4c] sm:$0x1] }
  0xa0   : > { %4375 = vst [vmem:[#allocation17_spill] sm:$0xff] %v3122_v3  ;;  %1600 = vrot.lane.b32.xlu1 %v3114_v14, %s2702_s22  ;;  %v2632_v3 = vld [vmem:[%s4315_s3 + $0x68] ss:$0 sps:$4 sm:$0xff]  }
  0xa1   : > { %1598 = vrot.lane.b32.xlu0 %v3047_v15, %s2702_s22  ;;  %v3219_v23 = vor.u32 %v842_v30, %v838_v21 }
  0xa2   : > { %v3129_v18 = vpop.permute.xlu1 %602 }
  0xa3   : > { %4376 = vst [vmem:[#allocation18_spill] sm:$0xff] %v3129_v18  ;;  %v3131_v22 = vpop.permute.xlu0 %600  ;;  %4389 = vst [vmem:[#allocation30_spill] sm:$0xff] %v3219_v23 }
  0xa4   : > { %4377 = vst [vmem:[#allocation19_spill] sm:$0xff] %v3131_v22  ;;  %749 = vrot.lane.b32.xlu1 %v2870_v60, %s2701_s21  ;;  %v458_v60 = vld [vmem:[%s2957_s8 + $0x18] sm:$0xf] }
  0xa5   : > { %747 = vrot.lane.b32.xlu0 %v2874_v61, %s2701_s21  ;;  %v3155_v61 = vcombine.low %v458_v60, %v459_v26  ;;  %v3175_v4 = vcombine.low %v458_v60, %v458_v60  ;;  %v3190_v26 = vld [vmem:[%s4315_s3 + $0x10] sm:$0xff]  }
  0xa6   : > { %v3139_v27 = vpop.permute.xlu1 %618  ;;  %2496 = vmatpush1.bf16.msra.mxu1 %v3190_v26 }
  0xa7   : > { %v3148_v33 = vpop.permute.xlu0 %616  ;;  %4378 = vst [vmem:[#allocation20_spill] sm:$0xff] %v3155_v61  ;;  %4382 = vst [vmem:[#allocation24_spill] sm:$0xff] %v3175_v4  ;;  %v845_v60 = vshrl.u32 %v3155_v61, 16  ;;  %2483 = vmatprep.subr.bf16.mxu1 %v4386_v43 }
  0xa8   : > { %1379 = vrot.lane.b32.xlu1 %v3081_v39, %s2694_s15 }
  0xa9   : > { %1377 = vrot.lane.b32.xlu0 %v3054_v20, %s2694_s15  ;;  %v847_v20 = vshll.u32 %v3155_v61, 16 }
  0xaa   : > { %v3164_v48 = vpop.permute.xlu1 %622  ;;  %2497 = vmatpush1.bf16.msra.mxu1 %v3208_v13 }
  0xab   : > { %4380 = vst [vmem:[#allocation22_spill] sm:$0xff] %v3164_v48  ;;  %v3171_v51 = vpop.permute.xlu0 %620  ;;  %v849_v45 = vrot.slane %v847_v20, 1  ;;  %2484 = vmatprep.subr.bf16.mxu1 %v4386_v43 }
  0xac   : > { %4381 = vst [vmem:[#allocation23_spill] sm:$0xff] %v3171_v51  ;;  %1623 = vrot.lane.b32.xlu1 %v3153_v40, %s2704_s23  ;;  %v4345_v51 = vrot.slane %v2976_v19, 1 }
  0xad   : > { %1621 = vrot.lane.b32.xlu0 %v3074_v36, %s2704_s23  ;;  %v3214_v20 = vor.u32 %v849_v45, %v845_v60 }
  0xae   : > { %v3185_v25 = vpop.permute.xlu1 %626 }
  0xaf   : > { %4384 = vst [vmem:[#allocation26_spill] sm:$0xff] %v3185_v25  ;;  %v3192_v28 = vpop.permute.xlu0 %624  ;;  %v2414_v25 = vcombine.low %v484_v46, %v484_v46 }
  0xb0   : > { %4385 = vst [vmem:[#allocation27_spill] sm:$0xff] %v3192_v28  ;;  %789 = vrot.lane.b32.xlu1 %v3175_v4, %s2702_s22 }
  0xb1   : > { %787 = vrot.lane.b32.xlu0 %v3181_v53, %s2702_s22  ;;  %v1356_v60 = vshrl.u32 %v2414_v25, 16  ;;  %v1359_v53 = vshll.u32 %v2414_v25, 16  ;;  %v4394_v25 = vrot.slane %v3155_v61, 1 }
  0xb2   : > { %v3203_v55 = vpop.permute.xlu1 %640 }
  0xb3   : > { %4387 = vst [vmem:[#allocation28_spill] sm:$0xff] %v3203_v55  ;;  %v3210_v28 = vpop.permute.xlu0 %638  ;;  %v1358_v18 = vrot.slane %v1356_v60, 7 }
  0xb4   : > { %4388 = vst [vmem:[#allocation29_spill] sm:$0xff] %v3210_v28  ;;  %1419 = vrot.lane.b32.xlu1 %v3114_v14, %s4323_s17  ;;  %v3227_v28 = vld [vmem:[%s4315_s3 + $0x20] sm:$0xff]  }
  0xb5   : > { %1417 = vrot.lane.b32.xlu0 %v3047_v15, %s4323_s17  ;;  %2498 = vmatpush1.bf16.msra.mxu1 %v3227_v28  ;;  %v3242_v15 = vld [vmem:[%s4315_s3 + $0x28] sm:$0xff]   ;;  %v3266_v60 = vor.u32 %v1359_v53, %v1358_v18  ;;  %v3287_v18 = vcombine.low %v2965_v17, %v2965_v17  ;;  %s4337_s17 = smov 96  }
  0xb6   : > { %v3222_v55 = vpop.permute.xlu1 %644  ;;  %2485 = vmatprep.subr.bf16.mxu1 %v4386_v43 }
  0xb7   : > { %v3229_v22 = vpop.permute.xlu0 %642 }
  0xb8   : > { %885 = vrot.lane.b32.xlu1 %v3214_v20, %s2704_s23 }
  0xb9   : > { %883 = vrot.lane.b32.xlu0 %v3219_v23, %s2704_s23  ;;  %2499 = vmatpush1.bf16.msra.mxu1 %v3242_v15 }
  0xba   : > { %v3237_v21 = vpop.permute.xlu1 %648  ;;  %2486 = vmatprep.subr.bf16.mxu1 %v4386_v43 }
  0xbb   : > { %4390 = vst [vmem:[#allocation31_spill] sm:$0xff] %v3237_v21  ;;  %v3244_v30 = vpop.permute.xlu0 %646  ;;  %v3369_v21 = vld [vmem:[%s4315_s3 + $0x60] sm:$0xff]  }
  0xbc   : > { %4391 = vst [vmem:[#allocation32_spill] sm:$0xff] %v3244_v30  ;;  %1491 = vrot.lane.b32.xlu1 %v3153_v40, %s2697_s19 }
  0xbd   : > { %1489 = vrot.lane.b32.xlu0 %v3074_v36, %s2697_s19  ;;  %2500 = vmatpush1.bf16.msra.mxu1 %v3259_v34 }
  0xbe   : > { %v3254_v9 = vpop.permute.xlu1 %652  ;;  %2487 = vmatprep.subr.bf16.mxu1 %v4386_v43 }
  0xbf   : > { %4392 = vst [vmem:[#allocation33_spill] sm:$0xff] %v3254_v9  ;;  %v3261_v45 = vpop.permute.xlu0 %650 }
  0xc0   : > { %4393 = vst [vmem:[#allocation34_spill] sm:$0xff] %v3261_v45  ;;  %909 = vrot.lane.b32.xlu1 %v4394_v25, %s2705_s12  ;;  %v3278_v45 = vld [vmem:[%s4315_s3 + $0x38] sm:$0xff]   ;;  %v485_v25 = vld [vmem:[%s2971_s13 + $0x34] sm:$0x1] }
  0xc1   : > { %907 = vrot.lane.b32.xlu0 %v4332_v2, %s2705_s12  ;;  %2501 = vmatpush1.bf16.msra.mxu1 %v3278_v45  ;;  %v3293_v53 = vcombine.low %v484_v46, %v485_v25  ;;  %v3316_v46 = vld [vmem:[%s4315_s3 + $0x48] sm:$0xff]  }
  0xc2   : > { %v3273_v36 = vpop.permute.xlu1 %666  ;;  %2488 = vmatprep.subr.bf16.mxu1 %v4386_v43 }
  0xc3   : > { %4395 = vst [vmem:[#allocation35_spill] sm:$0xff] %v3273_v36  ;;  %v3280_v9 = vpop.permute.xlu0 %664  ;;  %v1470_v17 = vshll.u32 %v3293_v53, 16  ;;  %v1468_v0 = vshrl.u32 %v3293_v53, 16 }
  0xc4   : > { %4396 = vst [vmem:[#allocation36_spill] sm:$0xff] %v3280_v9  ;;  %1517 = vrot.lane.b32.xlu1 %v3266_v60, %s4341_s10  ;;  %v3300_v9 = vld [vmem:[%s4315_s3 + $0x40] sm:$0xff]  }
  0xc5   : > { %1515 = vrot.lane.b32.xlu0 %v3081_v39, %s4341_s10  ;;  %2502 = vmatpush1.bf16.msra.mxu1 %v3300_v9  ;;  %v1472_v12 = vrot.slane %v1470_v17, 1  ;;  %s2363_s10 = sshll.u32 %s4496_s24, 3 }
  0xc6   : > { %v3295_v2 = vpop.permute.xlu1 %670  ;;  %2489 = vmatprep.subr.bf16.mxu1 %v4386_v43 }
  0xc7   : > { %v3302_v36 = vpop.permute.xlu0 %668  ;;  %v3341_v17 = vor.u32 %v1472_v12, %v1468_v0 }
  0xc8   : > { %928 = vrot.lane.b32.xlu1 %v3287_v18, %s4337_s17 }
  0xc9   : > { %926 = vrot.lane.b32.xlu0 %v3175_v4, %s4337_s17  ;;  %2503 = vmatpush1.bf16.msra.mxu1 %v3316_v46  ;;  %v3327_v4 = vld [vmem:[%s2971_s13 + $0x38] sm:$0xf]  ;;  %s4339_s17 = smov 104  }
  0xca   : > { %v3311_v39 = vpop.permute.xlu1 %674  ;;  %2490 = vmatprep.subr.bf16.mxu1 %v4386_v43 }
  0xcb   : > { %4397 = vst [vmem:[#allocation37_spill] sm:$0xff] %v3311_v39  ;;  %v3318_v25 = vpop.permute.xlu0 %672 }
  0xcc   : > { %4398 = vst [vmem:[#allocation38_spill] sm:$0xff] %v3318_v25  ;;  %1536 = vrot.lane.b32.xlu1 %v3293_v53, %s4343_s18  ;;  %v3335_v25 = vld [vmem:[%s4315_s3 + $0x50] sm:$0xff]  }
  0xcd   : > { %1534 = vrot.lane.b32.xlu0 %v3114_v14, %s4343_s18  ;;  %v2415_v14 = vcombine.low %v3327_v4, %v3327_v4  ;;  %2504 = vmatpush1.bf16.msra.mxu1 %v3335_v25 }
  0xce   : > { %v3330_v39 = vpop.permute.xlu1 %678  ;;  %2491 = vmatprep.subr.bf16.mxu1 %v4386_v43 }
  0xcf   : > { %4399 = vst [vmem:[#allocation39_spill] sm:$0xff] %v3330_v39  ;;  %v3337_v30 = vpop.permute.xlu0 %676  ;;  %v1363_v0 = vshrl.u32 %v2415_v14, 16  ;;  %v1366_v48 = vshll.u32 %v2415_v14, 16 }
  0xd0   : > { %4400 = vst [vmem:[#allocation40_spill] sm:$0xff] %v3337_v30  ;;  %954 = vrot.lane.b32.xlu1 %v3005_v32, %s4339_s17  ;;  %v3354_v30 = vld [vmem:[%s4315_s3 + $0x58] sm:$0xff]  }
  0xd1   : > { %952 = vrot.lane.b32.xlu0 %v3214_v20, %s4339_s17  ;;  %2505 = vmatpush1.bf16.msra.mxu1 %v3354_v30  ;;  %s2364_s17 = sshll.u32 %s4494_s25, 6 }
  0xd2   : > { %v3349_v39 = vpop.permute.xlu1 %683  ;;  %2492 = vmatprep.subr.bf16.mxu1 %v4386_v43  ;;  %s3402_s25 = sadd.s32 %s2364_s17, %s2363_s10 }
  0xd3   : > { %4401 = vst [vmem:[#allocation41_spill] sm:$0xff] %v3349_v39  ;;  %v3356_v12 = vpop.permute.xlu0 %681  ;;  %s2365_s24 = sshll.u32 %s3402_s25, 2 }
  0xd4   : > { %4402 = vst [vmem:[#allocation42_spill] sm:$0xff] %v3356_v12  ;;  %1559 = vrot.lane.b32.xlu1 %v3341_v17, %s2700_s20  ;;  %s3421_s17 = scalar_lea.vmem %s4317_s5, %s2365_s24  ;;  %s4421_s24 = smov 48  }
  0xd5   : > { %1557 = vrot.lane.b32.xlu0 %v3153_v40, %s2700_s20  ;;  %v1365_v40 = vrot.slane %v1363_v0, 7  ;;  %2506 = vmatpush1.bf16.msra.mxu1 %v3369_v21  ;;  %v3391_v0 = vsel %vm2115_vm0, %v2632_v3, 0  ;;  %v4405_v3 = vrot.slane %v3155_v61, 1  ;;  %v2634_v61 = vld [vmem:[%s3421_s17] sm:$0xff]   ;;  %vm1229_vm0 = vcmask 916480  }
  0xd6   : > { %v3364_v39 = vpop.permute.xlu1 %687  ;;  %2493 = vmatprep.subr.bf16.mxu1 %v4386_v43  ;;  %2472 = vmatprep.mubr.msk.bf16.mxu0 %vm1921_vm2, %v2634_v61 }
  0xd7   : > { %v3373_v12 = vpop.permute.xlu0 %685 }
  0xd8   : > { %710 = vrot.lane.b32.xlu1 %v2925_v10, %s4343_s18 }
  0xd9   : > { %708 = vrot.lane.b32.xlu0 %v2907_v6, %s4343_s18  ;;  %s2708_s18 = smov 112   ;;  %v3396_v6 = vor.u32 %v1366_v48, %v1365_v40  ;;  %2507 = vmatpush1.bf16.msra.mxu1 %v3391_v0 }
  0xda   : > { %v3387_v10 = vpop.permute.xlu1 %691 }
  0xdb   : > { %4403 = vst [vmem:[#allocation43_spill] sm:$0xff] %v3387_v10  ;;  %v3389_v14 = vpop.permute.xlu0 %689  ;;  %v1900_v10 = vld [vmem:[%s4318_s6] sm:$0x3] }
  0xdc   : > { %4404 = vst [vmem:[#allocation44_spill] sm:$0xff] %v3389_v14  ;;  %971 = vrot.lane.b32.xlu1 %v4345_v51, %s2708_s18  ;;  %v3408_v14 = vld [vmem:[%s2957_s8 + $0x48] sm:$0xf]  ;;  %2508 = vmatprep.subr.msk.bf16.mxu0 %vm1934_vm1, %v1900_v10  ;;  %v1936_v48 = vsel %vm1934_vm1, %v1900_v10, 0  ;;  %v3415_v51 = vld [vmem:[%s2957_s8 + $0x40] sm:$0xf] }
  0xdd   : > { %969 = vrot.lane.b32.xlu0 %v4405_v3, %s2708_s18  ;;  %4406 = vst [vmem:[#allocation45_spill] sm:$0xff] %v3408_v14  ;;  %4408 = vst [vmem:[#allocation47_spill] sm:$0xff] %v3415_v51  ;;  %2471 = vmatpush3.bf16.msra.mxu0 %v1936_v48  ;;  %v3430_v10 = vcombine.low %v3408_v14, %v471_v50  ;;  %v2635_v48 = vld [vmem:[%s3421_s17 + $0x8] sm:$0xff]   ;;  %v3449_v50 = vcombine.low %v2982_v11, %v2982_v11  ;;  %vm1246_vm1 = vcmask 982016  }
  0xde   : > { %v3412_v40 = vpop.permute.xlu1 %695  ;;  %2119 = vmatprep.subr.bf16.mxu0 %v4386_v43 }
  0xdf   : > { %4407 = vst [vmem:[#allocation46_spill] sm:$0xff] %v3412_v40  ;;  %v3423_v3 = vpop.permute.xlu0 %693  ;;  %4410 = vst [vmem:[#allocation49_spill] sm:$0xff] %v3430_v10  ;;  %v3436_v40 = vcombine.low %v3415_v51, %v469_v59  ;;  %v1269_v59 = vshll.u32 %v3430_v10, 16 }
  0xe0   : > { %4409 = vst [vmem:[#allocation48_spill] sm:$0xff] %v3423_v3  ;;  %1585 = vrot.lane.b32.xlu1 %v3396_v6, %s2701_s21  ;;  %2473 = vmatmul.mubr.msk.bf16.vlgmr.msra.gmra.mrb[0].mxu0 %vm1921_vm2, %v2635_v48 }
  0xe1   : > { %1583 = vrot.lane.b32.xlu0 %v3266_v60, %s2701_s21  ;;  %4411 = vst [vmem:[#allocation50_spill] sm:$0xff] %v3436_v40  ;;  %2120 = vmatpush1.bf16.msra.mxu0 %v3146_v31  ;;  %v944_v61 = vshll.u32 %v3436_v40, 16  ;;  %v1271_v11 = vrot.slane %v1269_v59, 1 }
  0xe2   : > { %v3439_v3 = vpop.permute.xlu1 %702  ;;  %2121 = vmatprep.subr.bf16.mxu0 %v4386_v43 }
  0xe3   : > { %4412 = vst [vmem:[#allocation51_spill] sm:$0xff] %v3439_v3  ;;  %v3442_v58 = vpop.permute.xlu0 %700  ;;  %v3469_v3 = vld [vmem:[%s2971_s13 + $0x8] sm:$0xf] }
  0xe4   : > { %4413 = vst [vmem:[#allocation52_spill] sm:$0xff] %v3442_v58  ;;  %736 = vrot.lane.b32.xlu1 %v2854_v56, %s2700_s20  ;;  %v1267_v56 = vshrl.u32 %v3430_v10, 16  ;;  %v946_v58 = vrot.slane %v944_v61, 1  ;;  %v2409_v10 = vcombine.low %v3469_v3, %v3469_v3  ;;  %v487_v61 = vld [vmem:[%s2971_s13 + $0x3c] sm:$0x1] }
  0xe5   : > { %734 = vrot.lane.b32.xlu0 %v2858_v57, %s2700_s20  ;;  %2122 = vmatpush1.bf16.msra.mxu0 %v3169_v49  ;;  %v942_v57 = vshrl.u32 %v3436_v40, 16  ;;  %v3474_v49 = vld [vmem:[%s2971_s13] sm:$0xf] }
  0xe6   : > { %v3456_v48 = vpop.permute.xlu1 %1277  ;;  %2123 = vmatprep.subr.bf16.mxu0 %v4386_v43  ;;  %v1272_v59 = vor.u32 %v1271_v11, %v1267_v56  ;;  %v2408_v47 = vcombine.low %v3474_v49, %v3474_v49  ;;  %v1321_v56 = vshrl.u32 %v2409_v10, 16 }
  0xe7   : > { %v3458_v31 = vpop.permute.xlu0 %704  ;;  %v3487_v40 = vor.u32 %v946_v58, %v942_v57 }
  0xe8   : > { %990 = vrot.lane.b32.xlu1 %v3449_v50, %s2709_s9  ;;  %v1314_v58 = vshrl.u32 %v2408_v47, 16 }
  0xe9   : > { %988 = vrot.lane.b32.xlu0 %v3287_v18, %s2709_s9  ;;  %2124 = vmatpush1.bf16.msra.mxu0 %v3190_v26  ;;  %4414 = vst [vmem:[#allocation53_spill] sm:$0xff] %v3487_v40 }
  0xea   : > { %v3471_v14 = vpop.permute.xlu1 %1373  ;;  %2125 = vmatprep.subr.bf16.mxu0 %v4386_v43 }
  0xeb   : > { %v3476_v51 = vpop.permute.xlu0 %1279 }
  0xec   : > { %1275 = vrot.lane.b32.xlu1 %v3214_v20, %s2695_s16  ;;  %v3497_v20 = vcombine.low %v3327_v4, %v487_v61  ;;  %v1324_v4 = vshll.u32 %v2409_v10, 16  ;;  %v1317_v61 = vshll.u32 %v2408_v47, 16 }
  0xed   : > { %1273 = vrot.lane.b32.xlu0 %v3219_v23, %s2695_s16  ;;  %2126 = vmatpush1.bf16.msra.mxu0 %v3208_v13  ;;  %v1323_v13 = vrot.slane %v1321_v56, 7 }
  0xee   : > { %v3491_v16 = vpop.permute.xlu1 %1413  ;;  %2127 = vmatprep.subr.bf16.mxu0 %v4386_v43  ;;  %v1477_v10 = vshll.u32 %v3497_v20, 16 }
  0xef   : > { %v3493_v26 = vpop.permute.xlu0 %1375 }
  0xf0   : > { %1287 = vrot.lane.b32.xlu1 %v1272_v59, %s2695_s16  ;;  %v1316_v59 = vrot.slane %v1314_v58, 7 }
  0xf1   : > { %1285 = vrot.lane.b32.xlu0 %v3487_v40, %s2695_s16  ;;  %2128 = vmatpush1.bf16.msra.mxu0 %v3227_v28  ;;  %v3520_v28 = vor.u32 %v1324_v4, %v1323_v13  ;;  %s4419_s16 = smov 40  }
  0xf2   : > { %v3503_v11 = vpop.permute.xlu1 %1485  ;;  %2129 = vmatprep.subr.bf16.mxu0 %v4386_v43  ;;  %v1319_v56 = vor.u32 %v1317_v61, %v1316_v59 }
  0xf3   : > { %v3505_v57 = vpop.permute.xlu0 %1415 }
  0xf4   : > { %1604 = vrot.lane.b32.xlu1 %v3497_v20, %s2702_s22 }
  0xf5   : > { %1602 = vrot.lane.b32.xlu0 %v3293_v53, %s2702_s22  ;;  %2130 = vmatpush1.bf16.msra.mxu0 %v3242_v15  ;;  %v1479_v15 = vrot.slane %v1477_v10, 1  ;;  %v473_v10 = vld [vmem:[%s2971_s13 + $0x4] sm:$0x1] }
  0xf6   : > { %v3513_v40 = vpop.permute.xlu1 %1511  ;;  %2131 = vmatprep.subr.bf16.mxu0 %v4386_v43 }
  0xf7   : > { %v3515_v23 = vpop.permute.xlu0 %1487 }
  0xf8   : > { %753 = vrot.lane.b32.xlu1 %v2878_v62, %s2701_s21  ;;  %v1475_v62 = vshrl.u32 %v3497_v20, 16 }
  0xf9   : > { %751 = vrot.lane.b32.xlu0 %v2882_v63, %s2701_s21  ;;  %2132 = vmatpush1.bf16.msra.mxu0 %v3259_v34 }
  0xfa   : > { %v3526_v47 = vpop.permute.xlu1 %1530  ;;  %2133 = vmatprep.subr.bf16.mxu0 %v4386_v43  ;;  %v3543_v34 = vor.u32 %v1479_v15, %v1475_v62 }
  0xfb   : > { %v3528_v58 = vpop.permute.xlu0 %1513 }
  0xfc   : > { %1371 = vrot.lane.b32.xlu1 %v3520_v28, %s2694_s15 }
  0xfd   : > { %1369 = vrot.lane.b32.xlu0 %v1319_v56, %s2694_s15  ;;  %2134 = vmatpush1.bf16.msra.mxu0 %v3278_v45  ;;  %v475_v45 = vld [vmem:[%s2971_s13 + $0xc] sm:$0x1] }
  0xfe   : > { %v3536_v63 = vpop.permute.xlu1 %1553  ;;  %2135 = vmatprep.subr.bf16.mxu0 %v4386_v43 }
  0xff   : > { %v3538_v13 = vpop.permute.xlu0 %1532 }
 0x100   : > { %1383 = vrot.lane.b32.xlu1 %v3396_v6, %s2694_s15 }
 0x101   : > { %1381 = vrot.lane.b32.xlu0 %v3266_v60, %s2694_s15  ;;  %2136 = vmatpush1.bf16.msra.mxu0 %v3300_v9  ;;  %v3568_v9 = vcombine.low %v3469_v3, %v475_v45  ;;  %v2416_v60 = vcombine.low %v3474_v49, %v473_v10  ;;  %s4415_s15 = smov 24  }
 0x102   : > { %v3548_v4 = vpop.permute.xlu1 %706  ;;  %2137 = vmatprep.subr.bf16.mxu0 %v4386_v43 }
 0x103   : > { %v3550_v59 = vpop.permute.xlu0 %1555  ;;  %v1428_v3 = vshll.u32 %v2416_v60, 16  ;;  %v1426_v10 = vshrl.u32 %v2416_v60, 16 }
 0x104   : > { %1627 = vrot.lane.b32.xlu1 %v3543_v34, %s2704_s23 }
 0x105   : > { %1625 = vrot.lane.b32.xlu0 %v3341_v17, %s2704_s23  ;;  %2138 = vmatpush1.bf16.msra.mxu0 %v3316_v46  ;;  %v1435_v46 = vshll.u32 %v3568_v9, 16  ;;  %v1430_v37 = vrot.slane %v1428_v3, 1 }
 0x106   : > { %v3559_v61 = vpop.permute.xlu1 %1581  ;;  %2139 = vmatprep.subr.bf16.mxu0 %v4386_v43 }
 0x107   : > { %v3562_v56 = vpop.permute.xlu0 %1579  ;;  %v1437_v49 = vrot.slane %v1435_v46, 1  ;;  %v1431_v46 = vor.u32 %v1430_v37, %v1426_v10 }
 0x108   : > { %793 = vrot.lane.b32.xlu1 %v3449_v50, %s2702_s22 }
 0x109   : > { %791 = vrot.lane.b32.xlu0 %v3287_v18, %s2702_s22  ;;  %2140 = vmatpush1.bf16.msra.mxu0 %v3335_v25  ;;  %v1433_v25 = vshrl.u32 %v3568_v9, 16 }
 0x10a   : > { %v3574_v62 = vpop.permute.xlu1 %732  ;;  %2141 = vmatprep.subr.bf16.mxu0 %v4386_v43 }
 0x10b   : > { %v3576_v15 = vpop.permute.xlu0 %730 }
 0x10c   : > { %1411 = vrot.lane.b32.xlu1 %v3568_v9, %s4415_s15 }
 0x10d   : > { %1409 = vrot.lane.b32.xlu0 %v2416_v60, %s4415_s15  ;;  %2142 = vmatpush1.bf16.msra.mxu0 %v3354_v30  ;;  %v3598_v30 = vor.u32 %v1437_v49, %v1433_v25  ;;  %v1638_v60 = vsel %vm1000_vm3, %v2976_v19, %v3456_v48  ;;  %v900_v49 = vrot.slane %v2992_v24, 1 }
 0x10e   : > { %v3584_v45 = vpop.permute.xlu1 %1283  ;;  %2143 = vmatprep.subr.bf16.mxu0 %v4386_v43  ;;  %v1654_v37 = vsel %vm1025_vm4, %v1638_v60, %v3471_v14 }
 0x10f   : > { %4416 = vst [vmem:[#allocation54_spill] sm:$0xff] %v3584_v45  ;;  %v3586_v18 = vpop.permute.xlu0 %1281  ;;  %v1670_v48 = vsel %vm1042_vm5, %v1654_v37, %v3491_v16 }
 0x110   : > { %4417 = vst [vmem:[#allocation55_spill] sm:$0xff] %v3586_v18  ;;  %1423 = vrot.lane.b32.xlu1 %v3497_v20, %s4415_s15  ;;  %v3604_v18 = vld [vmem:[%s2971_s13 + $0x40] sm:$0xf]  ;;  %v1686_v14 = vsel %vm1059_vm6, %v1670_v48, %v3503_v11 }
 0x111   : > { %1421 = vrot.lane.b32.xlu0 %v3293_v53, %s4415_s15  ;;  %2144 = vmatpush1.bf16.msra.mxu0 %v3369_v21  ;;  %v1640_v53 = vsel %vm1000_vm3, %v2992_v24, %v3476_v51  ;;  %v2424_v51 = vcombine.low %v3604_v18, %v3604_v18  ;;  %v1702_v25 = vsel %vm1076_vm7, %v1686_v14, %v3513_v40  ;;  %v2646_v24 = vld [vmem:[%s2793_s14 + $0x10] sm:$0xf] }
 0x112   : > { %v1601_v42 = vpop.permute.xlu1 %1600  ;;  %2145 = vmatprep.subr.bf16.mxu0 %v4386_v43  ;;  %v1656_v43 = vsel %vm1025_vm4, %v1640_v53, %v3493_v26  ;;  %v1718_v11 = vsel %vm1093_vm8, %v1702_v25, %v3526_v47 }
 0x113   : > { %v1599_v45 = vpop.permute.xlu0 %1598  ;;  %v1501_v10 = vshrl.u32 %v2424_v51, 16  ;;  %v1734_v40 = vsel %vm1110_vm9, %v1718_v11, %v3536_v63 }
 0x114   : > { %889 = vrot.lane.b32.xlu1 %v3020_v44, %s2704_s23  ;;  %v1750_v47 = vsel %vm1127_vm10, %v1734_v40, %v3562_v56  ;;  %v4418_v56 = vrot.slane %v2976_v19, 1 }
 0x115   : > { %887 = vrot.lane.b32.xlu0 %v3005_v32, %s2704_s23  ;;  %2146 = vmatpush1.bf16.msra.mxu0 %v3391_v0  ;;  %v1672_v32 = vsel %vm1042_vm5, %v1656_v43, %v3505_v57  ;;  %v1766_v53 = vsel %vm1144_vm11, %v1750_v47, %v1599_v45 }
 0x116   : > { %v3609_v21 = vpop.permute.xlu1 %749  ;;  %v1688_v0 = vsel %vm1059_vm6, %v1672_v32, %v3515_v23 }
 0x117   : > { %v3616_v3 = vpop.permute.xlu0 %747  ;;  %v1704_v26 = vsel %vm1076_vm7, %v1688_v0, %v3528_v58 }
 0x118   : > { %1483 = vrot.lane.b32.xlu1 %v3598_v30, %s2697_s19  ;;  %v1720_v16 = vsel %vm1093_vm8, %v1704_v26, %v3538_v13 }
 0x119   : > { %1481 = vrot.lane.b32.xlu0 %v1431_v46, %s2697_s19  ;;  %v1736_v58 = vsel %vm1110_vm9, %v1720_v16, %v3550_v59 }
 0x11a   : > { %v3636_v57 = vpop.permute.xlu1 %1379  ;;  %v1752_v13 = vsel %vm1127_vm10, %v1736_v58, %v3559_v61  ;;  %v1503_v61 = vrot.slane %v1501_v10, 7  ;;  %v3687_v10 = vcombine.low %v3065_v29, %v3065_v29 }
 0x11b   : > { %v3642_v23 = vpop.permute.xlu0 %1377  ;;  %v1768_v59 = vsel %vm1144_vm11, %v1752_v13, %v1601_v42  ;;  %v489_v13 = vld [vmem:[%s2971_s13 + $0x44] sm:$0x1] }
 0x11c   : > { %1495 = vrot.lane.b32.xlu1 %v3543_v34, %s2697_s19 }
 0x11d   : > { %1493 = vrot.lane.b32.xlu0 %v3341_v17, %s2697_s19  ;;  %v1504_v17 = vshll.u32 %v2424_v51, 16  ;;  %s4420_s19 = smov 96  }
 0x11e   : > { %v1624_v46 = vpop.permute.xlu1 %1623 }
 0x11f   : > { %v1784_v60 = vsel %vm1161_vm12, %v1768_v59, %v1624_v46  ;;  %v1622_v43 = vpop.permute.xlu0 %1621  ;;  %v3675_v25 = vor.u32 %v1504_v17, %v1503_v61  ;;  %v3742_v61 = vld [vmem:[%s2971_s13 + $0x48] sm:$0xf] }
 0x120   : > { %v1813_v37 = vshll.u32 %v1784_v60, 16  ;;  %v1782_v63 = vsel %vm1161_vm12, %v1766_v53, %v1622_v43  ;;  %913 = vrot.lane.b32.xlu1 %v900_v49, %s2705_s12  ;;  %v1811_v42 = vshrl.u32 %v1784_v60, 16 }
 0x121   : > { %v1807_v32 = vshll.u32 %v1782_v63, 16  ;;  %911 = vrot.lane.b32.xlu0 %v4418_v56, %s2705_s12  ;;  %v1805_v0 = vshrl.u32 %v1782_v63, 16  ;;  %v450_v63 = vld [vmem:[%s2793_s14 + $0x48] sm:$0xf]  ;;  %v2426_v56 = vcombine.low %v3742_v61, %v3742_v61 }
 0x122   : > { %v1815_v48 = vrot.slane %v1813_v37, 1  ;;  %v3669_v45 = vpop.permute.xlu1 %789 }
 0x123   : > { %v1809_v14 = vrot.slane %v1807_v32, 1  ;;  %v3671_v26 = vpop.permute.xlu0 %787 }
 0x124   : > { %1509 = vrot.lane.b32.xlu1 %v3015_v41, %s4419_s16  ;;  %v1816_v51 = vor.u32 %v1815_v48, %v1811_v42  ;;  %v901_v48 = vrot.slane %v3077_v38, 1 }
 0x125   : > { %1507 = vrot.lane.b32.xlu0 %v3520_v28, %s4419_s16  ;;  %v1810_v19 = vor.u32 %v1809_v14, %v1805_v0  ;;  %v1569_v0 = vshrl.u32 %v2426_v56, 16  ;;  %v451_v14 = vld [vmem:[%s2793_s14 + $0x4c] sm:$0x1] }
 0x126   : > { %v3679_v16 = vpop.permute.xlu1 %1419 }
 0x127   : > { %v3681_v11 = vpop.permute.xlu0 %1417  ;;  %v2440_v58 = vcombine.low %v1810_v19, %v1816_v51 }
 0x128   : > { %1521 = vrot.lane.b32.xlu1 %v3675_v25, %s4419_s16 }
 0x129   : > { %1519 = vrot.lane.b32.xlu0 %v3396_v6, %s4419_s16  ;;  %2460 = vmatprep.mubr.msk.bf16.mxu1 %vm1178_vm13, %v2440_v58  ;;  %v3708_v6 = vcombine.low %v3604_v18, %v489_v13  ;;  %v1571_v58 = vrot.slane %v1569_v0, 7  ;;  %v1572_v13 = vshll.u32 %v2426_v56, 16 }
 0x12a   : > { %v3692_v28 = vpop.permute.xlu1 %885 }
 0x12b   : > { %v3694_v40 = vpop.permute.xlu0 %883 }
 0x12c   : > { %932 = vrot.lane.b32.xlu1 %v3687_v10, %s4420_s19 }
 0x12d   : > { %930 = vrot.lane.b32.xlu0 %v3449_v50, %s4420_s19  ;;  %v1545_v50 = vshll.u32 %v3708_v6, 16 }
 0x12e   : > { %v3701_v47 = vpop.permute.xlu1 %1491 }
 0x12f   : > { %v3703_v29 = vpop.permute.xlu0 %1489  ;;  %v1547_v60 = vrot.slane %v1545_v50, 1 }
 0x130   : > { %1528 = vrot.lane.b32.xlu1 %v3007_v35, %s4421_s24 }
 0x131   : > { %1526 = vrot.lane.b32.xlu0 %v3568_v9, %s4421_s24  ;;  %v1543_v9 = vshrl.u32 %v3708_v6, 16 }
 0x132   : > { %v3712_v59 = vpop.permute.xlu1 %909 }
 0x133   : > { %v3714_v46 = vpop.permute.xlu0 %907 }
 0x134   : > { %1540 = vrot.lane.b32.xlu1 %v3708_v6, %s4421_s24 }
 0x135   : > { %1538 = vrot.lane.b32.xlu0 %v3497_v20, %s4421_s24  ;;  %v3736_v20 = vor.u32 %v1547_v60, %v1543_v9  ;;  %v1574_v9 = vor.u32 %v1572_v13, %v1571_v58 }
 0x136   : > { %v3721_v53 = vpop.permute.xlu1 %1517 }
 0x137   : > { %v3723_v18 = vpop.permute.xlu0 %1515 }
 0x138   : > { %958 = vrot.lane.b32.xlu1 %v3108_v5, %s4422_s11 }
 0x139   : > { %956 = vrot.lane.b32.xlu0 %v3020_v44, %s4422_s11  ;;  %v2386_v44 = vcombine.low %v450_v63, %v450_v63 }
 0x13a   : > { %v3730_v43 = vpop.permute.xlu1 %928 }
 0x13b   : > { %v3732_v37 = vpop.permute.xlu0 %926 }
 0x13c   : > { %1551 = vrot.lane.b32.xlu1 %v3035_v1, %s2700_s20 }
 0x13d   : > { %1549 = vrot.lane.b32.xlu0 %v3598_v30, %s2700_s20 }
 0x13e   : > { %v3744_v17 = vpop.permute.xlu1 %1536 }
 0x13f   : > { %v3746_v32 = vpop.permute.xlu0 %1534 }
 0x140   : > { %1563 = vrot.lane.b32.xlu1 %v3736_v20, %s2700_s20 }
 0x141   : > { %1561 = vrot.lane.b32.xlu0 %v3543_v34, %s2700_s20  ;;  %v3767_v34 = vcombine.low %v450_v63, %v451_v14  ;;  %v2645_v63 = vld [vmem:[%s2793_s14 + $0x18] sm:$0xf] }
 0x142   : > { %v3754_v42 = vpop.permute.xlu1 %954 }
 0x143   : > { %v3756_v30 = vpop.permute.xlu0 %952  ;;  %v722_v60 = vshll.u32 %v3767_v34, 16 }
 0x144   : > { %714 = vrot.lane.b32.xlu1 %v2386_v44, %s4421_s24  ;;  %v1012_v44 = vsel %vm1000_vm3, %v2645_v63, %v3110_v7  ;;  %v2644_v63 = vld [vmem:[%s3421_s17 + $0x18] sm:$0xff]  }
 0x145   : > { %712 = vrot.lane.b32.xlu0 %v2918_v8, %s4421_s24  ;;  %v1033_v56 = vsel %vm1025_vm4, %v1012_v44, %v3139_v27  ;;  %v724_v27 = vrot.slane %v722_v60, 1 }
 0x146   : > { %v3763_v51 = vpop.permute.xlu1 %1559  ;;  %v1050_v14 = vsel %vm1042_vm5, %v1033_v56, %v3222_v55  ;;  %v2643_v55 = vld [vmem:[%s3421_s17 + $0x10] sm:$0xff]  }
 0x147   : > { %v3765_v19 = vpop.permute.xlu0 %1557  ;;  %v1067_v58 = vsel %vm1059_vm6, %v1050_v14, %v3295_v2  ;;  %2476 = vmatprep.mubr.msk.bf16.mxu0 %vm1921_vm2, %v2643_v55 }
 0x148   : > { %975 = vrot.lane.b32.xlu1 %v901_v48, %s2708_s18  ;;  %2477 = vmatmul.mubr.msk.bf16.gmra.mrb[4].mxu0 %vm1921_vm2, %v2644_v63 }
 0x149   : > { %973 = vrot.lane.b32.xlu0 %v900_v49, %s2708_s18  ;;  %v1009_v49 = vsel %vm1000_vm3, %v2646_v24, %v3097_v54  ;;  %v720_v54 = vshrl.u32 %v3767_v34, 16  ;;  %v4424_v24 = vld [vmem:[#allocation2_spill] sm:$0xff] }
 0x14a   : > { %v3775_v50 = vpop.permute.xlu1 %710 }
 0x14b   : > { %v3777_v8 = vpop.permute.xlu0 %708  ;;  %v725_v44 = vor.u32 %v724_v27, %v720_v54 }
 0x14c   : > { %1577 = vrot.lane.b32.xlu1 %v3030_v52, %s2701_s21  ;;  %v1031_v52 = vsel %vm1025_vm4, %v1009_v49, %v3148_v33  ;;  %v1084_v33 = vsel %vm1076_vm7, %v1067_v58, %v3364_v39 }
 0x14d   : > { %1575 = vrot.lane.b32.xlu0 %v3015_v41, %s2701_s21  ;;  %v1048_v41 = vsel %vm1042_vm5, %v1031_v52, %v3229_v22  ;;  %v1101_v2 = vsel %vm1093_vm8, %v1084_v33, %v3548_v4  ;;  %v4423_v4 = vld [vmem:[#allocation3_spill] sm:$0xff] }
 0x14e   : > { %v972_v0 = vpop.permute.xlu1 %971  ;;  %v1065_v13 = vsel %vm1059_vm6, %v1048_v41, %v3302_v36  ;;  %v1118_v36 = vsel %vm1110_vm9, %v1101_v2, %v3574_v62  ;;  %v4425_v41 = vld [vmem:[#allocation7_spill] sm:$0xff] }
 0x14f   : > { %v970_v7 = vpop.permute.xlu0 %969  ;;  %v1082_v22 = vsel %vm1076_vm7, %v1065_v13, %v3373_v12  ;;  %v1135_v12 = vsel %vm1127_vm10, %v1118_v36, %v3609_v21  ;;  %v4427_v36 = vld [vmem:[#allocation4_spill] sm:$0xff] }
 0x150   : > { %1589 = vrot.lane.b32.xlu1 %v1574_v9, %s2701_s21  ;;  %v1099_v60 = vsel %vm1093_vm8, %v1082_v22, %v3458_v31  ;;  %v1152_v62 = vsel %vm1144_vm11, %v1135_v12, %v3669_v45 }
 0x151   : > { %1587 = vrot.lane.b32.xlu0 %v3675_v25, %s2701_s21  ;;  %v1116_v25 = vsel %vm1110_vm9, %v1099_v60, %v3576_v15  ;;  %v1169_v21 = vsel %vm1161_vm12, %v1152_v62, %v3692_v28  ;;  %v2647_v28 = vld [vmem:[%s2957_s8 + $0x38] sm:$0xf] }
 0x152   : > { %v3813_v9 = vpop.permute.xlu1 %1585  ;;  %v1133_v31 = vsel %vm1127_vm10, %v1116_v25, %v3616_v3  ;;  %v1186_v56 = vsel %vm1178_vm13, %v1169_v21, %v3712_v59  ;;  %v3854_v14 = vcombine.low %v2647_v28, %v2647_v28  ;;  %v4430_v62 = vld [vmem:[#allocation17_spill] sm:$0xff]  ;;  %v455_v21 = vld [vmem:[%s2957_s8 + $0xc] sm:$0x1] }
 0x153   : > { %v3820_v39 = vpop.permute.xlu0 %1583  ;;  %v1150_v15 = vsel %vm1144_vm11, %v1133_v31, %v3671_v26  ;;  %v1203_v26 = vsel %vm1195_vm14, %v1186_v56, %v3730_v43  ;;  %v2649_v31 = vld [vmem:[%s2793_s14 + $0x20] sm:$0xf]  ;;  %v4432_v56 = vld [vmem:[#allocation23_spill] sm:$0xff] }
 0x154   : > { %728 = vrot.lane.b32.xlu1 %v4423_v4, %s2700_s20  ;;  %v1167_v3 = vsel %vm1161_vm12, %v1150_v15, %v3694_v40  ;;  %v1220_v59 = vsel %vm1212_vm15, %v1203_v26, %v3754_v42  ;;  %v491_v42 = vld [vmem:[%s2971_s13 + $0x4c] sm:$0x1]  ;;  %v2648_v4 = vld [vmem:[%s2793_s14 + $0x28] sm:$0xf]  ;;  %s2368_s13 = sshll.u32 %s3402_s25, 3 }
 0x155   : > { %726 = vrot.lane.b32.xlu0 %v4424_v24, %s2700_s20  ;;  %v1184_v52 = vsel %vm1178_vm13, %v1167_v3, %v3714_v46  ;;  %v1237_v43 = vsel %vm1229_vm0, %v1220_v59, %v972_v0  ;;  %v4426_v0 = vld [vmem:[#allocation8_spill] sm:$0xff]  ;;  %v1015_v24 = vsel %vm1000_vm3, %v2649_v31, %v4430_v62 }
 0x156   : > { %v3840_v49 = vpop.permute.xlu1 %736  ;;  %v1201_v40 = vsel %vm1195_vm14, %v1184_v52, %v3732_v37  ;;  %v1035_v52 = vsel %vm1025_vm4, %v1015_v24, %v4432_v56  ;;  %v452_v56 = vld [vmem:[%s2957_s8] sm:$0xf] }
 0x157   : > { %v3846_v45 = vpop.permute.xlu0 %734  ;;  %v1218_v46 = vsel %vm1212_vm15, %v1201_v40, %v3756_v30  ;;  %v4433_v40 = vld [vmem:[#allocation31_spill] sm:$0xff] }
 0x158   : > { %740 = vrot.lane.b32.xlu1 %v725_v44, %s2700_s20  ;;  %v1235_v54 = vsel %vm1229_vm0, %v1218_v46, %v970_v7  ;;  %v2427_v7 = vcombine.low %v3742_v61, %v491_v42  ;;  %v742_v61 = vrot.slane %v3767_v34, 1  ;;  %v4429_v44 = vld [vmem:[#allocation16_spill] sm:$0xff]  ;;  %v4431_v34 = vld [vmem:[#allocation22_spill] sm:$0xff] }
 0x159   : > { %738 = vrot.lane.b32.xlu0 %v4425_v41, %s2700_s20  ;;  %v4434_v41 = vld [vmem:[#allocation32_spill] sm:$0xff] }
 0x15a   : > { %v991_v58 = vpop.permute.xlu1 %990  ;;  %v1613_v25 = vshll.u32 %v2427_v7, 16  ;;  %v1611_v26 = vshrl.u32 %v2427_v7, 16  ;;  %v1052_v46 = vsel %vm1042_vm5, %v1035_v52, %v4434_v41  ;;  %v4444_v52 = vld [vmem:[#allocation38_spill] sm:$0xff] }
 0x15b   : > { %v1254_v27 = vsel %vm1246_vm1, %v1237_v43, %v991_v58  ;;  %v989_v13 = vpop.permute.xlu0 %988  ;;  %v4435_v43 = vld [vmem:[#allocation6_spill] sm:$0xff] }
 0x15c   : > { %v1252_v33 = vsel %vm1246_vm1, %v1235_v54, %v989_v13  ;;  %994 = vrot.lane.b32.xlu1 %v3854_v14, %s2709_s9  ;;  %v1615_v28 = vrot.slane %v1613_v25, 1  ;;  %v4436_v58 = vrot.slane %v4435_v43, 1  ;;  %v454_v54 = vld [vmem:[%s2957_s8 + $0x8] sm:$0xf]  ;;  %v453_v25 = vld [vmem:[%s2957_s8 + $0x4] sm:$0x1] }
 0x15d   : > { %v2439_v37 = vcombine.low %v1252_v33, %v1254_v27  ;;  %992 = vrot.lane.b32.xlu0 %v3687_v10, %s2709_s9  ;;  %v4437_v27 = vld [vmem:[#allocation37_spill] sm:$0xff]  ;;  %v4438_v33 = vld [vmem:[#allocation54_spill] sm:$0xff] }
 0x15e   : > { %v1276_v55 = vpop.permute.xlu1 %1275  ;;  %v4446_v43 = vld [vmem:[#allocation50_spill] sm:$0xff] }
 0x15f   : > { %2160 = vmatmul.mubr.bf16.vlgmr.msra.gmra.mrb[0].mxu1 %v2439_v37  ;;  %v1274_v30 = vpop.permute.xlu0 %1273  ;;  %v4439_v37 = vld [vmem:[#allocation10_spill] sm:$0xff] }
 0x160   : > { %1596 = vrot.lane.b32.xlu1 %v4426_v0, %s2702_s22  ;;  %v1644_v42 = vsel %vm1000_vm3, %v4439_v37, %v4438_v33  ;;  %v4440_v0 = vld [vmem:[#allocation20_spill] sm:$0xff] }
 0x161   : > { %1594 = vrot.lane.b32.xlu0 %v3007_v35, %s2702_s22  ;;  %v4428_v35 = vld [vmem:[#allocation5_spill] sm:$0xff] }
 0x162   : > { %v1288_v22 = vpop.permute.xlu1 %1287 }
 0x163   : > { %v1286_v2 = vpop.permute.xlu0 %1285 }
 0x164   : > { %1608 = vrot.lane.b32.xlu1 %v2427_v7, %s2702_s22  ;;  %v1636_v7 = vsel %vm1000_vm3, %v4440_v0, %v1276_v55  ;;  %v4447_v0 = vld [vmem:[#allocation43_spill] sm:$0xff] }
 0x165   : > { %1606 = vrot.lane.b32.xlu0 %v3708_v6, %s2702_s22  ;;  %v1018_v6 = vsel %vm1000_vm3, %v2648_v4, %v4429_v44  ;;  %v1660_v44 = vsel %vm1025_vm4, %v1644_v42, %v3636_v57  ;;  %v1616_v57 = vor.u32 %v1615_v28, %v1611_v26  ;;  %v4445_v28 = vld [vmem:[#allocation49_spill] sm:$0xff]  ;;  %v2388_v42 = vcombine.low %v452_v56, %v452_v56 }
 0x166   : > { %v3881_v63 = vpop.permute.xlu1 %1604  ;;  %v1037_v3 = vsel %vm1025_vm4, %v1018_v6, %v4431_v34  ;;  %v4442_v6 = vld [vmem:[#allocation21_spill] sm:$0xff]  ;;  %v1648_v41 = vsel %vm1000_vm3, %v4445_v28, %v1288_v22 }
 0x167   : > { %v3883_v60 = vpop.permute.xlu0 %1602  ;;  %v1054_v59 = vsel %vm1042_vm5, %v1037_v3, %v4433_v40  ;;  %v1634_v31 = vsel %vm1000_vm3, %v4442_v6, %v1274_v30  ;;  %v4443_v3 = vld [vmem:[#allocation9_spill] sm:$0xff]  ;;  %v1069_v30 = vsel %vm1059_vm6, %v1052_v46, %v4444_v52 }
 0x168   : > { %745 = vrot.lane.b32.xlu1 %v4427_v36, %s2701_s21  ;;  %v1071_v13 = vsel %vm1059_vm6, %v1054_v59, %v4437_v27 }
 0x169   : > { %743 = vrot.lane.b32.xlu0 %v4428_v35, %s2701_s21  ;;  %v4441_v35 = vld [vmem:[#allocation55_spill] sm:$0xff] }
 0x16a   : > { %v3890_v12 = vpop.permute.xlu1 %753  ;;  %v1642_v4 = vsel %vm1000_vm3, %v3077_v38, %v4441_v35 }
 0x16b   : > { %v3898_v15 = vpop.permute.xlu0 %751  ;;  %v1658_v55 = vsel %vm1025_vm4, %v1642_v4, %v3642_v23 }
 0x16c   : > { %757 = vrot.lane.b32.xlu1 %v742_v61, %s2701_s21  ;;  %v3921_v61 = vcombine.low %v454_v54, %v455_v21  ;;  %v1676_v21 = vsel %vm1042_vm5, %v1660_v44, %v3679_v16  ;;  %v1674_v40 = vsel %vm1042_vm5, %v1658_v55, %v3681_v11  ;;  %v3952_v16 = vcombine.low %v452_v56, %v453_v25 }
 0x16d   : > { %755 = vrot.lane.b32.xlu0 %v4436_v58, %s2701_s21  ;;  %v1692_v23 = vsel %vm1059_vm6, %v1676_v21, %v3701_v47  ;;  %v1690_v59 = vsel %vm1059_vm6, %v1674_v40, %v3703_v29  ;;  %v1646_v58 = vsel %vm1000_vm3, %v4446_v43, %v1286_v2  ;;  %s4284_s21 = scalar_lea.vmem %s4319_s7, %s2368_s13 }
 0x16e   : > { %v1372_v36 = vpop.permute.xlu1 %1371  ;;  %v1708_v26 = vsel %vm1076_vm7, %v1692_v23, %v3721_v53  ;;  %v833_v11 = vshll.u32 %v3921_v61, 16  ;;  %v1706_v47 = vsel %vm1076_vm7, %v1690_v59, %v3723_v18  ;;  %v3974_v18 = vcombine.low %v454_v54, %v454_v54 }
 0x16f   : > { %v3932_v62 = vsel %vm1025_vm4, %v1636_v7, %v1372_v36  ;;  %v1370_v24 = vpop.permute.xlu0 %1369  ;;  %v1722_v53 = vsel %vm1093_vm8, %v1706_v47, %v3746_v32  ;;  %v826_v32 = vshll.u32 %v3952_v16, 16  ;;  %v4448_v7 = vld [vmem:[#allocation44_spill] sm:$0xff]  ;;  %v831_v4 = vshrl.u32 %v3921_v61, 16 }
 0x170   : > { %v3939_v34 = vsel %vm1025_vm4, %v1634_v31, %v1370_v24  ;;  %1619 = vrot.lane.b32.xlu1 %v4443_v3, %s2704_s23  ;;  %v1086_v36 = vsel %vm1076_vm7, %v1069_v30, %v4448_v7  ;;  %v835_v44 = vrot.slane %v833_v11, 1  ;;  %v4450_v7 = vld [vmem:[#allocation25_spill] sm:$0xff] }
 0x171   : > { %1617 = vrot.lane.b32.xlu0 %v3035_v1, %s2704_s23  ;;  %v1724_v1 = vsel %vm1093_vm8, %v1708_v26, %v3744_v17  ;;  %v1738_v17 = vsel %vm1110_vm9, %v1722_v53, %v3765_v19  ;;  %v828_v21 = vrot.slane %v826_v32, 1  ;;  %v4449_v53 = vld [vmem:[#allocation14_spill] sm:$0xff] }
 0x172   : > { %v1384_v46 = vpop.permute.xlu1 %1383  ;;  %v1740_v22 = vsel %vm1110_vm9, %v1724_v1, %v3763_v51  ;;  %v1088_v51 = vsel %vm1076_vm7, %v1071_v13, %v4447_v0  ;;  %v1754_v54 = vsel %vm1127_vm10, %v1738_v17, %v3820_v39  ;;  %v824_v39 = vshrl.u32 %v3952_v16, 16 }
 0x173   : > { %v1664_v29 = vsel %vm1025_vm4, %v1648_v41, %v1384_v46  ;;  %v1382_v27 = vpop.permute.xlu0 %1381  ;;  %v1756_v2 = vsel %vm1127_vm10, %v1740_v22, %v3813_v9  ;;  %v1770_v9 = vsel %vm1144_vm11, %v1754_v54, %v3883_v60  ;;  %v1105_v13 = vsel %vm1093_vm8, %v1088_v51, %v3775_v50 }
 0x174   : > { %v1662_v33 = vsel %vm1025_vm4, %v1646_v58, %v1382_v27  ;;  %1631 = vrot.lane.b32.xlu1 %v1616_v57, %s2704_s23  ;;  %v1772_v19 = vsel %vm1144_vm11, %v1756_v2, %v3881_v63  ;;  %v1103_v63 = vsel %vm1093_vm8, %v1086_v36, %v3777_v8  ;;  %v1122_v60 = vsel %vm1110_vm9, %v1105_v13, %v3840_v49  ;;  %v4451_v36 = vld [vmem:[#allocation47_spill] sm:$0xff]  ;;  %v4453_v13 = vld [vmem:[#allocation53_spill] sm:$0xff] }
 0x175   : > { %1629 = vrot.lane.b32.xlu0 %v3736_v20, %s2704_s23  ;;  %v1120_v50 = vsel %vm1110_vm9, %v1103_v63, %v3846_v45  ;;  %v1139_v3 = vsel %vm1127_vm10, %v1122_v60, %v3890_v12  ;;  %v836_v45 = vor.u32 %v835_v44, %v831_v4  ;;  %v829_v12 = vor.u32 %v828_v21, %v824_v39 }
 0x176   : > { %v1628_v25 = vpop.permute.xlu1 %1627  ;;  %v1137_v30 = vsel %vm1127_vm10, %v1120_v50, %v3898_v15  ;;  %v2404_v54 = vcombine.low %v4451_v36, %v4451_v36  ;;  %v4454_v39 = vrot.slane %v4442_v6, 1  ;;  %v964_v63 = vrot.slane %v4446_v43, 1  ;;  %v4456_v6 = vld [vmem:[#allocation45_spill] sm:$0xff] }
 0x177   : > { %v1788_v20 = vsel %vm1161_vm12, %v1772_v19, %v1628_v25  ;;  %v1626_v35 = vpop.permute.xlu0 %1625  ;;  %v2406_v43 = vcombine.low %v4456_v6, %v4456_v6 }
 0x178   : > { %v1825_v31 = vshll.u32 %v1788_v20, 16  ;;  %v1786_v24 = vsel %vm1161_vm12, %v1770_v9, %v1626_v35  ;;  %785 = vrot.lane.b32.xlu1 %v3974_v18, %s2702_s22  ;;  %v1823_v57 = vshrl.u32 %v1788_v20, 16  ;;  %v4452_v35 = vld [vmem:[#allocation30_spill] sm:$0xff] }
 0x179   : > { %v1819_v55 = vshll.u32 %v1786_v24, 16  ;;  %783 = vrot.lane.b32.xlu0 %v2388_v42, %s2702_s22  ;;  %v1817_v8 = vshrl.u32 %v1786_v24, 16 }
 0x17a   : > { %v1827_v56 = vrot.slane %v1825_v31, 1  ;;  %v794_v52 = vpop.permute.xlu1 %793 }
 0x17b   : > { %v1821_v40 = vrot.slane %v1819_v55, 1  ;;  %v1156_v49 = vsel %vm1144_vm11, %v1139_v3, %v794_v52  ;;  %v792_v23 = vpop.permute.xlu0 %791  ;;  %v4455_v3 = vld [vmem:[#allocation24_spill] sm:$0xff] }
 0x17c   : > { %v1828_v59 = vor.u32 %v1827_v56, %v1823_v57  ;;  %v1154_v26 = vsel %vm1144_vm11, %v1137_v30, %v792_v23  ;;  %797 = vrot.lane.b32.xlu1 %v3854_v14, %s2702_s22 }
 0x17d   : > { %v1822_v28 = vor.u32 %v1821_v40, %v1817_v8  ;;  %795 = vrot.lane.b32.xlu0 %v3687_v10, %s2702_s22 }
 0x17e   : > { %v1412_v41 = vpop.permute.xlu1 %1411 }
 0x17f   : > { %v2442_v46 = vcombine.low %v1822_v28, %v1828_v59  ;;  %v1668_v15 = vsel %vm1042_vm5, %v3932_v62, %v1412_v41  ;;  %v1410_v11 = vpop.permute.xlu0 %1409  ;;  %v896_v62 = vrot.slane %v3921_v61, 1 }
 0x180   : > { %v1666_v47 = vsel %vm1042_vm5, %v3939_v34, %v1410_v11  ;;  %881 = vrot.lane.b32.xlu1 %v836_v45, %s2704_s23  ;;  %v895_v34 = vrot.slane %v3952_v16, 1 }
 0x181   : > { %879 = vrot.lane.b32.xlu0 %v829_v12, %s2704_s23  ;;  %2461 = vmatprep.mubr.msk.bf16.mxu1 %vm1178_vm13, %v2442_v46 }
 0x182   : > { %v1424_v1 = vpop.permute.xlu1 %1423 }
 0x183   : > { %v1680_v58 = vsel %vm1042_vm5, %v1664_v29, %v1424_v1  ;;  %v1422_v10 = vpop.permute.xlu0 %1421  ;;  %v2650_v1 = vld [vmem:[%s2793_s14 + $0x38] sm:$0xf] }
 0x184   : > { %v1678_v27 = vsel %vm1042_vm5, %v1662_v33, %v1422_v10  ;;  %893 = vrot.lane.b32.xlu1 %v4449_v53, %s2704_s23  ;;  %v902_v33 = vrot.slane %v4439_v37, 1 }
 0x185   : > { %891 = vrot.lane.b32.xlu0 %v3108_v5, %s2704_s23 }
 0x186   : > { %v890_v22 = vpop.permute.xlu1 %889 }
 0x187   : > { %v4034_v17 = vsel %vm1161_vm12, %v1156_v49, %v890_v22  ;;  %v888_v2 = vpop.permute.xlu0 %887 }
 0x188   : > { %v4037_v29 = vsel %vm1161_vm12, %v1154_v26, %v888_v2  ;;  %905 = vrot.lane.b32.xlu1 %v896_v62, %s2705_s12 }
 0x189   : > { %903 = vrot.lane.b32.xlu0 %v895_v34, %s2705_s12  ;;  %v4459_v34 = vld [vmem:[#allocation26_spill] sm:$0xff] }
 0x18a   : > { %v1484_v61 = vpop.permute.xlu1 %1483 }
 0x18b   : > { %v1684_v42 = vsel %vm1059_vm6, %v1668_v15, %v1484_v61  ;;  %v1482_v5 = vpop.permute.xlu0 %1481 }
 0x18c   : > { %v1682_v16 = vsel %vm1059_vm6, %v1666_v47, %v1482_v5  ;;  %917 = vrot.lane.b32.xlu1 %v902_v33, %s2705_s12 }
 0x18d   : > { %915 = vrot.lane.b32.xlu0 %v901_v48, %s2705_s12 }
 0x18e   : > { %v1496_v32 = vpop.permute.xlu1 %1495 }
 0x18f   : > { %v1696_v0 = vsel %vm1059_vm6, %v1680_v58, %v1496_v32  ;;  %v1494_v51 = vpop.permute.xlu0 %1493  ;;  %v4457_v58 = vld [vmem:[#allocation18_spill] sm:$0xff] }
 0x190   : > { %v1694_v37 = vsel %vm1059_vm6, %v1678_v27, %v1494_v51  ;;  %924 = vrot.lane.b32.xlu1 %v4450_v7, %s4420_s19  ;;  %v1024_v10 = vsel %vm1000_vm3, %v2650_v1, %v4457_v58  ;;  %v2651_v27 = vld [vmem:[%s2793_s14 + $0x30] sm:$0xf]  ;;  %v4462_v32 = vld [vmem:[#allocation34_spill] sm:$0xff]  ;;  %v4463_v51 = vld [vmem:[#allocation39_spill] sm:$0xff] }
 0x191   : > { %922 = vrot.lane.b32.xlu0 %v3974_v18, %s4420_s19  ;;  %v1041_v22 = vsel %vm1025_vm4, %v1024_v10, %v4459_v34 }
 0x192   : > { %v4056_v19 = vpop.permute.xlu1 %913 }
 0x193   : > { %v4058_v25 = vpop.permute.xlu0 %911 }
 0x194   : > { %936 = vrot.lane.b32.xlu1 %v2404_v54, %s4420_s19  ;;  %v1188_v6 = vsel %vm1178_vm13, %v4037_v29, %v4058_v25 }
 0x195   : > { %934 = vrot.lane.b32.xlu0 %v3854_v14, %s4420_s19 }
 0x196   : > { %v1510_v38 = vpop.permute.xlu1 %1509 }
 0x197   : > { %v4064_v48 = vsel %vm1076_vm7, %v1684_v42, %v1510_v38  ;;  %v1508_v9 = vpop.permute.xlu0 %1507  ;;  %v4461_v42 = vld [vmem:[#allocation33_spill] sm:$0xff] }
 0x198   : > { %v4067_v20 = vsel %vm1076_vm7, %v1682_v16, %v1508_v9  ;;  %950 = vrot.lane.b32.xlu1 %v4452_v35, %s4422_s11  ;;  %v1058_v5 = vsel %vm1042_vm5, %v1041_v22, %v4461_v42  ;;  %v4466_v9 = vld [vmem:[#allocation48_spill] sm:$0xff] }
 0x199   : > { %948 = vrot.lane.b32.xlu0 %v836_v45, %s4422_s11 }
 0x19a   : > { %v1522_v18 = vpop.permute.xlu1 %1521 }
 0x19b   : > { %v4073_v4 = vsel %vm1076_vm7, %v1696_v0, %v1522_v18  ;;  %v1520_v44 = vpop.permute.xlu0 %1519 }
 0x19c   : > { %v4076_v14 = vsel %vm1076_vm7, %v1694_v37, %v1520_v44  ;;  %962 = vrot.lane.b32.xlu1 %v4453_v13, %s4422_s11  ;;  %v1075_v37 = vsel %vm1059_vm6, %v1058_v5, %v4463_v51  ;;  %v1190_v13 = vsel %vm1178_vm13, %v4034_v17, %v4056_v19 }
 0x19d   : > { %960 = vrot.lane.b32.xlu0 %v4449_v53, %s4422_s11  ;;  %v4458_v53 = vld [vmem:[#allocation19_spill] sm:$0xff] }
 0x19e   : > { %v933_v31 = vpop.permute.xlu1 %932 }
 0x19f   : > { %v931_v24 = vpop.permute.xlu0 %930 }
 0x1a0   : > { %967 = vrot.lane.b32.xlu1 %v4454_v39, %s2708_s18 }
 0x1a1   : > { %965 = vrot.lane.b32.xlu0 %v896_v62, %s2708_s18  ;;  %v1021_v62 = vsel %vm1000_vm3, %v2651_v27, %v4458_v53 }
 0x1a2   : > { %v4087_v60 = vpop.permute.xlu1 %1528 }
 0x1a3   : > { %v4089_v55 = vpop.permute.xlu0 %1526 }
 0x1a4   : > { %979 = vrot.lane.b32.xlu1 %v964_v63, %s2708_s18 }
 0x1a5   : > { %977 = vrot.lane.b32.xlu0 %v902_v33, %s2708_s18  ;;  %v4460_v33 = vld [vmem:[#allocation27_spill] sm:$0xff] }
 0x1a6   : > { %v4093_v21 = vpop.permute.xlu1 %1540  ;;  %v1039_v61 = vsel %vm1025_vm4, %v1021_v62, %v4460_v33  ;;  %v1714_v33 = vsel %vm1093_vm8, %v4067_v20, %v4089_v55 }
 0x1a7   : > { %v4095_v50 = vpop.permute.xlu0 %1538  ;;  %v1056_v0 = vsel %vm1042_vm5, %v1039_v61, %v4462_v32 }
 0x1a8   : > { %986 = vrot.lane.b32.xlu1 %v4455_v3, %s2709_s9  ;;  %v1726_v55 = vsel %vm1093_vm8, %v4076_v14, %v4095_v50 }
 0x1a9   : > { %984 = vrot.lane.b32.xlu0 %v4450_v7, %s2709_s9  ;;  %v4464_v7 = vld [vmem:[#allocation40_spill] sm:$0xff] }
 0x1aa   : > { %v959_v57 = vpop.permute.xlu1 %958  ;;  %v1073_v36 = vsel %vm1059_vm6, %v1056_v0, %v4464_v7 }
 0x1ab   : > { %v957_v56 = vpop.permute.xlu0 %956  ;;  %v1090_v35 = vsel %vm1076_vm7, %v1073_v36, %v4466_v9 }
 0x1ac   : > { %998 = vrot.lane.b32.xlu1 %v2406_v43, %s2709_s9  ;;  %v1207_v43 = vsel %vm1195_vm14, %v1190_v13, %v933_v31 }
 0x1ad   : > { %996 = vrot.lane.b32.xlu0 %v2404_v54, %s2709_s9  ;;  %v4465_v54 = vld [vmem:[#allocation46_spill] sm:$0xff]  ;;  %v1224_v58 = vsel %vm1212_vm15, %v1207_v43, %v959_v57 }
 0x1ae   : > { %v1552_v52 = vpop.permute.xlu1 %1551  ;;  %v1092_v38 = vsel %vm1076_vm7, %v1075_v37, %v4465_v54 }
 0x1af   : > { %v1550_v30 = vpop.permute.xlu0 %1549 }
 0x1b0   : > { %v1730_v42 = vsel %vm1110_vm9, %v1714_v33, %v1550_v30 }
 0x1b2   : > { %v4105_v8 = vpop.permute.xlu1 %1563 }
 0x1b3   : > { %v4107_v40 = vpop.permute.xlu0 %1561  ;;  %v4109_v49 = vpop.f32.mrb[0].mxu0 }
 0x1b4   : > { %v4111_v59 = vpop.f32.mrb[1].mxu0 }
 0x1b5   : > { %v4113_v45 = vpop.f32.mrb[2].mxu0 }
 0x1b6   : > { %v715_v23 = vpop.permute.xlu1 %714  ;;  %v4115_v41 = vpop.f32.mrb[3].mxu0 }
 0x1b7   : > { %v713_v26 = vpop.permute.xlu0 %712  ;;  %v1109_v18 = vsel %vm1093_vm8, %v1092_v38, %v715_v23  ;;  %v1205_v23 = vsel %vm1195_vm14, %v1188_v6, %v931_v24 }
 0x1b8   : > { %v1107_v39 = vsel %vm1093_vm8, %v1090_v35, %v713_v26  ;;  %v1222_v17 = vsel %vm1212_vm15, %v1205_v23, %v957_v56 }
 0x1ba   : > { %v976_v28 = vpop.permute.xlu1 %975 }
 0x1bb   : > { %v974_v12 = vpop.permute.xlu0 %973  ;;  %v1241_v19 = vsel %vm1229_vm0, %v1224_v58, %v976_v28  ;;  %v1716_v28 = vsel %vm1093_vm8, %v4064_v48, %v4087_v60  ;;  %v1728_v48 = vsel %vm1093_vm8, %v4073_v4, %v4093_v21 }
 0x1bc   : > { %v1239_v10 = vsel %vm1229_vm0, %v1222_v17, %v974_v12  ;;  %v1732_v61 = vsel %vm1110_vm9, %v1716_v28, %v1552_v52  ;;  %v1744_v52 = vsel %vm1110_vm9, %v1728_v48, %v4105_v8  ;;  %v4467_v48 = vld [vmem:[#allocation15_spill] sm:$0xff] }
 0x1be   : > { %v1578_v46 = vpop.permute.xlu1 %1577 }
 0x1bf   : > { %v1576_v15 = vpop.permute.xlu0 %1575  ;;  %v1748_v5 = vsel %vm1127_vm10, %v1732_v61, %v1578_v46 }
 0x1c0   : > { %v1746_v32 = vsel %vm1127_vm10, %v1730_v42, %v1576_v15  ;;  %v1742_v15 = vsel %vm1110_vm9, %v1726_v55, %v4107_v40  ;;  %v4468_v55 = vld [vmem:[#allocation13_spill] sm:$0xff] }
 0x1c2   : > { %v1590_v11 = vpop.permute.xlu1 %1589 }
 0x1c3   : > { %v4117_v47 = vpop.permute.xlu0 %1587  ;;  %v1760_v4 = vsel %vm1127_vm10, %v1744_v52, %v1590_v11 }
 0x1c4   : > { %v1758_v7 = vsel %vm1127_vm10, %v1742_v15, %v4117_v47 }
 0x1c6   : > { %v4127_v2 = vpop.permute.xlu1 %728 }
 0x1c7   : > { %v4133_v16 = vpop.permute.xlu0 %726 }
 0x1ca   : > { %v741_v44 = vpop.permute.xlu1 %740 }
 0x1cb   : > { %v4151_v63 = vsel %vm1110_vm9, %v1109_v18, %v741_v44  ;;  %v739_v3 = vpop.permute.xlu0 %738 }
 0x1cc   : > { %v4158_v1 = vsel %vm1110_vm9, %v1107_v39, %v739_v3 }
 0x1ce   : > { %v995_v26 = vpop.permute.xlu1 %994 }
 0x1cf   : > { %v1258_v27 = vsel %vm1246_vm1, %v1241_v19, %v995_v26  ;;  %v993_v53 = vpop.permute.xlu0 %992 }
 0x1d0   : > { %v1256_v29 = vsel %vm1246_vm1, %v1239_v10, %v993_v53 }
 0x1d1   : > { %v2441_v25 = vcombine.low %v1256_v29, %v1258_v27 }
 0x1d2   : > { %v1597_v31 = vpop.permute.xlu1 %1596 }
 0x1d3   : > { %2168 = vmatmul.mubr.bf16.gmra.mrb[4].mxu1 %v2441_v25  ;;  %v1595_v62 = vpop.permute.xlu0 %1594  ;;  %v1764_v0 = vsel %vm1144_vm11, %v1748_v5, %v1597_v31 }
 0x1d4   : > { %v1762_v60 = vsel %vm1144_vm11, %v1746_v32, %v1595_v62 }
 0x1d6   : > { %v1609_v34 = vpop.permute.xlu1 %1608 }
 0x1d7   : > { %v1607_v24 = vpop.permute.xlu0 %1606  ;;  %v1776_v36 = vsel %vm1144_vm11, %v1760_v4, %v1609_v34  ;;  %v4470_v4 = vld [vmem:[#allocation28_spill] sm:$0xff] }
 0x1d8   : > { %v1774_v50 = vsel %vm1144_vm11, %v1758_v7, %v1607_v24  ;;  %v4471_v7 = vld [vmem:[#allocation12_spill] sm:$0xff] }
 0x1da   : > { %v4167_v22 = vpop.permute.xlu1 %745 }
 0x1db   : > { %v4169_v57 = vpop.permute.xlu0 %743 }
 0x1de   : > { %v4171_v56 = vpop.permute.xlu1 %757 }
 0x1df   : > { %v4176_v12 = vpop.permute.xlu0 %755 }
 0x1e2   : > { %v1620_v51 = vpop.permute.xlu1 %1619 }
 0x1e3   : > { %v1780_v37 = vsel %vm1161_vm12, %v1764_v0, %v1620_v51  ;;  %v1618_v20 = vpop.permute.xlu0 %1617  ;;  %v2652_v51 = vld [vmem:[%s2793_s14 + $0x8] sm:$0xf] }
 0x1e4   : > { %v1801_v30 = vshll.u32 %v1780_v37, 16  ;;  %v1778_v46 = vsel %vm1161_vm12, %v1762_v60, %v1618_v20  ;;  %v1799_v54 = vshrl.u32 %v1780_v37, 16  ;;  %v1006_v60 = vsel %vm1000_vm3, %v2652_v51, %v4467_v48  ;;  %v2653_v20 = vld [vmem:[%s2793_s14] sm:$0xf] }
 0x1e5   : > { %v1795_v21 = vshll.u32 %v1778_v46, 16  ;;  %v1793_v8 = vshrl.u32 %v1778_v46, 16  ;;  %v1003_v52 = vsel %vm1000_vm3, %v2653_v20, %v4468_v55 }
 0x1e6   : > { %v1803_v38 = vrot.slane %v1801_v30, 1  ;;  %v1632_v14 = vpop.permute.xlu1 %1631  ;;  %v4469_v30 = vld [vmem:[#allocation11_spill] sm:$0xff] }
 0x1e7   : > { %v1797_v9 = vrot.slane %v1795_v21, 1  ;;  %v1792_v35 = vsel %vm1161_vm12, %v1776_v36, %v1632_v14  ;;  %v1630_v18 = vpop.permute.xlu0 %1629  ;;  %v1029_v46 = vsel %vm1025_vm4, %v1006_v60, %v4469_v30  ;;  %v1027_v36 = vsel %vm1025_vm4, %v1003_v52, %v4471_v7 }
 0x1e8   : > { %v1804_v44 = vor.u32 %v1803_v38, %v1799_v54  ;;  %v1837_v40 = vshll.u32 %v1792_v35, 16  ;;  %v1790_v11 = vsel %vm1161_vm12, %v1774_v50, %v1630_v18  ;;  %v1835_v3 = vshrl.u32 %v1792_v35, 16  ;;  %v4472_v38 = vld [vmem:[#allocation29_spill] sm:$0xff]  ;;  %v4473_v50 = vld [vmem:[#allocation35_spill] sm:$0xff] }
 0x1e9   : > { %v1798_v13 = vor.u32 %v1797_v9, %v1793_v8  ;;  %v1831_v39 = vshll.u32 %v1790_v11, 16  ;;  %v1829_v23 = vshrl.u32 %v1790_v11, 16  ;;  %v1046_v21 = vsel %vm1042_vm5, %v1029_v46, %v4470_v4  ;;  %v4474_v9 = vld [vmem:[#allocation36_spill] sm:$0xff]  ;;  %v4475_v18 = vld [vmem:[#allocation41_spill] sm:$0xff] }
 0x1ea   : > { %v1839_v47 = vrot.slane %v1837_v40, 1  ;;  %v786_v6 = vpop.permute.xlu1 %785  ;;  %v1044_v14 = vsel %vm1042_vm5, %v1027_v36, %v4472_v38  ;;  %v1063_v8 = vsel %vm1059_vm6, %v1046_v21, %v4473_v50  ;;  %v4476_v40 = vld [vmem:[#allocation42_spill] sm:$0xff] }
 0x1eb   : > { %v2438_v43 = vcombine.low %v1798_v13, %v1804_v44  ;;  %v1833_v58 = vrot.slane %v1831_v39, 1  ;;  %v784_v17 = vpop.permute.xlu0 %783  ;;  %v1061_v35 = vsel %vm1059_vm6, %v1044_v14, %v4474_v9  ;;  %v1080_v44 = vsel %vm1076_vm7, %v1063_v8, %v4475_v18  ;;  %v4477_v13 = vld [vmem:[#allocation51_spill] sm:$0xff] }
 0x1ec   : > { %v1840_v19 = vor.u32 %v1839_v47, %v1835_v3  ;;  %v1078_v11 = vsel %vm1076_vm7, %v1061_v35, %v4476_v40  ;;  %v1097_v39 = vsel %vm1093_vm8, %v1080_v44, %v4477_v13  ;;  %v4478_v47 = vld [vmem:[#allocation52_spill] sm:$0xff] }
 0x1ed   : > { %v1834_v26 = vor.u32 %v1833_v58, %v1829_v23  ;;  %2459 = vmatprep.mubr.msk.bf16.mxu0 %vm1178_vm13, %v2438_v43  ;;  %v1095_v43 = vsel %vm1093_vm8, %v1078_v11, %v4478_v47  ;;  %v1114_v23 = vsel %vm1110_vm9, %v1097_v39, %v4127_v2 }
 0x1ee   : > { %v798_v10 = vpop.permute.xlu1 %797 }
 0x1ef   : > { %v2444_v27 = vcombine.low %v1834_v26, %v1840_v19  ;;  %v796_v53 = vpop.permute.xlu0 %795  ;;  %v1112_v19 = vsel %vm1110_vm9, %v1095_v43, %v4133_v16  ;;  %v1131_v26 = vsel %vm1127_vm10, %v1114_v23, %v4167_v22  ;;  %v1143_v16 = vsel %vm1127_vm10, %v4151_v63, %v4171_v56 }
 0x1f0   : > { %v1148_v51 = vsel %vm1144_vm11, %v1131_v26, %v786_v6  ;;  %v1141_v6 = vsel %vm1127_vm10, %v4158_v1, %v4176_v12 }
 0x1f1   : > { %2462 = vmatprep.mubr.msk.bf16.mxu1 %vm1178_vm13, %v2444_v27  ;;  %v1129_v27 = vsel %vm1127_vm10, %v1112_v19, %v4169_v57 }
 0x1f2   : > { %v882_v29 = vpop.permute.xlu1 %881  ;;  %v1146_v48 = vsel %vm1144_vm11, %v1129_v27, %v784_v17  ;;  %v1160_v17 = vsel %vm1144_vm11, %v1143_v16, %v798_v10 }
 0x1f3   : > { %v880_v25 = vpop.permute.xlu0 %879  ;;  %v1165_v60 = vsel %vm1161_vm12, %v1148_v51, %v882_v29 }
 0x1f4   : > { %v1163_v55 = vsel %vm1161_vm12, %v1146_v48, %v880_v25 }
 0x1f6   : > { %v894_v31 = vpop.permute.xlu1 %893 }
 0x1f7   : > { %v892_v62 = vpop.permute.xlu0 %891  ;;  %v1177_v30 = vsel %vm1161_vm12, %v1160_v17, %v894_v31 }
 0x1fa   : > { %v906_v34 = vpop.permute.xlu1 %905 }
 0x1fb   : > { %v904_v24 = vpop.permute.xlu0 %903  ;;  %v1182_v2 = vsel %vm1178_vm13, %v1165_v60, %v906_v34  ;;  %v1158_v34 = vsel %vm1144_vm11, %v1141_v6, %v796_v53 }
 0x1fc   : > { %v1180_v22 = vsel %vm1178_vm13, %v1163_v55, %v904_v24 }
 0x1fe   : > { %v918_v28 = vpop.permute.xlu1 %917 }
 0x1ff   : > { %v916_v33 = vpop.permute.xlu0 %915  ;;  %v1194_v46 = vsel %vm1178_vm13, %v1177_v30, %v918_v28 }
 0x202   : > { %v925_v61 = vpop.permute.xlu1 %924 }
 0x203   : > { %v923_v42 = vpop.permute.xlu0 %922  ;;  %v1199_v57 = vsel %vm1195_vm14, %v1182_v2, %v925_v61  ;;  %v1175_v61 = vsel %vm1161_vm12, %v1158_v34, %v892_v62 }
 0x204   : > { %v1197_v29 = vsel %vm1195_vm14, %v1180_v22, %v923_v42  ;;  %v1192_v42 = vsel %vm1178_vm13, %v1175_v61, %v916_v33 }
 0x206   : > { %v937_v5 = vpop.permute.xlu1 %936 }
 0x207   : > { %v935_v32 = vpop.permute.xlu0 %934  ;;  %v1211_v53 = vsel %vm1195_vm14, %v1194_v46, %v937_v5 }
 0x20a   : > { %v951_v0 = vpop.permute.xlu1 %950 }
 0x20b   : > { %v949_v37 = vpop.permute.xlu0 %948  ;;  %v1216_v25 = vsel %vm1212_vm15, %v1199_v57, %v951_v0  ;;  %v1209_v0 = vsel %vm1195_vm14, %v1192_v42, %v935_v32 }
 0x20c   : > { %v1214_v63 = vsel %vm1212_vm15, %v1197_v29, %v949_v37 }
 0x20e   : > { %v963_v15 = vpop.permute.xlu1 %962 }
 0x20f   : > { %v961_v54 = vpop.permute.xlu0 %960  ;;  %v1228_v37 = vsel %vm1212_vm15, %v1211_v53, %v963_v15 }
 0x210   : > { %v1226_v62 = vsel %vm1212_vm15, %v1209_v0, %v961_v54  ;;  %v2436_v54 = vld [vmem:[%s4316_s4] ss:$0 sm:$0xff] }
 0x212   : > { %v968_v3 = vpop.permute.xlu1 %967 }
 0x213   : > { %v966_v58 = vpop.permute.xlu0 %965  ;;  %v1233_v56 = vsel %vm1229_vm0, %v1216_v25, %v968_v3 }
 0x214   : > { %v1231_v1 = vsel %vm1229_vm0, %v1214_v63, %v966_v58 }
 0x216   : > { %v980_v20 = vpop.permute.xlu1 %979 }
 0x217   : > { %v978_v52 = vpop.permute.xlu0 %977  ;;  %v1245_v28 = vsel %vm1229_vm0, %v1228_v37, %v980_v20 }
 0x218   : > { %v1243_v7 = vsel %vm1229_vm0, %v1226_v62, %v978_v52 }
 0x21a   : > { %v987_v24 = vpop.permute.xlu1 %986 }
 0x21b   : > { %v1250_v12 = vsel %vm1246_vm1, %v1233_v56, %v987_v24  ;;  %v985_v10 = vpop.permute.xlu0 %984  ;;  %v2478_v32 = vpop.f32.mrb[4].mxu0 }
 0x21c   : > { %v1248_v31 = vsel %vm1246_vm1, %v1231_v1, %v985_v10  ;;  %v1988_v14 = vpop.f32.mrb[5].mxu0 }
 0x21d   : > { %v2437_v4 = vcombine.low %v1248_v31, %v1250_v12  ;;  %v2479_v15 = vpop.f32.mrb[6].mxu0 }
 0x21e   : > { %v999_v21 = vpop.permute.xlu1 %998  ;;  %v1991_v50 = vpop.f32.mrb[7].mxu0 }
 0x21f   : > { %v1262_v36 = vsel %vm1246_vm1, %v1245_v28, %v999_v21  ;;  %2152 = vmatmul.mubr.bf16.vlgmr.msra.gmra.mrb[8].mxu0 %v2437_v4  ;;  %v997_v33 = vpop.permute.xlu0 %996 }
 0x220   : > { %v1260_v5 = vsel %vm1246_vm1, %v1243_v7, %v997_v33 }
 0x221   : > { %v2443_v38 = vcombine.low %v1260_v5, %v1262_v36 }
 0x223   : > { %2176 = vmatmul.mubr.bf16.gmra.mrb[8].mxu1 %v2443_v38 }
 0x232   : > { %v2161_v8 = vpop.f32.mrb[0].mxu1 }
 0x233   : > { %v2162_v9 = vadd.f32 %v2436_v54, %v2161_v8  ;;  %v2163_v35 = vpop.f32.mrb[1].mxu1 }
 0x234   : > { %v2164_v18 = vpop.f32.mrb[2].mxu1 }
 0x235   : > { %v2186_v44 = vadd.f32 %v4109_v49, %v2162_v9  ;;  %v2165_v40 = vadd.f32 %v2436_v54, %v2164_v18  ;;  %v2166_v11 = vpop.f32.mrb[3].mxu1 }
 0x237   : > { %vm2194_vm2 = vcmp.ge.f32.partialorder %v2186_v44, 0.0  ;;  %v2202_v13 = vmul.f32 0.2, %v2186_v44  ;;  %v2187_v39 = vadd.f32 %v4113_v45, %v2165_v40 }
 0x239   : > { %v2210_v3 = vsel %vm2194_vm2, %v2186_v44, %v2202_v13  ;;  %vm2195_vm3 = vcmp.ge.f32.partialorder %v2187_v39, 0.0  ;;  %v2203_v47 = vmul.f32 0.2, %v2187_v39 }
 0x23a   : > { %2218 = vst [vmem:[%s4284_s21 + $0x10] sm:$0xff] %v2210_v3 }
 0x23b   : > { %v2211_v43 = vsel %vm2195_vm3, %v2187_v39, %v2203_v47 }
 0x23c   : > { %2219 = vst [vmem:[%s4284_s21 + $0x18] sm:$0xff] %v2211_v43 }
 0x2a6   : > { %v2169_v49 = vpop.f32.mrb[4].mxu1 }
 0x2a7   : > { %v2170_v23 = vadd.f32 %v2436_v54, %v2169_v49  ;;  %v2171_v58 = vpop.f32.mrb[5].mxu1 }
 0x2a8   : > { %v2172_v19 = vpop.f32.mrb[6].mxu1 }
 0x2a9   : > { %v2188_v26 = vadd.f32 %v2170_v23, %v1988_v14  ;;  %v2173_v27 = vadd.f32 %v2436_v54, %v2172_v19  ;;  %v2174_v51 = vpop.f32.mrb[7].mxu1 }
 0x2ab   : > { %vm2196_vm4 = vcmp.ge.f32.partialorder %v2188_v26, 0.0  ;;  %v2204_v48 = vmul.f32 0.2, %v2188_v26  ;;  %v2189_v60 = vadd.f32 %v2173_v27, %v1991_v50 }
 0x2ad   : > { %v2212_v20 = vsel %vm2196_vm4, %v2188_v26, %v2204_v48  ;;  %vm2197_vm5 = vcmp.ge.f32.partialorder %v2189_v60, 0.0  ;;  %v2205_v45 = vmul.f32 0.2, %v2189_v60 }
 0x2ae   : > { %2220 = vst [vmem:[%s4284_s21 + $0x20] sm:$0xff] %v2212_v20 }
 0x2af   : > { %v2213_v55 = vsel %vm2197_vm5, %v2189_v60, %v2205_v45 }
 0x2b0   : > { %2221 = vst [vmem:[%s4284_s21 + $0x28] sm:$0xff] %v2213_v55 }
 0x2f2   : > { %v2153_v2 = vpop.f32.mrb[8].mxu0 }
 0x2f3   : > { %v2154_v52 = vadd.f32 %v2436_v54, %v2153_v2  ;;  %v2155_v16 = vpop.f32.mrb[9].mxu0 }
 0x2f4   : > { %v2156_v22 = vpop.f32.mrb[10].mxu0 }
 0x2f5   : > { %v2184_v57 = vadd.f32 %v2154_v52, %v4111_v59  ;;  %v2157_v6 = vadd.f32 %v2436_v54, %v2156_v22  ;;  %v2158_v17 = vpop.f32.mrb[11].mxu0 }
 0x2f6   : > { %v2177_v29 = vpop.f32.mrb[8].mxu1 }
 0x2f7   : > { %vm2192_vm6 = vcmp.ge.f32.partialorder %v2184_v57, 0.0  ;;  %v2200_v25 = vmul.f32 0.2, %v2184_v57  ;;  %v2185_v34 = vadd.f32 %v2157_v6, %v4115_v41  ;;  %v2178_v30 = vadd.f32 %v2436_v54, %v2177_v29  ;;  %v2179_v63 = vpop.f32.mrb[9].mxu1 }
 0x2f8   : > { %v2180_v56 = vpop.f32.mrb[10].mxu1 }
 0x2f9   : > { %v2208_v24 = vsel %vm2192_vm6, %v2184_v57, %v2200_v25  ;;  %vm2193_vm7 = vcmp.ge.f32.partialorder %v2185_v34, 0.0  ;;  %v2201_v61 = vmul.f32 0.2, %v2185_v34  ;;  %v2190_v46 = vadd.f32 %v2478_v32, %v2178_v30  ;;  %v2182_v1 = vpop.f32.mrb[11].mxu1 }
 0x2fa   : > { %2216 = vst [vmem:[%s4284_s21] sm:$0xff] %v2208_v24  ;;  %v2181_v59 = vadd.f32 %v2436_v54, %v2180_v56 }
 0x2fb   : > { %v2209_v12 = vsel %vm2193_vm7, %v2185_v34, %v2201_v61  ;;  %vm2198_vm8 = vcmp.ge.f32.partialorder %v2190_v46, 0.0  ;;  %v2206_v10 = vmul.f32 0.2, %v2190_v46 }
 0x2fc   : > { %2217 = vst [vmem:[%s4284_s21 + $0x8] sm:$0xff] %v2209_v12  ;;  %v2191_v42 = vadd.f32 %v2479_v15, %v2181_v59 }
 0x2fd   : > { %v2214_v53 = vsel %vm2198_vm8, %v2190_v46, %v2206_v10 }
 0x2fe   : > { %2222 = vst [vmem:[%s4284_s21 + $0x30] sm:$0xff] %v2214_v53  ;;  %vm2199_vm9 = vcmp.ge.f32.partialorder %v2191_v42, 0.0  ;;  %v2207_v41 = vmul.f32 0.2, %v2191_v42 }
 0x300   : > { %v2215_v31 = vsel %vm2199_vm9, %v2191_v42, %v2207_v41 }
 0x301   : > { %2223 = vst [vmem:[%s4284_s21 + $0x38] sm:$0xff] %v2215_v31 }
 0x302 PF: > { %s17_s28 = sadd.s32 1, %s2692_s28   ;;  %s4479_s24 = smov %s2684_s26 }
 0x303   : > { %p14_p10 = scmp.ge.s32.totalorder %s17_s28, 18   ;;  %s4480_s25 = smov %s2688_s27 }
 0x304   : > { %s4481_s26 = smov %s4484_s29  ;;  %s4482_s27 = smov %s4488_s30 }
 0x305   :  { %16 = sbr.rel (!%p14_p10) target bundleno = 3 (0x3), region = 87 }

</bundles_post_ra>
